<compile_context>
chip_gen: v6e
topology: v6e:2x2x1
jax: 0.10.0
libtpu: 0.0.40
codegen_flags: <defaults>
</compile_context>

<pallas_src>
import functools

import jax
import jax.numpy as jnp
from jax.experimental import pallas as pl
from jax.experimental.pallas import tpu as pltpu


# ------------------------- fused LSTM + Linear kernel -------------------------
def _make_fused_lstm_kernel(num_layers, seq_len, hidden_size):
    L, T, H = num_layers, seq_len, hidden_size

    def kernel(*refs):
        # --- unpack refs ---
        x_ref = refs[0]                                   # (T, Bb, D0) time-major
        layer_refs = [(refs[1 + 3 * l], refs[2 + 3 * l], refs[3 + 3 * l])
                      for l in range(L)]
        h0_ref, c0_ref, wout_ref, bout_ref = refs[1 + 3 * L: 5 + 3 * L]
        out_ref, hN_ref, cN_ref = refs[5 + 3 * L: 8 + 3 * L]

        Bb = x_ref.shape[1]
        layer_in = x_ref[...]                             # (T, Bb, D0), f32

        for layer, (wih_ref, whh_ref, b_ref) in enumerate(layer_refs):
            D_l = layer_in.shape[-1]

            # ---- hoisted input projection: one (T*Bb, D) @ (D, 4H) bf16 matmul
            xw = jnp.dot(
                layer_in.reshape(T * Bb, D_l).astype(jnp.bfloat16),
                wih_ref[...],                             # (D_l, 4H) bf16
                preferred_element_type=jnp.float32) + b_ref[...]
            xw = xw.reshape(T, Bb, 4 * H)                 # time-major: xw[t] is a
                                                          # clean leading-axis read

            whh = whh_ref[...]                            # (H, 4H) bf16, resident
            h = h0_ref[layer]                             # (Bb, H) f32
            c = c0_ref[layer]                             # (Bb, H) f32

            # Sequential recurrence; only the h @ W_hh dependency is serial.
            hs = []
            for t in range(T):
                gates = xw[t] + jnp.dot(
                    h.astype(jnp.bfloat16), whh,
                    preferred_element_type=jnp.float32)   # (Bb, 4H) f32
                # With H a multiple of 128 these slices are lane-aligned views.
                i_g = jax.nn.sigmoid(gates[:, 0 * H:1 * H])
                f_g = jax.nn.sigmoid(gates[:, 1 * H:2 * H])
                g_g = jnp.tanh(gates[:, 2 * H:3 * H])
                o_g = jax.nn.sigmoid(gates[:, 3 * H:4 * H])
                c = f_g * c + i_g * g_g                   # f32 cell state
                h = o_g * jnp.tanh(c)
                hs.append(h)                              # stays in vregs

            hN_ref[layer] = h
            cN_ref[layer] = c
            layer_in = jnp.stack(hs, axis=0)              # (T, Bb, H), time-major

        # ---- fused final Linear: one (T*Bb, H) @ (H, O) bf16 matmul ----
        y = jnp.dot(layer_in.reshape(T * Bb, H).astype(jnp.bfloat16),
                    wout_ref[...],
                    preferred_element_type=jnp.float32) + bout_ref[...]
        out_ref[...] = y.reshape(T, Bb, -1).astype(out_ref.dtype)  # single store

    return kernel


def _full_spec(arr):
    """Whole-array block, constant across the batch grid (weights / biases)."""
    nd = arr.ndim
    return pl.BlockSpec(arr.shape, lambda b: (0,) * nd)


# -------------------------- one-time parameter prep ---------------------------
def prepare_params(params):
    """Pre-transpose, fold biases and cast MXU operands to bf16 (done once,
    outside the jitted forward -> no per-call transpose/cast work)."""
    prep = {"layers": []}
    for p in params["lstm"]:
        prep["layers"].append({
            "w_ih_t": jnp.transpose(p["w_ih"]).astype(jnp.bfloat16),   # (D_l, 4H)
            "w_hh_t": jnp.transpose(p["w_hh"]).astype(jnp.bfloat16),   # (H, 4H)
            "b": (p["b_ih"] + p["b_hh"]).reshape(1, -1).astype(jnp.float32),
        })
    prep["w_out_t"] = jnp.transpose(params["linear"]["w"]).astype(jnp.bfloat16)  # (H,O)
    prep["b_out"] = params["linear"]["b"].reshape(1, -1).astype(jnp.float32)     # (1,O)
    return prep


# --------------------------------- forward ------------------------------------
def lstm_module_forward(prep, x, hidden, *, block_batch=8):
    """Equivalent of LSTM.forward(x, hidden) -> (out, (h_n, c_n))."""
    h0, c0 = hidden
    B, T, D = x.shape
    L = len(prep["layers"])
    H = h0.shape[-1]
    O = prep["b_out"].shape[-1]

    # Batch-block grid (sharding lever for v7x's 2 TensorCores).  For production
    # PPO rollouts, fuse enough environments so B >= 32-64 and B % 8 == 0.
    Bb = block_batch if (B % block_batch == 0) else B
    grid = (B // Bb,)

    # Layout plumbing only: present the sequence time-major to the kernel so the
    # recurrence reads xw[t] as a leading-axis index and writes one dense block.
    x_tm = jnp.transpose(x, (1, 0, 2))                    # (T, B, D)

    inputs = [x_tm]
    in_specs = [pl.BlockSpec((T, Bb, D), lambda b: (0, b, 0))]
    for lp in prep["layers"]:
        for w in (lp["w_ih_t"], lp["w_hh_t"], lp["b"]):
            inputs.append(w)
            in_specs.append(_full_spec(w))
    h0_idx = len(inputs)
    inputs.append(h0)
    in_specs.append(pl.BlockSpec((L, Bb, H), lambda b: (0, b, 0)))
    c0_idx = len(inputs)
    inputs.append(c0)
    in_specs.append(pl.BlockSpec((L, Bb, H), lambda b: (0, b, 0)))
    inputs.append(prep["w_out_t"])
    in_specs.append(_full_spec(prep["w_out_t"]))
    inputs.append(prep["b_out"])
    in_specs.append(_full_spec(prep["b_out"]))

    kernel = _make_fused_lstm_kernel(L, T, H)
    out_tm, hN, cN = pl.pallas_call(
        kernel,
        out_shape=(
            jax.ShapeDtypeStruct((T, B, O), jnp.float32),
            jax.ShapeDtypeStruct((L, B, H), jnp.float32),
            jax.ShapeDtypeStruct((L, B, H), jnp.float32),
        ),
        grid=grid,
        in_specs=in_specs,
        out_specs=(
            pl.BlockSpec((T, Bb, O), lambda b: (0, b, 0)),
            pl.BlockSpec((L, Bb, H), lambda b: (0, b, 0)),
            pl.BlockSpec((L, Bb, H), lambda b: (0, b, 0)),
        ),
        # h0 -> h_n, c0 -> c_n alias (identical shape/dtype, identical specs).
        input_output_aliases={h0_idx: 1, c0_idx: 2},
        compiler_params=pltpu.CompilerParams(
            dimension_semantics=("parallel",)),
    )(*inputs)

    out = jnp.transpose(out_tm, (1, 0, 2))                # back to (B, T, O)
    return out, (hN, cN)


# ------------------------------- Module wrapper --------------------------------
def init_params(key, input_dim, output_dim, hidden_size, num_layers):
    """Deterministic init mimicking PyTorch's U(-1/sqrt(H), 1/sqrt(H))."""
    k = 1.0 / jnp.sqrt(jnp.float32(hidden_size))
    params = {"lstm": [], "linear": {}}
    for layer in range(num_layers):
        d_in = input_dim if layer == 0 else hidden_size
        key, k1, k2, k3, k4 = jax.random.split(key, 5)
        params["lstm"].append({
            "w_ih": jax.random.uniform(k1, (4 * hidden_size, d_in),
                                       jnp.float32, -k, k),
            "w_hh": jax.random.uniform(k2, (4 * hidden_size, hidden_size),
                                       jnp.float32, -k, k),
            "b_ih": jax.random.uniform(k3, (4 * hidden_size,),
                                       jnp.float32, -k, k),
            "b_hh": jax.random.uniform(k4, (4 * hidden_size,),
                                       jnp.float32, -k, k),
        })
    key, k1, k2 = jax.random.split(key, 3)
    kl = 1.0 / jnp.sqrt(jnp.float32(hidden_size))  # num_direct = 1
    params["linear"]["w"] = jax.random.uniform(
        k1, (output_dim, hidden_size), jnp.float32, -kl, kl)
    params["linear"]["b"] = jax.random.uniform(
        k2, (output_dim,), jnp.float32, -kl, kl)
    return params


def init_h_c_state(num_layers, batch_size, hidden_size):
    return (jnp.zeros((num_layers, batch_size, hidden_size), jnp.float32),
            jnp.zeros((num_layers, batch_size, hidden_size), jnp.float32))


# ------------------------------ Pure-JAX reference -----------------------------
def _reference_forward(params, x, hidden):
    h0_all, c0_all = hidden
    layer_in = x
    h_fs, c_fs = [], []
    for layer_idx, p in enumerate(params["lstm"]):
        def cell(carry, x_t, p=p):
            h, c = carry
            gates = x_t @ p["w_ih"].T + p["b_ih"] + h @ p["w_hh"].T + p["b_hh"]
            H = h.shape[-1]
            i = jax.nn.sigmoid(gates[:, :H])
            f = jax.nn.sigmoid(gates[:, H:2 * H])
            g = jnp.tanh(gates[:, 2 * H:3 * H])
            o = jax.nn.sigmoid(gates[:, 3 * H:])
            c_new = f * c + i * g
            h_new = o * jnp.tanh(c_new)
            return (h_new, c_new), h_new
        (hN, cN), seq = jax.lax.scan(
            cell, (h0_all[layer_idx], c0_all[layer_idx]),
            jnp.transpose(layer_in, (1, 0, 2)))
        layer_in = jnp.transpose(seq, (1, 0, 2))
        h_fs.append(hN)
        c_fs.append(cN)
    out = layer_in @ params["linear"]["w"].T + params["linear"]["b"]
    return out, (jnp.stack(h_fs), jnp.stack(c_fs))


# ------------------------------------ main -------------------------------------
if __name__ == "__main__":
    # Small, MXU/vreg-friendly config: B multiple of 8 sublanes, H=128 so gate
    # slices are lane-aligned and 4H=512 is a multiple of the MXU tile width.
    input_dim, output_dim, hidden_size, num_layers = 16, 8, 128, 2
    batch, seq = 16, 8

    key = jax.random.PRNGKey(0)
    key, kx = jax.random.split(key)
    params = init_params(key, input_dim, output_dim, hidden_size, num_layers)
    x = jax.random.normal(kx, (batch, seq, input_dim), jnp.float32)
    hidden = init_h_c_state(num_layers, batch, hidden_size)

    # Pure-JAX f32 reference (computed first, straight from the raw params).
    ref_out, (ref_h, ref_c) = _reference_forward(params, x, hidden)

    prep = prepare_params(params)          # one-time transpose / fold / bf16 cast
    fwd = jax.jit(functools.partial(lstm_module_forward, prep))
    out, (h_n, c_n) = fwd(x, hidden)
    jax.block_until_ready((out, h_n, c_n))

    assert out.shape == (batch, seq, output_dim)
    assert h_n.shape == (num_layers, batch, hidden_size)
    assert c_n.shape == (num_layers, batch, hidden_size)
    # bf16 MXU operands (f32 accumulate / f32 cell state) -> relaxed tolerance.
    assert jnp.allclose(out, ref_out, rtol=5e-2, atol=5e-2)
    assert jnp.allclose(h_n, ref_h, rtol=5e-2, atol=5e-2)
    assert jnp.allclose(c_n, ref_c, rtol=5e-2, atol=5e-2)

    print("KERNEL_OK")
</pallas_src>

<mosaic_0001>
module attributes {stable_mosaic.version = 11 : i64} {
  func.func @kernel(%arg0: i32, %arg1: memref<8x8x16xf32, #tpu.memory_space<vmem>>, %arg2: memref<16x512xbf16, #tpu.memory_space<vmem>>, %arg3: memref<128x512xbf16, #tpu.memory_space<vmem>>, %arg4: memref<1x512xf32, #tpu.memory_space<vmem>>, %arg5: memref<128x512xbf16, #tpu.memory_space<vmem>>, %arg6: memref<128x512xbf16, #tpu.memory_space<vmem>>, %arg7: memref<1x512xf32, #tpu.memory_space<vmem>>, %arg8: memref<2x8x128xf32, #tpu.memory_space<vmem>>, %arg9: memref<2x8x128xf32, #tpu.memory_space<vmem>>, %arg10: memref<128x8xbf16, #tpu.memory_space<vmem>>, %arg11: memref<1x8xf32, #tpu.memory_space<vmem>>, %arg12: memref<8x8x8xf32, #tpu.memory_space<vmem>>, %arg13: memref<2x8x128xf32, #tpu.memory_space<vmem>>, %arg14: memref<2x8x128xf32, #tpu.memory_space<vmem>>) attributes {dimension_semantics = [#tpu.dimension_semantics<parallel>], iteration_bounds = array<i64: 2>, scalar_prefetch = 0 : i64, scratch_operands = 0 : i64, tpu.core_type = #tpu.core_type<tc>, window_params = [{transform_indices = @transform_0, window_bounds = array<i64: 8, 8, 16>}, {pipeline_mode = #tpu.pipeline_mode<synchronous>, transform_indices = @transform_1, window_bounds = array<i64: 16, 512>}, {pipeline_mode = #tpu.pipeline_mode<synchronous>, transform_indices = @transform_2, window_bounds = array<i64: 128, 512>}, {pipeline_mode = #tpu.pipeline_mode<synchronous>, transform_indices = @transform_3, window_bounds = array<i64: 1, 512>}, {pipeline_mode = #tpu.pipeline_mode<synchronous>, transform_indices = @transform_4, window_bounds = array<i64: 128, 512>}, {pipeline_mode = #tpu.pipeline_mode<synchronous>, transform_indices = @transform_5, window_bounds = array<i64: 128, 512>}, {pipeline_mode = #tpu.pipeline_mode<synchronous>, transform_indices = @transform_6, window_bounds = array<i64: 1, 512>}, {transform_indices = @transform_7, window_bounds = array<i64: 2, 8, 128>}, {transform_indices = @transform_8, window_bounds = array<i64: 2, 8, 128>}, {pipeline_mode = #tpu.pipeline_mode<synchronous>, transform_indices = @transform_9, window_bounds = array<i64: 128, 8>}, {pipeline_mode = #tpu.pipeline_mode<synchronous>, transform_indices = @transform_10, window_bounds = array<i64: 1, 8>}, {transform_indices = @transform_11, window_bounds = array<i64: 8, 8, 8>}, {transform_indices = @transform_12, window_bounds = array<i64: 2, 8, 128>}, {transform_indices = @transform_13, window_bounds = array<i64: 2, 8, 128>}]} {
    %c0 = arith.constant 0 : index
    %c0_0 = arith.constant 0 : index
    %c0_1 = arith.constant 0 : index
    %0 = vector.load %arg1[%c0, %c0_0, %c0_1] : memref<8x8x16xf32, #tpu.memory_space<vmem>>, vector<8x8x16xf32>
    %1 = vector.shape_cast %0 : vector<8x8x16xf32> to vector<64x16xf32>
    %2 = arith.truncf %1 : vector<64x16xf32> to vector<64x16xbf16>
    %c0_2 = arith.constant 0 : index
    %c0_3 = arith.constant 0 : index
    %3 = vector.load %arg2[%c0_2, %c0_3] : memref<16x512xbf16, #tpu.memory_space<vmem>>, vector<16x512xbf16>
    %cst = arith.constant dense<0.000000e+00> : vector<64x512xf32>
    %4 = tpu.matmul %2, %3, %cst {dimension_numbers = #tpu.dot_dimension_numbers<[1], [0], [0], [1], [0, 0, 1, 1], [], []>} : vector<64x16xbf16>, vector<16x512xbf16>, vector<64x512xf32> -> vector<64x512xf32>
    %c0_4 = arith.constant 0 : index
    %c0_5 = arith.constant 0 : index
    %5 = vector.load %arg4[%c0_4, %c0_5] : memref<1x512xf32, #tpu.memory_space<vmem>>, vector<1x512xf32>
    %6 = vector.broadcast %5 : vector<1x512xf32> to vector<64x512xf32>
    %7 = arith.addf %4, %6 : vector<64x512xf32>
    %8 = vector.shape_cast %7 : vector<64x512xf32> to vector<8x8x512xf32>
    %c0_6 = arith.constant 0 : index
    %c0_7 = arith.constant 0 : index
    %9 = vector.load %arg3[%c0_6, %c0_7] : memref<128x512xbf16, #tpu.memory_space<vmem>>, vector<128x512xbf16>
    %c0_8 = arith.constant 0 : index
    %c0_9 = arith.constant 0 : index
    %c0_10 = arith.constant 0 : index
    %10 = vector.load %arg8[%c0_8, %c0_9, %c0_10] : memref<2x8x128xf32, #tpu.memory_space<vmem>>, vector<1x8x128xf32>
    %11 = vector.shape_cast %10 : vector<1x8x128xf32> to vector<8x128xf32>
    %c0_11 = arith.constant 0 : index
    %c0_12 = arith.constant 0 : index
    %c0_13 = arith.constant 0 : index
    %12 = vector.load %arg9[%c0_11, %c0_12, %c0_13] : memref<2x8x128xf32, #tpu.memory_space<vmem>>, vector<1x8x128xf32>
    %13 = vector.shape_cast %12 : vector<1x8x128xf32> to vector<8x128xf32>
    %14 = vector.extract_strided_slice %8 {offsets = [0, 0, 0], sizes = [1, 8, 512], strides = [1, 1, 1]} : vector<8x8x512xf32> to vector<1x8x512xf32>
    %15 = vector.shape_cast %14 : vector<1x8x512xf32> to vector<8x512xf32>
    %16 = arith.truncf %11 : vector<8x128xf32> to vector<8x128xbf16>
    %cst_14 = arith.constant dense<0.000000e+00> : vector<8x512xf32>
    %17 = tpu.matmul %16, %9, %cst_14 {dimension_numbers = #tpu.dot_dimension_numbers<[1], [0], [0], [1], [0, 0, 1, 1], [], []>} : vector<8x128xbf16>, vector<128x512xbf16>, vector<8x512xf32> -> vector<8x512xf32>
    %18 = arith.addf %15, %17 : vector<8x512xf32>
    %19 = vector.extract_strided_slice %18 {offsets = [0, 0], sizes = [8, 128], strides = [1, 1]} : vector<8x512xf32> to vector<8x128xf32>
    %20 = arith.negf %19 : vector<8x128xf32>
    %21 = math.exp %20 : vector<8x128xf32>
    %cst_15 = arith.constant 1.000000e+00 : f32
    %22 = vector.broadcast %cst_15 : f32 to vector<8x128xf32>
    %23 = arith.addf %22, %21 : vector<8x128xf32>
    %24 = arith.divf %22, %23 : vector<8x128xf32>
    %25 = vector.extract_strided_slice %18 {offsets = [0, 128], sizes = [8, 128], strides = [1, 1]} : vector<8x512xf32> to vector<8x128xf32>
    %26 = arith.negf %25 : vector<8x128xf32>
    %27 = math.exp %26 : vector<8x128xf32>
    %cst_16 = arith.constant 1.000000e+00 : f32
    %28 = vector.broadcast %cst_16 : f32 to vector<8x128xf32>
    %29 = arith.addf %28, %27 : vector<8x128xf32>
    %30 = arith.divf %28, %29 : vector<8x128xf32>
    %31 = vector.extract_strided_slice %18 {offsets = [0, 256], sizes = [8, 128], strides = [1, 1]} : vector<8x512xf32> to vector<8x128xf32>
    %32 = math.tanh %31 : vector<8x128xf32>
    %33 = vector.extract_strided_slice %18 {offsets = [0, 384], sizes = [8, 128], strides = [1, 1]} : vector<8x512xf32> to vector<8x128xf32>
    %34 = arith.negf %33 : vector<8x128xf32>
    %35 = math.exp %34 : vector<8x128xf32>
    %cst_17 = arith.constant 1.000000e+00 : f32
    %36 = vector.broadcast %cst_17 : f32 to vector<8x128xf32>
    %37 = arith.addf %36, %35 : vector<8x128xf32>
    %38 = arith.divf %36, %37 : vector<8x128xf32>
    %39 = arith.mulf %30, %13 : vector<8x128xf32>
    %40 = arith.mulf %24, %32 : vector<8x128xf32>
    %41 = arith.addf %39, %40 : vector<8x128xf32>
    %42 = math.tanh %41 : vector<8x128xf32>
    %43 = arith.mulf %38, %42 : vector<8x128xf32>
    %44 = vector.extract_strided_slice %8 {offsets = [1, 0, 0], sizes = [1, 8, 512], strides = [1, 1, 1]} : vector<8x8x512xf32> to vector<1x8x512xf32>
    %45 = vector.shape_cast %44 : vector<1x8x512xf32> to vector<8x512xf32>
    %46 = arith.truncf %43 : vector<8x128xf32> to vector<8x128xbf16>
    %cst_18 = arith.constant dense<0.000000e+00> : vector<8x512xf32>
    %47 = tpu.matmul %46, %9, %cst_18 {dimension_numbers = #tpu.dot_dimension_numbers<[1], [0], [0], [1], [0, 0, 1, 1], [], []>} : vector<8x128xbf16>, vector<128x512xbf16>, vector<8x512xf32> -> vector<8x512xf32>
    %48 = arith.addf %45, %47 : vector<8x512xf32>
    %49 = vector.extract_strided_slice %48 {offsets = [0, 0], sizes = [8, 128], strides = [1, 1]} : vector<8x512xf32> to vector<8x128xf32>
    %50 = arith.negf %49 : vector<8x128xf32>
    %51 = math.exp %50 : vector<8x128xf32>
    %cst_19 = arith.constant 1.000000e+00 : f32
    %52 = vector.broadcast %cst_19 : f32 to vector<8x128xf32>
    %53 = arith.addf %52, %51 : vector<8x128xf32>
    %54 = arith.divf %52, %53 : vector<8x128xf32>
    %55 = vector.extract_strided_slice %48 {offsets = [0, 128], sizes = [8, 128], strides = [1, 1]} : vector<8x512xf32> to vector<8x128xf32>
    %56 = arith.negf %55 : vector<8x128xf32>
    %57 = math.exp %56 : vector<8x128xf32>
    %cst_20 = arith.constant 1.000000e+00 : f32
    %58 = vector.broadcast %cst_20 : f32 to vector<8x128xf32>
    %59 = arith.addf %58, %57 : vector<8x128xf32>
    %60 = arith.divf %58, %59 : vector<8x128xf32>
    %61 = vector.extract_strided_slice %48 {offsets = [0, 256], sizes = [8, 128], strides = [1, 1]} : vector<8x512xf32> to vector<8x128xf32>
    %62 = math.tanh %61 : vector<8x128xf32>
    %63 = vector.extract_strided_slice %48 {offsets = [0, 384], sizes = [8, 128], strides = [1, 1]} : vector<8x512xf32> to vector<8x128xf32>
    %64 = arith.negf %63 : vector<8x128xf32>
    %65 = math.exp %64 : vector<8x128xf32>
    %cst_21 = arith.constant 1.000000e+00 : f32
    %66 = vector.broadcast %cst_21 : f32 to vector<8x128xf32>
    %67 = arith.addf %66, %65 : vector<8x128xf32>
    %68 = arith.divf %66, %67 : vector<8x128xf32>
    %69 = arith.mulf %60, %41 : vector<8x128xf32>
    %70 = arith.mulf %54, %62 : vector<8x128xf32>
    %71 = arith.addf %69, %70 : vector<8x128xf32>
    %72 = math.tanh %71 : vector<8x128xf32>
    %73 = arith.mulf %68, %72 : vector<8x128xf32>
    %74 = vector.extract_strided_slice %8 {offsets = [2, 0, 0], sizes = [1, 8, 512], strides = [1, 1, 1]} : vector<8x8x512xf32> to vector<1x8x512xf32>
    %75 = vector.shape_cast %74 : vector<1x8x512xf32> to vector<8x512xf32>
    %76 = arith.truncf %73 : vector<8x128xf32> to vector<8x128xbf16>
    %cst_22 = arith.constant dense<0.000000e+00> : vector<8x512xf32>
    %77 = tpu.matmul %76, %9, %cst_22 {dimension_numbers = #tpu.dot_dimension_numbers<[1], [0], [0], [1], [0, 0, 1, 1], [], []>} : vector<8x128xbf16>, vector<128x512xbf16>, vector<8x512xf32> -> vector<8x512xf32>
    %78 = arith.addf %75, %77 : vector<8x512xf32>
    %79 = vector.extract_strided_slice %78 {offsets = [0, 0], sizes = [8, 128], strides = [1, 1]} : vector<8x512xf32> to vector<8x128xf32>
    %80 = arith.negf %79 : vector<8x128xf32>
    %81 = math.exp %80 : vector<8x128xf32>
    %cst_23 = arith.constant 1.000000e+00 : f32
    %82 = vector.broadcast %cst_23 : f32 to vector<8x128xf32>
    %83 = arith.addf %82, %81 : vector<8x128xf32>
    %84 = arith.divf %82, %83 : vector<8x128xf32>
    %85 = vector.extract_strided_slice %78 {offsets = [0, 128], sizes = [8, 128], strides = [1, 1]} : vector<8x512xf32> to vector<8x128xf32>
    %86 = arith.negf %85 : vector<8x128xf32>
    %87 = math.exp %86 : vector<8x128xf32>
    %cst_24 = arith.constant 1.000000e+00 : f32
    %88 = vector.broadcast %cst_24 : f32 to vector<8x128xf32>
    %89 = arith.addf %88, %87 : vector<8x128xf32>
    %90 = arith.divf %88, %89 : vector<8x128xf32>
    %91 = vector.extract_strided_slice %78 {offsets = [0, 256], sizes = [8, 128], strides = [1, 1]} : vector<8x512xf32> to vector<8x128xf32>
    %92 = math.tanh %91 : vector<8x128xf32>
    %93 = vector.extract_strided_slice %78 {offsets = [0, 384], sizes = [8, 128], strides = [1, 1]} : vector<8x512xf32> to vector<8x128xf32>
    %94 = arith.negf %93 : vector<8x128xf32>
    %95 = math.exp %94 : vector<8x128xf32>
    %cst_25 = arith.constant 1.000000e+00 : f32
    %96 = vector.broadcast %cst_25 : f32 to vector<8x128xf32>
    %97 = arith.addf %96, %95 : vector<8x128xf32>
    %98 = arith.divf %96, %97 : vector<8x128xf32>
    %99 = arith.mulf %90, %71 : vector<8x128xf32>
    %100 = arith.mulf %84, %92 : vector<8x128xf32>
    %101 = arith.addf %99, %100 : vector<8x128xf32>
    %102 = math.tanh %101 : vector<8x128xf32>
    %103 = arith.mulf %98, %102 : vector<8x128xf32>
    %104 = vector.extract_strided_slice %8 {offsets = [3, 0, 0], sizes = [1, 8, 512], strides = [1, 1, 1]} : vector<8x8x512xf32> to vector<1x8x512xf32>
    %105 = vector.shape_cast %104 : vector<1x8x512xf32> to vector<8x512xf32>
    %106 = arith.truncf %103 : vector<8x128xf32> to vector<8x128xbf16>
    %cst_26 = arith.constant dense<0.000000e+00> : vector<8x512xf32>
    %107 = tpu.matmul %106, %9, %cst_26 {dimension_numbers = #tpu.dot_dimension_numbers<[1], [0], [0], [1], [0, 0, 1, 1], [], []>} : vector<8x128xbf16>, vector<128x512xbf16>, vector<8x512xf32> -> vector<8x512xf32>
    %108 = arith.addf %105, %107 : vector<8x512xf32>
    %109 = vector.extract_strided_slice %108 {offsets = [0, 0], sizes = [8, 128], strides = [1, 1]} : vector<8x512xf32> to vector<8x128xf32>
    %110 = arith.negf %109 : vector<8x128xf32>
    %111 = math.exp %110 : vector<8x128xf32>
    %cst_27 = arith.constant 1.000000e+00 : f32
    %112 = vector.broadcast %cst_27 : f32 to vector<8x128xf32>
    %113 = arith.addf %112, %111 : vector<8x128xf32>
    %114 = arith.divf %112, %113 : vector<8x128xf32>
    %115 = vector.extract_strided_slice %108 {offsets = [0, 128], sizes = [8, 128], strides = [1, 1]} : vector<8x512xf32> to vector<8x128xf32>
    %116 = arith.negf %115 : vector<8x128xf32>
    %117 = math.exp %116 : vector<8x128xf32>
    %cst_28 = arith.constant 1.000000e+00 : f32
    %118 = vector.broadcast %cst_28 : f32 to vector<8x128xf32>
    %119 = arith.addf %118, %117 : vector<8x128xf32>
    %120 = arith.divf %118, %119 : vector<8x128xf32>
    %121 = vector.extract_strided_slice %108 {offsets = [0, 256], sizes = [8, 128], strides = [1, 1]} : vector<8x512xf32> to vector<8x128xf32>
    %122 = math.tanh %121 : vector<8x128xf32>
    %123 = vector.extract_strided_slice %108 {offsets = [0, 384], sizes = [8, 128], strides = [1, 1]} : vector<8x512xf32> to vector<8x128xf32>
    %124 = arith.negf %123 : vector<8x128xf32>
    %125 = math.exp %124 : vector<8x128xf32>
    %cst_29 = arith.constant 1.000000e+00 : f32
    %126 = vector.broadcast %cst_29 : f32 to vector<8x128xf32>
    %127 = arith.addf %126, %125 : vector<8x128xf32>
    %128 = arith.divf %126, %127 : vector<8x128xf32>
    %129 = arith.mulf %120, %101 : vector<8x128xf32>
    %130 = arith.mulf %114, %122 : vector<8x128xf32>
    %131 = arith.addf %129, %130 : vector<8x128xf32>
    %132 = math.tanh %131 : vector<8x128xf32>
    %133 = arith.mulf %128, %132 : vector<8x128xf32>
    %134 = vector.extract_strided_slice %8 {offsets = [4, 0, 0], sizes = [1, 8, 512], strides = [1, 1, 1]} : vector<8x8x512xf32> to vector<1x8x512xf32>
    %135 = vector.shape_cast %134 : vector<1x8x512xf32> to vector<8x512xf32>
    %136 = arith.truncf %133 : vector<8x128xf32> to vector<8x128xbf16>
    %cst_30 = arith.constant dense<0.000000e+00> : vector<8x512xf32>
    %137 = tpu.matmul %136, %9, %cst_30 {dimension_numbers = #tpu.dot_dimension_numbers<[1], [0], [0], [1], [0, 0, 1, 1], [], []>} : vector<8x128xbf16>, vector<128x512xbf16>, vector<8x512xf32> -> vector<8x512xf32>
    %138 = arith.addf %135, %137 : vector<8x512xf32>
    %139 = vector.extract_strided_slice %138 {offsets = [0, 0], sizes = [8, 128], strides = [1, 1]} : vector<8x512xf32> to vector<8x128xf32>
    %140 = arith.negf %139 : vector<8x128xf32>
    %141 = math.exp %140 : vector<8x128xf32>
    %cst_31 = arith.constant 1.000000e+00 : f32
    %142 = vector.broadcast %cst_31 : f32 to vector<8x128xf32>
    %143 = arith.addf %142, %141 : vector<8x128xf32>
    %144 = arith.divf %142, %143 : vector<8x128xf32>
    %145 = vector.extract_strided_slice %138 {offsets = [0, 128], sizes = [8, 128], strides = [1, 1]} : vector<8x512xf32> to vector<8x128xf32>
    %146 = arith.negf %145 : vector<8x128xf32>
    %147 = math.exp %146 : vector<8x128xf32>
    %cst_32 = arith.constant 1.000000e+00 : f32
    %148 = vector.broadcast %cst_32 : f32 to vector<8x128xf32>
    %149 = arith.addf %148, %147 : vector<8x128xf32>
    %150 = arith.divf %148, %149 : vector<8x128xf32>
    %151 = vector.extract_strided_slice %138 {offsets = [0, 256], sizes = [8, 128], strides = [1, 1]} : vector<8x512xf32> to vector<8x128xf32>
    %152 = math.tanh %151 : vector<8x128xf32>
    %153 = vector.extract_strided_slice %138 {offsets = [0, 384], sizes = [8, 128], strides = [1, 1]} : vector<8x512xf32> to vector<8x128xf32>
    %154 = arith.negf %153 : vector<8x128xf32>
    %155 = math.exp %154 : vector<8x128xf32>
    %cst_33 = arith.constant 1.000000e+00 : f32
    %156 = vector.broadcast %cst_33 : f32 to vector<8x128xf32>
    %157 = arith.addf %156, %155 : vector<8x128xf32>
    %158 = arith.divf %156, %157 : vector<8x128xf32>
    %159 = arith.mulf %150, %131 : vector<8x128xf32>
    %160 = arith.mulf %144, %152 : vector<8x128xf32>
    %161 = arith.addf %159, %160 : vector<8x128xf32>
    %162 = math.tanh %161 : vector<8x128xf32>
    %163 = arith.mulf %158, %162 : vector<8x128xf32>
    %164 = vector.extract_strided_slice %8 {offsets = [5, 0, 0], sizes = [1, 8, 512], strides = [1, 1, 1]} : vector<8x8x512xf32> to vector<1x8x512xf32>
    %165 = vector.shape_cast %164 : vector<1x8x512xf32> to vector<8x512xf32>
    %166 = arith.truncf %163 : vector<8x128xf32> to vector<8x128xbf16>
    %cst_34 = arith.constant dense<0.000000e+00> : vector<8x512xf32>
    %167 = tpu.matmul %166, %9, %cst_34 {dimension_numbers = #tpu.dot_dimension_numbers<[1], [0], [0], [1], [0, 0, 1, 1], [], []>} : vector<8x128xbf16>, vector<128x512xbf16>, vector<8x512xf32> -> vector<8x512xf32>
    %168 = arith.addf %165, %167 : vector<8x512xf32>
    %169 = vector.extract_strided_slice %168 {offsets = [0, 0], sizes = [8, 128], strides = [1, 1]} : vector<8x512xf32> to vector<8x128xf32>
    %170 = arith.negf %169 : vector<8x128xf32>
    %171 = math.exp %170 : vector<8x128xf32>
    %cst_35 = arith.constant 1.000000e+00 : f32
    %172 = vector.broadcast %cst_35 : f32 to vector<8x128xf32>
    %173 = arith.addf %172, %171 : vector<8x128xf32>
    %174 = arith.divf %172, %173 : vector<8x128xf32>
    %175 = vector.extract_strided_slice %168 {offsets = [0, 128], sizes = [8, 128], strides = [1, 1]} : vector<8x512xf32> to vector<8x128xf32>
    %176 = arith.negf %175 : vector<8x128xf32>
    %177 = math.exp %176 : vector<8x128xf32>
    %cst_36 = arith.constant 1.000000e+00 : f32
    %178 = vector.broadcast %cst_36 : f32 to vector<8x128xf32>
    %179 = arith.addf %178, %177 : vector<8x128xf32>
    %180 = arith.divf %178, %179 : vector<8x128xf32>
    %181 = vector.extract_strided_slice %168 {offsets = [0, 256], sizes = [8, 128], strides = [1, 1]} : vector<8x512xf32> to vector<8x128xf32>
    %182 = math.tanh %181 : vector<8x128xf32>
    %183 = vector.extract_strided_slice %168 {offsets = [0, 384], sizes = [8, 128], strides = [1, 1]} : vector<8x512xf32> to vector<8x128xf32>
    %184 = arith.negf %183 : vector<8x128xf32>
    %185 = math.exp %184 : vector<8x128xf32>
    %cst_37 = arith.constant 1.000000e+00 : f32
    %186 = vector.broadcast %cst_37 : f32 to vector<8x128xf32>
    %187 = arith.addf %186, %185 : vector<8x128xf32>
    %188 = arith.divf %186, %187 : vector<8x128xf32>
    %189 = arith.mulf %180, %161 : vector<8x128xf32>
    %190 = arith.mulf %174, %182 : vector<8x128xf32>
    %191 = arith.addf %189, %190 : vector<8x128xf32>
    %192 = math.tanh %191 : vector<8x128xf32>
    %193 = arith.mulf %188, %192 : vector<8x128xf32>
    %194 = vector.extract_strided_slice %8 {offsets = [6, 0, 0], sizes = [1, 8, 512], strides = [1, 1, 1]} : vector<8x8x512xf32> to vector<1x8x512xf32>
    %195 = vector.shape_cast %194 : vector<1x8x512xf32> to vector<8x512xf32>
    %196 = arith.truncf %193 : vector<8x128xf32> to vector<8x128xbf16>
    %cst_38 = arith.constant dense<0.000000e+00> : vector<8x512xf32>
    %197 = tpu.matmul %196, %9, %cst_38 {dimension_numbers = #tpu.dot_dimension_numbers<[1], [0], [0], [1], [0, 0, 1, 1], [], []>} : vector<8x128xbf16>, vector<128x512xbf16>, vector<8x512xf32> -> vector<8x512xf32>
    %198 = arith.addf %195, %197 : vector<8x512xf32>
    %199 = vector.extract_strided_slice %198 {offsets = [0, 0], sizes = [8, 128], strides = [1, 1]} : vector<8x512xf32> to vector<8x128xf32>
    %200 = arith.negf %199 : vector<8x128xf32>
    %201 = math.exp %200 : vector<8x128xf32>
    %cst_39 = arith.constant 1.000000e+00 : f32
    %202 = vector.broadcast %cst_39 : f32 to vector<8x128xf32>
    %203 = arith.addf %202, %201 : vector<8x128xf32>
    %204 = arith.divf %202, %203 : vector<8x128xf32>
    %205 = vector.extract_strided_slice %198 {offsets = [0, 128], sizes = [8, 128], strides = [1, 1]} : vector<8x512xf32> to vector<8x128xf32>
    %206 = arith.negf %205 : vector<8x128xf32>
    %207 = math.exp %206 : vector<8x128xf32>
    %cst_40 = arith.constant 1.000000e+00 : f32
    %208 = vector.broadcast %cst_40 : f32 to vector<8x128xf32>
    %209 = arith.addf %208, %207 : vector<8x128xf32>
    %210 = arith.divf %208, %209 : vector<8x128xf32>
    %211 = vector.extract_strided_slice %198 {offsets = [0, 256], sizes = [8, 128], strides = [1, 1]} : vector<8x512xf32> to vector<8x128xf32>
    %212 = math.tanh %211 : vector<8x128xf32>
    %213 = vector.extract_strided_slice %198 {offsets = [0, 384], sizes = [8, 128], strides = [1, 1]} : vector<8x512xf32> to vector<8x128xf32>
    %214 = arith.negf %213 : vector<8x128xf32>
    %215 = math.exp %214 : vector<8x128xf32>
    %cst_41 = arith.constant 1.000000e+00 : f32
    %216 = vector.broadcast %cst_41 : f32 to vector<8x128xf32>
    %217 = arith.addf %216, %215 : vector<8x128xf32>
    %218 = arith.divf %216, %217 : vector<8x128xf32>
    %219 = arith.mulf %210, %191 : vector<8x128xf32>
    %220 = arith.mulf %204, %212 : vector<8x128xf32>
    %221 = arith.addf %219, %220 : vector<8x128xf32>
    %222 = math.tanh %221 : vector<8x128xf32>
    %223 = arith.mulf %218, %222 : vector<8x128xf32>
    %224 = vector.extract_strided_slice %8 {offsets = [7, 0, 0], sizes = [1, 8, 512], strides = [1, 1, 1]} : vector<8x8x512xf32> to vector<1x8x512xf32>
    %225 = vector.shape_cast %224 : vector<1x8x512xf32> to vector<8x512xf32>
    %226 = arith.truncf %223 : vector<8x128xf32> to vector<8x128xbf16>
    %cst_42 = arith.constant dense<0.000000e+00> : vector<8x512xf32>
    %227 = tpu.matmul %226, %9, %cst_42 {dimension_numbers = #tpu.dot_dimension_numbers<[1], [0], [0], [1], [0, 0, 1, 1], [], []>} : vector<8x128xbf16>, vector<128x512xbf16>, vector<8x512xf32> -> vector<8x512xf32>
    %228 = arith.addf %225, %227 : vector<8x512xf32>
    %229 = vector.extract_strided_slice %228 {offsets = [0, 0], sizes = [8, 128], strides = [1, 1]} : vector<8x512xf32> to vector<8x128xf32>
    %230 = arith.negf %229 : vector<8x128xf32>
    %231 = math.exp %230 : vector<8x128xf32>
    %cst_43 = arith.constant 1.000000e+00 : f32
    %232 = vector.broadcast %cst_43 : f32 to vector<8x128xf32>
    %233 = arith.addf %232, %231 : vector<8x128xf32>
    %234 = arith.divf %232, %233 : vector<8x128xf32>
    %235 = vector.extract_strided_slice %228 {offsets = [0, 128], sizes = [8, 128], strides = [1, 1]} : vector<8x512xf32> to vector<8x128xf32>
    %236 = arith.negf %235 : vector<8x128xf32>
    %237 = math.exp %236 : vector<8x128xf32>
    %cst_44 = arith.constant 1.000000e+00 : f32
    %238 = vector.broadcast %cst_44 : f32 to vector<8x128xf32>
    %239 = arith.addf %238, %237 : vector<8x128xf32>
    %240 = arith.divf %238, %239 : vector<8x128xf32>
    %241 = vector.extract_strided_slice %228 {offsets = [0, 256], sizes = [8, 128], strides = [1, 1]} : vector<8x512xf32> to vector<8x128xf32>
    %242 = math.tanh %241 : vector<8x128xf32>
    %243 = vector.extract_strided_slice %228 {offsets = [0, 384], sizes = [8, 128], strides = [1, 1]} : vector<8x512xf32> to vector<8x128xf32>
    %244 = arith.negf %243 : vector<8x128xf32>
    %245 = math.exp %244 : vector<8x128xf32>
    %cst_45 = arith.constant 1.000000e+00 : f32
    %246 = vector.broadcast %cst_45 : f32 to vector<8x128xf32>
    %247 = arith.addf %246, %245 : vector<8x128xf32>
    %248 = arith.divf %246, %247 : vector<8x128xf32>
    %249 = arith.mulf %240, %221 : vector<8x128xf32>
    %250 = arith.mulf %234, %242 : vector<8x128xf32>
    %251 = arith.addf %249, %250 : vector<8x128xf32>
    %252 = math.tanh %251 : vector<8x128xf32>
    %253 = arith.mulf %248, %252 : vector<8x128xf32>
    %c0_46 = arith.constant 0 : index
    %c0_47 = arith.constant 0 : index
    %c0_48 = arith.constant 0 : index
    %254 = vector.load %arg13[%c0_46, %c0_47, %c0_48] : memref<2x8x128xf32, #tpu.memory_space<vmem>>, vector<1x8x128xf32>
    %255 = vector.shape_cast %254 : vector<1x8x128xf32> to vector<8x128xf32>
    %256 = vector.shape_cast %253 : vector<8x128xf32> to vector<1x8x128xf32>
    tpu.vector_store %arg13[%c0_46, %c0_47, %c0_48], %256 {strides = array<i32>} : memref<2x8x128xf32, #tpu.memory_space<vmem>>, vector<1x8x128xf32>,
    %c0_49 = arith.constant 0 : index
    %c0_50 = arith.constant 0 : index
    %c0_51 = arith.constant 0 : index
    %257 = vector.load %arg14[%c0_49, %c0_50, %c0_51] : memref<2x8x128xf32, #tpu.memory_space<vmem>>, vector<1x8x128xf32>
    %258 = vector.shape_cast %257 : vector<1x8x128xf32> to vector<8x128xf32>
    %259 = vector.shape_cast %251 : vector<8x128xf32> to vector<1x8x128xf32>
    tpu.vector_store %arg14[%c0_49, %c0_50, %c0_51], %259 {strides = array<i32>} : memref<2x8x128xf32, #tpu.memory_space<vmem>>, vector<1x8x128xf32>,
    %260 = vector.shape_cast %43 : vector<8x128xf32> to vector<1x8x128xf32>
    %261 = vector.shape_cast %73 : vector<8x128xf32> to vector<1x8x128xf32>
    %262 = vector.shape_cast %103 : vector<8x128xf32> to vector<1x8x128xf32>
    %263 = vector.shape_cast %133 : vector<8x128xf32> to vector<1x8x128xf32>
    %264 = vector.shape_cast %163 : vector<8x128xf32> to vector<1x8x128xf32>
    %265 = vector.shape_cast %193 : vector<8x128xf32> to vector<1x8x128xf32>
    %266 = vector.shape_cast %223 : vector<8x128xf32> to vector<1x8x128xf32>
    %267 = vector.shape_cast %253 : vector<8x128xf32> to vector<1x8x128xf32>
    %268 = tpu.concatenate %260, %261, %262, %263, %264, %265, %266, %267 in 0 : vector<1x8x128xf32>, vector<1x8x128xf32>, vector<1x8x128xf32>, vector<1x8x128xf32>, vector<1x8x128xf32>, vector<1x8x128xf32>, vector<1x8x128xf32>, vector<1x8x128xf32> -> vector<8x8x128xf32>
    %269 = vector.shape_cast %268 : vector<8x8x128xf32> to vector<64x128xf32>
    %270 = arith.truncf %269 : vector<64x128xf32> to vector<64x128xbf16>
    %c0_52 = arith.constant 0 : index
    %c0_53 = arith.constant 0 : index
    %271 = vector.load %arg5[%c0_52, %c0_53] : memref<128x512xbf16, #tpu.memory_space<vmem>>, vector<128x512xbf16>
    %cst_54 = arith.constant dense<0.000000e+00> : vector<64x512xf32>
    %272 = tpu.matmul %270, %271, %cst_54 {dimension_numbers = #tpu.dot_dimension_numbers<[1], [0], [0], [1], [0, 0, 1, 1], [], []>} : vector<64x128xbf16>, vector<128x512xbf16>, vector<64x512xf32> -> vector<64x512xf32>
    %c0_55 = arith.constant 0 : index
    %c0_56 = arith.constant 0 : index
    %273 = vector.load %arg7[%c0_55, %c0_56] : memref<1x512xf32, #tpu.memory_space<vmem>>, vector<1x512xf32>
    %274 = vector.broadcast %273 : vector<1x512xf32> to vector<64x512xf32>
    %275 = arith.addf %272, %274 : vector<64x512xf32>
    %276 = vector.shape_cast %275 : vector<64x512xf32> to vector<8x8x512xf32>
    %c0_57 = arith.constant 0 : index
    %c0_58 = arith.constant 0 : index
    %277 = vector.load %arg6[%c0_57, %c0_58] : memref<128x512xbf16, #tpu.memory_space<vmem>>, vector<128x512xbf16>
    %c1 = arith.constant 1 : index
    %c0_59 = arith.constant 0 : index
    %c0_60 = arith.constant 0 : index
    %278 = vector.load %arg8[%c1, %c0_59, %c0_60] : memref<2x8x128xf32, #tpu.memory_space<vmem>>, vector<1x8x128xf32>
    %279 = vector.shape_cast %278 : vector<1x8x128xf32> to vector<8x128xf32>
    %c1_61 = arith.constant 1 : index
    %c0_62 = arith.constant 0 : index
    %c0_63 = arith.constant 0 : index
    %280 = vector.load %arg9[%c1_61, %c0_62, %c0_63] : memref<2x8x128xf32, #tpu.memory_space<vmem>>, vector<1x8x128xf32>
    %281 = vector.shape_cast %280 : vector<1x8x128xf32> to vector<8x128xf32>
    %282 = vector.extract_strided_slice %276 {offsets = [0, 0, 0], sizes = [1, 8, 512], strides = [1, 1, 1]} : vector<8x8x512xf32> to vector<1x8x512xf32>
    %283 = vector.shape_cast %282 : vector<1x8x512xf32> to vector<8x512xf32>
    %284 = arith.truncf %279 : vector<8x128xf32> to vector<8x128xbf16>
    %cst_64 = arith.constant dense<0.000000e+00> : vector<8x512xf32>
    %285 = tpu.matmul %284, %277, %cst_64 {dimension_numbers = #tpu.dot_dimension_numbers<[1], [0], [0], [1], [0, 0, 1, 1], [], []>} : vector<8x128xbf16>, vector<128x512xbf16>, vector<8x512xf32> -> vector<8x512xf32>
    %286 = arith.addf %283, %285 : vector<8x512xf32>
    %287 = vector.extract_strided_slice %286 {offsets = [0, 0], sizes = [8, 128], strides = [1, 1]} : vector<8x512xf32> to vector<8x128xf32>
    %288 = arith.negf %287 : vector<8x128xf32>
    %289 = math.exp %288 : vector<8x128xf32>
    %cst_65 = arith.constant 1.000000e+00 : f32
    %290 = vector.broadcast %cst_65 : f32 to vector<8x128xf32>
    %291 = arith.addf %290, %289 : vector<8x128xf32>
    %292 = arith.divf %290, %291 : vector<8x128xf32>
    %293 = vector.extract_strided_slice %286 {offsets = [0, 128], sizes = [8, 128], strides = [1, 1]} : vector<8x512xf32> to vector<8x128xf32>
    %294 = arith.negf %293 : vector<8x128xf32>
    %295 = math.exp %294 : vector<8x128xf32>
    %cst_66 = arith.constant 1.000000e+00 : f32
    %296 = vector.broadcast %cst_66 : f32 to vector<8x128xf32>
    %297 = arith.addf %296, %295 : vector<8x128xf32>
    %298 = arith.divf %296, %297 : vector<8x128xf32>
    %299 = vector.extract_strided_slice %286 {offsets = [0, 256], sizes = [8, 128], strides = [1, 1]} : vector<8x512xf32> to vector<8x128xf32>
    %300 = math.tanh %299 : vector<8x128xf32>
    %301 = vector.extract_strided_slice %286 {offsets = [0, 384], sizes = [8, 128], strides = [1, 1]} : vector<8x512xf32> to vector<8x128xf32>
    %302 = arith.negf %301 : vector<8x128xf32>
    %303 = math.exp %302 : vector<8x128xf32>
    %cst_67 = arith.constant 1.000000e+00 : f32
    %304 = vector.broadcast %cst_67 : f32 to vector<8x128xf32>
    %305 = arith.addf %304, %303 : vector<8x128xf32>
    %306 = arith.divf %304, %305 : vector<8x128xf32>
    %307 = arith.mulf %298, %281 : vector<8x128xf32>
    %308 = arith.mulf %292, %300 : vector<8x128xf32>
    %309 = arith.addf %307, %308 : vector<8x128xf32>
    %310 = math.tanh %309 : vector<8x128xf32>
    %311 = arith.mulf %306, %310 : vector<8x128xf32>
    %312 = vector.extract_strided_slice %276 {offsets = [1, 0, 0], sizes = [1, 8, 512], strides = [1, 1, 1]} : vector<8x8x512xf32> to vector<1x8x512xf32>
    %313 = vector.shape_cast %312 : vector<1x8x512xf32> to vector<8x512xf32>
    %314 = arith.truncf %311 : vector<8x128xf32> to vector<8x128xbf16>
    %cst_68 = arith.constant dense<0.000000e+00> : vector<8x512xf32>
    %315 = tpu.matmul %314, %277, %cst_68 {dimension_numbers = #tpu.dot_dimension_numbers<[1], [0], [0], [1], [0, 0, 1, 1], [], []>} : vector<8x128xbf16>, vector<128x512xbf16>, vector<8x512xf32> -> vector<8x512xf32>
    %316 = arith.addf %313, %315 : vector<8x512xf32>
    %317 = vector.extract_strided_slice %316 {offsets = [0, 0], sizes = [8, 128], strides = [1, 1]} : vector<8x512xf32> to vector<8x128xf32>
    %318 = arith.negf %317 : vector<8x128xf32>
    %319 = math.exp %318 : vector<8x128xf32>
    %cst_69 = arith.constant 1.000000e+00 : f32
    %320 = vector.broadcast %cst_69 : f32 to vector<8x128xf32>
    %321 = arith.addf %320, %319 : vector<8x128xf32>
    %322 = arith.divf %320, %321 : vector<8x128xf32>
    %323 = vector.extract_strided_slice %316 {offsets = [0, 128], sizes = [8, 128], strides = [1, 1]} : vector<8x512xf32> to vector<8x128xf32>
    %324 = arith.negf %323 : vector<8x128xf32>
    %325 = math.exp %324 : vector<8x128xf32>
    %cst_70 = arith.constant 1.000000e+00 : f32
    %326 = vector.broadcast %cst_70 : f32 to vector<8x128xf32>
    %327 = arith.addf %326, %325 : vector<8x128xf32>
    %328 = arith.divf %326, %327 : vector<8x128xf32>
    %329 = vector.extract_strided_slice %316 {offsets = [0, 256], sizes = [8, 128], strides = [1, 1]} : vector<8x512xf32> to vector<8x128xf32>
    %330 = math.tanh %329 : vector<8x128xf32>
    %331 = vector.extract_strided_slice %316 {offsets = [0, 384], sizes = [8, 128], strides = [1, 1]} : vector<8x512xf32> to vector<8x128xf32>
    %332 = arith.negf %331 : vector<8x128xf32>
    %333 = math.exp %332 : vector<8x128xf32>
    %cst_71 = arith.constant 1.000000e+00 : f32
    %334 = vector.broadcast %cst_71 : f32 to vector<8x128xf32>
    %335 = arith.addf %334, %333 : vector<8x128xf32>
    %336 = arith.divf %334, %335 : vector<8x128xf32>
    %337 = arith.mulf %328, %309 : vector<8x128xf32>
    %338 = arith.mulf %322, %330 : vector<8x128xf32>
    %339 = arith.addf %337, %338 : vector<8x128xf32>
    %340 = math.tanh %339 : vector<8x128xf32>
    %341 = arith.mulf %336, %340 : vector<8x128xf32>
    %342 = vector.extract_strided_slice %276 {offsets = [2, 0, 0], sizes = [1, 8, 512], strides = [1, 1, 1]} : vector<8x8x512xf32> to vector<1x8x512xf32>
    %343 = vector.shape_cast %342 : vector<1x8x512xf32> to vector<8x512xf32>
    %344 = arith.truncf %341 : vector<8x128xf32> to vector<8x128xbf16>
    %cst_72 = arith.constant dense<0.000000e+00> : vector<8x512xf32>
    %345 = tpu.matmul %344, %277, %cst_72 {dimension_numbers = #tpu.dot_dimension_numbers<[1], [0], [0], [1], [0, 0, 1, 1], [], []>} : vector<8x128xbf16>, vector<128x512xbf16>, vector<8x512xf32> -> vector<8x512xf32>
    %346 = arith.addf %343, %345 : vector<8x512xf32>
    %347 = vector.extract_strided_slice %346 {offsets = [0, 0], sizes = [8, 128], strides = [1, 1]} : vector<8x512xf32> to vector<8x128xf32>
    %348 = arith.negf %347 : vector<8x128xf32>
    %349 = math.exp %348 : vector<8x128xf32>
    %cst_73 = arith.constant 1.000000e+00 : f32
    %350 = vector.broadcast %cst_73 : f32 to vector<8x128xf32>
    %351 = arith.addf %350, %349 : vector<8x128xf32>
    %352 = arith.divf %350, %351 : vector<8x128xf32>
    %353 = vector.extract_strided_slice %346 {offsets = [0, 128], sizes = [8, 128], strides = [1, 1]} : vector<8x512xf32> to vector<8x128xf32>
    %354 = arith.negf %353 : vector<8x128xf32>
    %355 = math.exp %354 : vector<8x128xf32>
    %cst_74 = arith.constant 1.000000e+00 : f32
    %356 = vector.broadcast %cst_74 : f32 to vector<8x128xf32>
    %357 = arith.addf %356, %355 : vector<8x128xf32>
    %358 = arith.divf %356, %357 : vector<8x128xf32>
    %359 = vector.extract_strided_slice %346 {offsets = [0, 256], sizes = [8, 128], strides = [1, 1]} : vector<8x512xf32> to vector<8x128xf32>
    %360 = math.tanh %359 : vector<8x128xf32>
    %361 = vector.extract_strided_slice %346 {offsets = [0, 384], sizes = [8, 128], strides = [1, 1]} : vector<8x512xf32> to vector<8x128xf32>
    %362 = arith.negf %361 : vector<8x128xf32>
    %363 = math.exp %362 : vector<8x128xf32>
    %cst_75 = arith.constant 1.000000e+00 : f32
    %364 = vector.broadcast %cst_75 : f32 to vector<8x128xf32>
    %365 = arith.addf %364, %363 : vector<8x128xf32>
    %366 = arith.divf %364, %365 : vector<8x128xf32>
    %367 = arith.mulf %358, %339 : vector<8x128xf32>
    %368 = arith.mulf %352, %360 : vector<8x128xf32>
    %369 = arith.addf %367, %368 : vector<8x128xf32>
    %370 = math.tanh %369 : vector<8x128xf32>
    %371 = arith.mulf %366, %370 : vector<8x128xf32>
    %372 = vector.extract_strided_slice %276 {offsets = [3, 0, 0], sizes = [1, 8, 512], strides = [1, 1, 1]} : vector<8x8x512xf32> to vector<1x8x512xf32>
    %373 = vector.shape_cast %372 : vector<1x8x512xf32> to vector<8x512xf32>
    %374 = arith.truncf %371 : vector<8x128xf32> to vector<8x128xbf16>
    %cst_76 = arith.constant dense<0.000000e+00> : vector<8x512xf32>
    %375 = tpu.matmul %374, %277, %cst_76 {dimension_numbers = #tpu.dot_dimension_numbers<[1], [0], [0], [1], [0, 0, 1, 1], [], []>} : vector<8x128xbf16>, vector<128x512xbf16>, vector<8x512xf32> -> vector<8x512xf32>
    %376 = arith.addf %373, %375 : vector<8x512xf32>
    %377 = vector.extract_strided_slice %376 {offsets = [0, 0], sizes = [8, 128], strides = [1, 1]} : vector<8x512xf32> to vector<8x128xf32>
    %378 = arith.negf %377 : vector<8x128xf32>
    %379 = math.exp %378 : vector<8x128xf32>
    %cst_77 = arith.constant 1.000000e+00 : f32
    %380 = vector.broadcast %cst_77 : f32 to vector<8x128xf32>
    %381 = arith.addf %380, %379 : vector<8x128xf32>
    %382 = arith.divf %380, %381 : vector<8x128xf32>
    %383 = vector.extract_strided_slice %376 {offsets = [0, 128], sizes = [8, 128], strides = [1, 1]} : vector<8x512xf32> to vector<8x128xf32>
    %384 = arith.negf %383 : vector<8x128xf32>
    %385 = math.exp %384 : vector<8x128xf32>
    %cst_78 = arith.constant 1.000000e+00 : f32
    %386 = vector.broadcast %cst_78 : f32 to vector<8x128xf32>
    %387 = arith.addf %386, %385 : vector<8x128xf32>
    %388 = arith.divf %386, %387 : vector<8x128xf32>
    %389 = vector.extract_strided_slice %376 {offsets = [0, 256], sizes = [8, 128], strides = [1, 1]} : vector<8x512xf32> to vector<8x128xf32>
    %390 = math.tanh %389 : vector<8x128xf32>
    %391 = vector.extract_strided_slice %376 {offsets = [0, 384], sizes = [8, 128], strides = [1, 1]} : vector<8x512xf32> to vector<8x128xf32>
    %392 = arith.negf %391 : vector<8x128xf32>
    %393 = math.exp %392 : vector<8x128xf32>
    %cst_79 = arith.constant 1.000000e+00 : f32
    %394 = vector.broadcast %cst_79 : f32 to vector<8x128xf32>
    %395 = arith.addf %394, %393 : vector<8x128xf32>
    %396 = arith.divf %394, %395 : vector<8x128xf32>
    %397 = arith.mulf %388, %369 : vector<8x128xf32>
    %398 = arith.mulf %382, %390 : vector<8x128xf32>
    %399 = arith.addf %397, %398 : vector<8x128xf32>
    %400 = math.tanh %399 : vector<8x128xf32>
    %401 = arith.mulf %396, %400 : vector<8x128xf32>
    %402 = vector.extract_strided_slice %276 {offsets = [4, 0, 0], sizes = [1, 8, 512], strides = [1, 1, 1]} : vector<8x8x512xf32> to vector<1x8x512xf32>
    %403 = vector.shape_cast %402 : vector<1x8x512xf32> to vector<8x512xf32>
    %404 = arith.truncf %401 : vector<8x128xf32> to vector<8x128xbf16>
    %cst_80 = arith.constant dense<0.000000e+00> : vector<8x512xf32>
    %405 = tpu.matmul %404, %277, %cst_80 {dimension_numbers = #tpu.dot_dimension_numbers<[1], [0], [0], [1], [0, 0, 1, 1], [], []>} : vector<8x128xbf16>, vector<128x512xbf16>, vector<8x512xf32> -> vector<8x512xf32>
    %406 = arith.addf %403, %405 : vector<8x512xf32>
    %407 = vector.extract_strided_slice %406 {offsets = [0, 0], sizes = [8, 128], strides = [1, 1]} : vector<8x512xf32> to vector<8x128xf32>
    %408 = arith.negf %407 : vector<8x128xf32>
    %409 = math.exp %408 : vector<8x128xf32>
    %cst_81 = arith.constant 1.000000e+00 : f32
    %410 = vector.broadcast %cst_81 : f32 to vector<8x128xf32>
    %411 = arith.addf %410, %409 : vector<8x128xf32>
    %412 = arith.divf %410, %411 : vector<8x128xf32>
    %413 = vector.extract_strided_slice %406 {offsets = [0, 128], sizes = [8, 128], strides = [1, 1]} : vector<8x512xf32> to vector<8x128xf32>
    %414 = arith.negf %413 : vector<8x128xf32>
    %415 = math.exp %414 : vector<8x128xf32>
    %cst_82 = arith.constant 1.000000e+00 : f32
    %416 = vector.broadcast %cst_82 : f32 to vector<8x128xf32>
    %417 = arith.addf %416, %415 : vector<8x128xf32>
    %418 = arith.divf %416, %417 : vector<8x128xf32>
    %419 = vector.extract_strided_slice %406 {offsets = [0, 256], sizes = [8, 128], strides = [1, 1]} : vector<8x512xf32> to vector<8x128xf32>
    %420 = math.tanh %419 : vector<8x128xf32>
    %421 = vector.extract_strided_slice %406 {offsets = [0, 384], sizes = [8, 128], strides = [1, 1]} : vector<8x512xf32> to vector<8x128xf32>
    %422 = arith.negf %421 : vector<8x128xf32>
    %423 = math.exp %422 : vector<8x128xf32>
    %cst_83 = arith.constant 1.000000e+00 : f32
    %424 = vector.broadcast %cst_83 : f32 to vector<8x128xf32>
    %425 = arith.addf %424, %423 : vector<8x128xf32>
    %426 = arith.divf %424, %425 : vector<8x128xf32>
    %427 = arith.mulf %418, %399 : vector<8x128xf32>
    %428 = arith.mulf %412, %420 : vector<8x128xf32>
    %429 = arith.addf %427, %428 : vector<8x128xf32>
    %430 = math.tanh %429 : vector<8x128xf32>
    %431 = arith.mulf %426, %430 : vector<8x128xf32>
    %432 = vector.extract_strided_slice %276 {offsets = [5, 0, 0], sizes = [1, 8, 512], strides = [1, 1, 1]} : vector<8x8x512xf32> to vector<1x8x512xf32>
    %433 = vector.shape_cast %432 : vector<1x8x512xf32> to vector<8x512xf32>
    %434 = arith.truncf %431 : vector<8x128xf32> to vector<8x128xbf16>
    %cst_84 = arith.constant dense<0.000000e+00> : vector<8x512xf32>
    %435 = tpu.matmul %434, %277, %cst_84 {dimension_numbers = #tpu.dot_dimension_numbers<[1], [0], [0], [1], [0, 0, 1, 1], [], []>} : vector<8x128xbf16>, vector<128x512xbf16>, vector<8x512xf32> -> vector<8x512xf32>
    %436 = arith.addf %433, %435 : vector<8x512xf32>
    %437 = vector.extract_strided_slice %436 {offsets = [0, 0], sizes = [8, 128], strides = [1, 1]} : vector<8x512xf32> to vector<8x128xf32>
    %438 = arith.negf %437 : vector<8x128xf32>
    %439 = math.exp %438 : vector<8x128xf32>
    %cst_85 = arith.constant 1.000000e+00 : f32
    %440 = vector.broadcast %cst_85 : f32 to vector<8x128xf32>
    %441 = arith.addf %440, %439 : vector<8x128xf32>
    %442 = arith.divf %440, %441 : vector<8x128xf32>
    %443 = vector.extract_strided_slice %436 {offsets = [0, 128], sizes = [8, 128], strides = [1, 1]} : vector<8x512xf32> to vector<8x128xf32>
    %444 = arith.negf %443 : vector<8x128xf32>
    %445 = math.exp %444 : vector<8x128xf32>
    %cst_86 = arith.constant 1.000000e+00 : f32
    %446 = vector.broadcast %cst_86 : f32 to vector<8x128xf32>
    %447 = arith.addf %446, %445 : vector<8x128xf32>
    %448 = arith.divf %446, %447 : vector<8x128xf32>
    %449 = vector.extract_strided_slice %436 {offsets = [0, 256], sizes = [8, 128], strides = [1, 1]} : vector<8x512xf32> to vector<8x128xf32>
    %450 = math.tanh %449 : vector<8x128xf32>
    %451 = vector.extract_strided_slice %436 {offsets = [0, 384], sizes = [8, 128], strides = [1, 1]} : vector<8x512xf32> to vector<8x128xf32>
    %452 = arith.negf %451 : vector<8x128xf32>
    %453 = math.exp %452 : vector<8x128xf32>
    %cst_87 = arith.constant 1.000000e+00 : f32
    %454 = vector.broadcast %cst_87 : f32 to vector<8x128xf32>
    %455 = arith.addf %454, %453 : vector<8x128xf32>
    %456 = arith.divf %454, %455 : vector<8x128xf32>
    %457 = arith.mulf %448, %429 : vector<8x128xf32>
    %458 = arith.mulf %442, %450 : vector<8x128xf32>
    %459 = arith.addf %457, %458 : vector<8x128xf32>
    %460 = math.tanh %459 : vector<8x128xf32>
    %461 = arith.mulf %456, %460 : vector<8x128xf32>
    %462 = vector.extract_strided_slice %276 {offsets = [6, 0, 0], sizes = [1, 8, 512], strides = [1, 1, 1]} : vector<8x8x512xf32> to vector<1x8x512xf32>
    %463 = vector.shape_cast %462 : vector<1x8x512xf32> to vector<8x512xf32>
    %464 = arith.truncf %461 : vector<8x128xf32> to vector<8x128xbf16>
    %cst_88 = arith.constant dense<0.000000e+00> : vector<8x512xf32>
    %465 = tpu.matmul %464, %277, %cst_88 {dimension_numbers = #tpu.dot_dimension_numbers<[1], [0], [0], [1], [0, 0, 1, 1], [], []>} : vector<8x128xbf16>, vector<128x512xbf16>, vector<8x512xf32> -> vector<8x512xf32>
    %466 = arith.addf %463, %465 : vector<8x512xf32>
    %467 = vector.extract_strided_slice %466 {offsets = [0, 0], sizes = [8, 128], strides = [1, 1]} : vector<8x512xf32> to vector<8x128xf32>
    %468 = arith.negf %467 : vector<8x128xf32>
    %469 = math.exp %468 : vector<8x128xf32>
    %cst_89 = arith.constant 1.000000e+00 : f32
    %470 = vector.broadcast %cst_89 : f32 to vector<8x128xf32>
    %471 = arith.addf %470, %469 : vector<8x128xf32>
    %472 = arith.divf %470, %471 : vector<8x128xf32>
    %473 = vector.extract_strided_slice %466 {offsets = [0, 128], sizes = [8, 128], strides = [1, 1]} : vector<8x512xf32> to vector<8x128xf32>
    %474 = arith.negf %473 : vector<8x128xf32>
    %475 = math.exp %474 : vector<8x128xf32>
    %cst_90 = arith.constant 1.000000e+00 : f32
    %476 = vector.broadcast %cst_90 : f32 to vector<8x128xf32>
    %477 = arith.addf %476, %475 : vector<8x128xf32>
    %478 = arith.divf %476, %477 : vector<8x128xf32>
    %479 = vector.extract_strided_slice %466 {offsets = [0, 256], sizes = [8, 128], strides = [1, 1]} : vector<8x512xf32> to vector<8x128xf32>
    %480 = math.tanh %479 : vector<8x128xf32>
    %481 = vector.extract_strided_slice %466 {offsets = [0, 384], sizes = [8, 128], strides = [1, 1]} : vector<8x512xf32> to vector<8x128xf32>
    %482 = arith.negf %481 : vector<8x128xf32>
    %483 = math.exp %482 : vector<8x128xf32>
    %cst_91 = arith.constant 1.000000e+00 : f32
    %484 = vector.broadcast %cst_91 : f32 to vector<8x128xf32>
    %485 = arith.addf %484, %483 : vector<8x128xf32>
    %486 = arith.divf %484, %485 : vector<8x128xf32>
    %487 = arith.mulf %478, %459 : vector<8x128xf32>
    %488 = arith.mulf %472, %480 : vector<8x128xf32>
    %489 = arith.addf %487, %488 : vector<8x128xf32>
    %490 = math.tanh %489 : vector<8x128xf32>
    %491 = arith.mulf %486, %490 : vector<8x128xf32>
    %492 = vector.extract_strided_slice %276 {offsets = [7, 0, 0], sizes = [1, 8, 512], strides = [1, 1, 1]} : vector<8x8x512xf32> to vector<1x8x512xf32>
    %493 = vector.shape_cast %492 : vector<1x8x512xf32> to vector<8x512xf32>
    %494 = arith.truncf %491 : vector<8x128xf32> to vector<8x128xbf16>
    %cst_92 = arith.constant dense<0.000000e+00> : vector<8x512xf32>
    %495 = tpu.matmul %494, %277, %cst_92 {dimension_numbers = #tpu.dot_dimension_numbers<[1], [0], [0], [1], [0, 0, 1, 1], [], []>} : vector<8x128xbf16>, vector<128x512xbf16>, vector<8x512xf32> -> vector<8x512xf32>
    %496 = arith.addf %493, %495 : vector<8x512xf32>
    %497 = vector.extract_strided_slice %496 {offsets = [0, 0], sizes = [8, 128], strides = [1, 1]} : vector<8x512xf32> to vector<8x128xf32>
    %498 = arith.negf %497 : vector<8x128xf32>
    %499 = math.exp %498 : vector<8x128xf32>
    %cst_93 = arith.constant 1.000000e+00 : f32
    %500 = vector.broadcast %cst_93 : f32 to vector<8x128xf32>
    %501 = arith.addf %500, %499 : vector<8x128xf32>
    %502 = arith.divf %500, %501 : vector<8x128xf32>
    %503 = vector.extract_strided_slice %496 {offsets = [0, 128], sizes = [8, 128], strides = [1, 1]} : vector<8x512xf32> to vector<8x128xf32>
    %504 = arith.negf %503 : vector<8x128xf32>
    %505 = math.exp %504 : vector<8x128xf32>
    %cst_94 = arith.constant 1.000000e+00 : f32
    %506 = vector.broadcast %cst_94 : f32 to vector<8x128xf32>
    %507 = arith.addf %506, %505 : vector<8x128xf32>
    %508 = arith.divf %506, %507 : vector<8x128xf32>
    %509 = vector.extract_strided_slice %496 {offsets = [0, 256], sizes = [8, 128], strides = [1, 1]} : vector<8x512xf32> to vector<8x128xf32>
    %510 = math.tanh %509 : vector<8x128xf32>
    %511 = vector.extract_strided_slice %496 {offsets = [0, 384], sizes = [8, 128], strides = [1, 1]} : vector<8x512xf32> to vector<8x128xf32>
    %512 = arith.negf %511 : vector<8x128xf32>
    %513 = math.exp %512 : vector<8x128xf32>
    %cst_95 = arith.constant 1.000000e+00 : f32
    %514 = vector.broadcast %cst_95 : f32 to vector<8x128xf32>
    %515 = arith.addf %514, %513 : vector<8x128xf32>
    %516 = arith.divf %514, %515 : vector<8x128xf32>
    %517 = arith.mulf %508, %489 : vector<8x128xf32>
    %518 = arith.mulf %502, %510 : vector<8x128xf32>
    %519 = arith.addf %517, %518 : vector<8x128xf32>
    %520 = math.tanh %519 : vector<8x128xf32>
    %521 = arith.mulf %516, %520 : vector<8x128xf32>
    %c1_96 = arith.constant 1 : index
    %c0_97 = arith.constant 0 : index
    %c0_98 = arith.constant 0 : index
    %522 = vector.load %arg13[%c1_96, %c0_97, %c0_98] : memref<2x8x128xf32, #tpu.memory_space<vmem>>, vector<1x8x128xf32>
    %523 = vector.shape_cast %522 : vector<1x8x128xf32> to vector<8x128xf32>
    %524 = vector.shape_cast %521 : vector<8x128xf32> to vector<1x8x128xf32>
    tpu.vector_store %arg13[%c1_96, %c0_97, %c0_98], %524 {strides = array<i32>} : memref<2x8x128xf32, #tpu.memory_space<vmem>>, vector<1x8x128xf32>,
    %c1_99 = arith.constant 1 : index
    %c0_100 = arith.constant 0 : index
    %c0_101 = arith.constant 0 : index
    %525 = vector.load %arg14[%c1_99, %c0_100, %c0_101] : memref<2x8x128xf32, #tpu.memory_space<vmem>>, vector<1x8x128xf32>
    %526 = vector.shape_cast %525 : vector<1x8x128xf32> to vector<8x128xf32>
    %527 = vector.shape_cast %519 : vector<8x128xf32> to vector<1x8x128xf32>
    tpu.vector_store %arg14[%c1_99, %c0_100, %c0_101], %527 {strides = array<i32>} : memref<2x8x128xf32, #tpu.memory_space<vmem>>, vector<1x8x128xf32>,
    %528 = vector.shape_cast %311 : vector<8x128xf32> to vector<1x8x128xf32>
    %529 = vector.shape_cast %341 : vector<8x128xf32> to vector<1x8x128xf32>
    %530 = vector.shape_cast %371 : vector<8x128xf32> to vector<1x8x128xf32>
    %531 = vector.shape_cast %401 : vector<8x128xf32> to vector<1x8x128xf32>
    %532 = vector.shape_cast %431 : vector<8x128xf32> to vector<1x8x128xf32>
    %533 = vector.shape_cast %461 : vector<8x128xf32> to vector<1x8x128xf32>
    %534 = vector.shape_cast %491 : vector<8x128xf32> to vector<1x8x128xf32>
    %535 = vector.shape_cast %521 : vector<8x128xf32> to vector<1x8x128xf32>
    %536 = tpu.concatenate %528, %529, %530, %531, %532, %533, %534, %535 in 0 : vector<1x8x128xf32>, vector<1x8x128xf32>, vector<1x8x128xf32>, vector<1x8x128xf32>, vector<1x8x128xf32>, vector<1x8x128xf32>, vector<1x8x128xf32>, vector<1x8x128xf32> -> vector<8x8x128xf32>
    %537 = vector.shape_cast %536 : vector<8x8x128xf32> to vector<64x128xf32>
    %538 = arith.truncf %537 : vector<64x128xf32> to vector<64x128xbf16>
    %c0_102 = arith.constant 0 : index
    %c0_103 = arith.constant 0 : index
    %539 = vector.load %arg10[%c0_102, %c0_103] : memref<128x8xbf16, #tpu.memory_space<vmem>>, vector<128x8xbf16>
    %cst_104 = arith.constant dense<0.000000e+00> : vector<64x8xf32>
    %540 = tpu.matmul %538, %539, %cst_104 {dimension_numbers = #tpu.dot_dimension_numbers<[1], [0], [0], [1], [0, 0, 1, 1], [], []>} : vector<64x128xbf16>, vector<128x8xbf16>, vector<64x8xf32> -> vector<64x8xf32>
    %c0_105 = arith.constant 0 : index
    %c0_106 = arith.constant 0 : index
    %541 = vector.load %arg11[%c0_105, %c0_106] : memref<1x8xf32, #tpu.memory_space<vmem>>, vector<1x8xf32>
    %542 = vector.broadcast %541 : vector<1x8xf32> to vector<64x8xf32>
    %543 = arith.addf %540, %542 : vector<64x8xf32>
    %544 = vector.shape_cast %543 : vector<64x8xf32> to vector<8x8x8xf32>
    %c0_107 = arith.constant 0 : index
    %c0_108 = arith.constant 0 : index
    %c0_109 = arith.constant 0 : index
    %545 = vector.load %arg12[%c0_107, %c0_108, %c0_109] : memref<8x8x8xf32, #tpu.memory_space<vmem>>, vector<8x8x8xf32>
    tpu.vector_store %arg12[%c0_107, %c0_108, %c0_109], %544 {strides = array<i32>} : memref<8x8x8xf32, #tpu.memory_space<vmem>>, vector<8x8x8xf32>,
    return
  }
  func.func @transform_0(%arg0: i32) -> (i32, i32, i32) {
    %c0_i32 = arith.constant 0 : i32
    %c0_i32_0 = arith.constant 0 : i32
    %c0_i32_1 = arith.constant 0 : i32
    return %c0_i32, %arg0, %c0_i32_0 : i32, i32, i32
  }
  func.func @transform_1(%arg0: i32) -> (i32, i32) {
    %c0_i32 = arith.constant 0 : i32
    %c0_i32_0 = arith.constant 0 : i32
    %c0_i32_1 = arith.constant 0 : i32
    return %c0_i32, %c0_i32_0 : i32, i32
  }
  func.func @transform_2(%arg0: i32) -> (i32, i32) {
    %c0_i32 = arith.constant 0 : i32
    %c0_i32_0 = arith.constant 0 : i32
    %c0_i32_1 = arith.constant 0 : i32
    return %c0_i32, %c0_i32_0 : i32, i32
  }
  func.func @transform_3(%arg0: i32) -> (i32, i32) {
    %c0_i32 = arith.constant 0 : i32
    %c0_i32_0 = arith.constant 0 : i32
    %c0_i32_1 = arith.constant 0 : i32
    return %c0_i32, %c0_i32_0 : i32, i32
  }
  func.func @transform_4(%arg0: i32) -> (i32, i32) {
    %c0_i32 = arith.constant 0 : i32
    %c0_i32_0 = arith.constant 0 : i32
    %c0_i32_1 = arith.constant 0 : i32
    return %c0_i32, %c0_i32_0 : i32, i32
  }
  func.func @transform_5(%arg0: i32) -> (i32, i32) {
    %c0_i32 = arith.constant 0 : i32
    %c0_i32_0 = arith.constant 0 : i32
    %c0_i32_1 = arith.constant 0 : i32
    return %c0_i32, %c0_i32_0 : i32, i32
  }
  func.func @transform_6(%arg0: i32) -> (i32, i32) {
    %c0_i32 = arith.constant 0 : i32
    %c0_i32_0 = arith.constant 0 : i32
    %c0_i32_1 = arith.constant 0 : i32
    return %c0_i32, %c0_i32_0 : i32, i32
  }
  func.func @transform_7(%arg0: i32) -> (i32, i32, i32) {
    %c0_i32 = arith.constant 0 : i32
    %c0_i32_0 = arith.constant 0 : i32
    %c0_i32_1 = arith.constant 0 : i32
    return %c0_i32, %arg0, %c0_i32_0 : i32, i32, i32
  }
  func.func @transform_8(%arg0: i32) -> (i32, i32, i32) {
    %c0_i32 = arith.constant 0 : i32
    %c0_i32_0 = arith.constant 0 : i32
    %c0_i32_1 = arith.constant 0 : i32
    return %c0_i32, %arg0, %c0_i32_0 : i32, i32, i32
  }
  func.func @transform_9(%arg0: i32) -> (i32, i32) {
    %c0_i32 = arith.constant 0 : i32
    %c0_i32_0 = arith.constant 0 : i32
    %c0_i32_1 = arith.constant 0 : i32
    return %c0_i32, %c0_i32_0 : i32, i32
  }
  func.func @transform_10(%arg0: i32) -> (i32, i32) {
    %c0_i32 = arith.constant 0 : i32
    %c0_i32_0 = arith.constant 0 : i32
    %c0_i32_1 = arith.constant 0 : i32
    return %c0_i32, %c0_i32_0 : i32, i32
  }
  func.func @transform_11(%arg0: i32) -> (i32, i32, i32) {
    %c0_i32 = arith.constant 0 : i32
    %c0_i32_0 = arith.constant 0 : i32
    %c0_i32_1 = arith.constant 0 : i32
    return %c0_i32, %arg0, %c0_i32_0 : i32, i32, i32
  }
  func.func @transform_12(%arg0: i32) -> (i32, i32, i32) {
    %c0_i32 = arith.constant 0 : i32
    %c0_i32_0 = arith.constant 0 : i32
    %c0_i32_1 = arith.constant 0 : i32
    return %c0_i32, %arg0, %c0_i32_0 : i32, i32, i32
  }
  func.func @transform_13(%arg0: i32) -> (i32, i32, i32) {
    %c0_i32 = arith.constant 0 : i32
    %c0_i32_0 = arith.constant 0 : i32
    %c0_i32_1 = arith.constant 0 : i32
    return %c0_i32, %arg0, %c0_i32_0 : i32, i32, i32
  }
}

</mosaic_0001>

<bundles_post_ra>
// kernel: lstm_module_forward.1
= control target key start
LH: loop header
LB: loop body
LE: loop exit
PB: predicated region body
PF: predicated region fallthrough
CT: control target
= control target key end

     0   :  { %s6504_s0 = inlined_call_operand.vmem [shape: f32[8,16,16], index: 0, kind: input, shape index: {}]   ;;  %s6505_s1 = inlined_call_operand.hbm [shape: bf16[16,512], index: 1, kind: input, shape index: {}]   ;;  %s6506_s2 = inlined_call_operand.hbm [shape: bf16[128,512], index: 2, kind: input, shape index: {}]   ;;  %s6507_s3 = inlined_call_operand.vmem [shape: f32[1,512], index: 3, kind: input, shape index: {}]   ;;  %s6508_s4 = inlined_call_operand.hbm [shape: bf16[128,512], index: 4, kind: input, shape index: {}]   ;;  %s6509_s5 = inlined_call_operand.vmem [shape: bf16[128,512], index: 5, kind: input, shape index: {}]   ;;  %s6510_s6 = inlined_call_operand.vmem [shape: f32[1,512], index: 6, kind: input, shape index: {}]   ;;  %s6511_s7 = inlined_call_operand.vmem [shape: f32[2,16,128], index: 7, kind: input, shape index: {}, may-alias: {7,12}]   ;;  %s6512_s8 = inlined_call_operand.vmem [shape: f32[2,16,128], index: 8, kind: input, shape index: {}, may-alias: {8,13}]   ;;  %s6513_s9 = inlined_call_operand.vmem [shape: bf16[128,8], index: 9, kind: input, shape index: {}]   ;;  %s6514_s10 = inlined_call_operand.vmem [shape: f32[1,8], index: 10, kind: input, shape index: {}]   ;;  %s6515_s11 = inlined_call_operand.vmem [shape: f32[8,16,8], index: 11, kind: output, shape index: {0}]   ;;  %s6516_s12 = inlined_call_operand.vmem [shape: f32[2,16,128], index: 12, kind: output, shape index: {1}, may-alias: {7,12}]   ;;  %s6517_s13 = inlined_call_operand.vmem [shape: f32[2,16,128], index: 13, kind: output, shape index: {2}, may-alias: {8,13}]  }
   0x1   :  { %6530 = sst [smem:[#allocation38_spill]] %s6505_s1 }
   0x2   :  { %6531 = sst [smem:[#allocation39_spill]] %s6517_s13 }
   0x3   :  { %19 = vsyncpa [#allocation4], 0 }
   0x4   :  { %20 = vsyncpa [#allocation6], 0  ;;  %s4875_s25 = smov 0   ;;  %s4877_s26 = smov 0  }
   0x5   :  { %s4879_s27 = smov 0  }
   0x6 LB: > { %s4891_s28 = sadd.s32 4294967295, %s4797_s27   ;;  %s4894_s29 = sadd.s32 1, %s4797_s27   ;;  %s4797_s27 = sphi %s4879_s27, %s6633_s27   ;;  %s4793_s26 = sphi %s4877_s26, %s6636_s26   ;;  %s4789_s25 = sphi %s4875_s25, %s6635_s25  }
   0x7   : > { %6532 = sst [smem:[#allocation15_spill]] %s4894_s29  ;;  %s30_s30 = ssub.s32 %s4797_s27, %s4894_s29 }
   0x8   : > { %s33_s14 = sadd.s32 1, %s4793_s26  ;;  %p31_p0 = scmp.eq.s32.totalorder %s30_s30, 0 }
   0x9   : > { %p40_p1 = scmp.ne.s32.totalorder %s4793_s26, %s4789_s25  ;;  %p41_p2 = scmp.eq.s32.totalorder %s4797_s27, 0 }
   0xa   : > { %p290_p3 = scmp.eq.s32.totalorder %s4891_s28, 1  ;;  %p3919_p6 = scmp.ge.s32.totalorder %s4797_s27, 1 }
   0xb   : > { %s4904_s15 = scalar_select %p31_p0, %s4793_s26, %s33_s14  }
   0xc   : > { %p4906_p4 = por %p41_p2, %p40_p1  ;;  %p4910_p5 = por %p290_p3, %p40_p1 }
   0xd   : > { %6533 = sst [smem:[#allocation16_spill]] %s4904_s15  ;;  %p355_p7 = scmp.lt.s32.totalorder %s4797_s27, 3 }
   0xe   : > { %s6535_s17 = scalar_select %p4910_p5, 1, 0 }
   0xf   : > { %p6520_p8 = scmp.eq.s32.totalorder %s4891_s28, 0  ;;  %p4917_p9 = pnand %p3919_p6, %p355_p7 }
  0x10   : > { %s4799_s19 = smov [#allocation5]   ;;  %s4800_s22 = smov [#allocation3]  }
  0x11   : > { %s6536_s18 = scalar_select %p4917_p9, 1, 0 }
  0x12   : > { %p4165_p10 = pneg %p4917_p9  ;;  %s380_s20 = sshll.u32 %s4799_s19, 4  ;;  %s381_s20 = int_to_ptr.vmem [resolvable:$true] %s380_s20 }
  0x13   : > { %s367_s23 = sshll.u32 %s4800_s22, 4  ;;  %s4801_s24 = smov [#allocation7]   ;;  %s368_s23 = int_to_ptr.vmem [resolvable:$true] %s367_s23 }
  0x14   : > { %p4925_p11 = pnand %p6520_p8, %p4165_p10  ;;  %s396_s30 = sshll.u32 %s4801_s24, 4  ;;  %s397_s30 = int_to_ptr.vmem [resolvable:$true] %s396_s30 }
  0x15   : > { %s4700_s14 = scalar_lea.vmem %s381_s20, 4096  ;;  %p4708_p2 = scmp.lt.s32.totalorder %s381_s20, %s381_s20 }
  0x16   : > { %p4691_p12 = pneg %p4925_p11  ;;  %p4701_p13 = scmp.ne.s32.totalorder %s381_s20, %s4700_s14 }
  0x17   : > { %p4709_p3 = scmp.lt.s32.totalorder %s4700_s14, %s4700_s14 }
  0x18   : > { %p4703_p0 = pnand %p4701_p13, %p4691_p12 }
  0x19   : > { %p4710_p6 = por %p4709_p3, %p4708_p2 }
  0x1a   : > { %p4704_p1 = pneg %p4703_p0 }
  0x1c   : > { %p4711_p7 = pnand %p4710_p6, %p4704_p1 }
  0x1e   : > { %4714 = shalt.err (!%p4711_p7)
}
  0x1f   : > { %s4802_s19 = smov 256   ;;  %s4803_s22 = smov 16  }
  0x20   : > { %4171 = dma.hbm_to_vmem [thread:$0]  (!%p4925_p11), %s6506_s2, 4096, %s381_s20, [#allocation6], %s4802_s19, %s4802_s19, %s4803_s22  }
  0x21   : > { %s4726_s29 = scalar_lea.vmem %s368_s23, 512  ;;  %p4734_p8 = scmp.lt.s32.totalorder %s368_s23, %s368_s23 }
  0x22   : > { %p4727_p10 = scmp.ne.s32.totalorder %s368_s23, %s4726_s29  ;;  %p4735_p5 = scmp.lt.s32.totalorder %s4726_s29, %s4726_s29 }
  0x24   : > { %p4729_p13 = pnand %p4727_p10, %p4691_p12  ;;  %p4736_p2 = por %p4735_p5, %p4734_p8 }
  0x26   : > { %p4730_p0 = pneg %p4729_p13 }
  0x28   : > { %p4737_p1 = pnand %p4736_p2, %p4730_p0 }
  0x2a   : > { %4740 = shalt.err (!%p4737_p1)
}
  0x2b   : > { %s6538_s1 = sld [smem:[#allocation38_spill]]  ;;  %s4752_s15 = scalar_lea.vmem %s397_s30, 4096 }
  0x2c   : > { %p4753_p3 = scmp.ne.s32.totalorder %s397_s30, %s4752_s15  ;;  %p4760_p10 = scmp.lt.s32.totalorder %s397_s30, %s397_s30 }
  0x2d   : > { %p4761_p13 = scmp.lt.s32.totalorder %s4752_s15, %s4752_s15 }
  0x2e   : > { %p4755_p6 = pnand %p4753_p3, %p4691_p12 }
  0x2f   : > { %p4762_p9 = por %p4761_p13, %p4760_p10 }
  0x30   : > { %p4756_p7 = pneg %p4755_p6 }
  0x31   : > { %4168 = dma.hbm_to_vmem [thread:$0]  (!%p4925_p11), %s6538_s1, 512, %s368_s23, [#allocation4], %s4802_s19, %s4802_s19, %s4803_s22  }
  0x32   : > { %p4763_p5 = pnand %p4762_p9, %p4756_p7 }
  0x34   : > { %4766 = shalt.err (!%p4763_p5)
}
  0x35   : > { %4174 = dma.hbm_to_vmem [thread:$0]  (!%p4925_p11), %s6508_s4, 4096, %s397_s30, [#allocation6], %s4802_s19, %s4802_s19, %s4803_s22  }
  0x36   : > { %p3923_p8 = scmp.ge.s32.totalorder %s4797_s27, 2 }
  0x38   : > { %418 = sbr.rel (%p3923_p8) target bundleno = 79 (0x4f), region = 48 }
  0x3d   : > { %421 = sbr.rel (!%p4906_p4) target bundleno = 69 (0x45), region = 52  ;;  %s423_s13 = sand.u32 (%p4906_p4), 1, %s4793_s26  }
  0x3e   : > { %s3925_s23 = sshll.u32 (%p4906_p4), %s4797_s27, 3  ;;  %s3924_s24 = sshll.u32 (%p4906_p4), %s423_s13, 6 }
  0x3f   : > { %s427_s1 = scalar_lea.vmem (%p4906_p4), %s6504_s0, %s3925_s23  ;;  %s425_s21 = scalar_lea.vmem (%p4906_p4), [#allocation2], %s3924_s24 }
  0x40   : > { %v470_v0 = vld [vmem:[%s427_s1] sm:$0xff] (%p4906_p4)  ;;  %v472_v1 = vld [vmem:[%s427_s1 + $0x10] sm:$0xff] (%p4906_p4) }
  0x41   : > { %v474_v2 = vld [vmem:[%s427_s1 + $0x20] sm:$0xff] (%p4906_p4)  ;;  %471 = vst [vmem:[%s425_s21] sm:$0xff] (%p4906_p4), %v470_v0  ;;  %473 = vst [vmem:[%s425_s21 + $0x8] sm:$0xff] (%p4906_p4), %v472_v1  ;;  %v476_v3 = vld [vmem:[%s427_s1 + $0x30] sm:$0xff] (%p4906_p4) }
  0x42   : > { %475 = vst [vmem:[%s425_s21 + $0x10] sm:$0xff] %v474_v2  ;;  %v478_v4 = vld [vmem:[%s427_s1 + $0x40] sm:$0xff]  ;;  %v480_v5 = vld [vmem:[%s427_s1 + $0x50] sm:$0xff]  ;;  %477 = vst [vmem:[%s425_s21 + $0x18] sm:$0xff] %v476_v3 }
  0x43   : > { %479 = vst [vmem:[%s425_s21 + $0x20] sm:$0xff] %v478_v4  ;;  %481 = vst [vmem:[%s425_s21 + $0x28] sm:$0xff] %v480_v5  ;;  %v482_v6 = vld [vmem:[%s427_s1 + $0x60] sm:$0xff]  ;;  %v484_v7 = vld [vmem:[%s427_s1 + $0x70] sm:$0xff] }
  0x44   : > { %483 = vst [vmem:[%s425_s21 + $0x30] sm:$0xff] %v482_v6  ;;  %485 = vst [vmem:[%s425_s21 + $0x38] sm:$0xff] %v484_v7 }
  0x45 PF: > { %491 = sbr.rel (!%p4906_p4) target bundleno = 74 (0x4a), region = 90  ;;  %s493_s30 = sand.u32 (%p4906_p4), 1, %s4793_s26  }
  0x46   : > { %s3927_s19 = sshll.u32 (%p4906_p4), %s4797_s27, 3  ;;  %s3926_s22 = sshll.u32 (%p4906_p4), %s493_s30, 4 }
  0x47   : > { %s497_s13 = scalar_lea.vmem (%p4906_p4), %s6511_s7, %s3927_s19  ;;  %s495_s23 = scalar_lea.vmem (%p4906_p4), [#allocation8], %s3926_s22 }
  0x48   : > { %v528_v8 = vld [vmem:[%s497_s13] sm:$0xff] (%p4906_p4)  ;;  %v530_v9 = vld [vmem:[%s497_s13 + $0x10] sm:$0xff] (%p4906_p4) }
  0x49   : > { %529 = vst [vmem:[%s495_s23] sm:$0xff] (%p4906_p4), %v528_v8  ;;  %531 = vst [vmem:[%s495_s23 + $0x8] sm:$0xff] (%p4906_p4), %v530_v9 }
  0x4a PF: > { %537 = sbr.rel (!%p4906_p4) target bundleno = 79 (0x4f), region = 128  ;;  %s539_s1 = sand.u32 (%p4906_p4), 1, %s4793_s26  }
  0x4b   : > { %s3929_s24 = sshll.u32 (%p4906_p4), %s4797_s27, 3  ;;  %s3928_s14 = sshll.u32 (%p4906_p4), %s539_s1, 4 }
  0x4c   : > { %s543_s30 = scalar_lea.vmem (%p4906_p4), %s6512_s8, %s3929_s24  ;;  %s541_s19 = scalar_lea.vmem (%p4906_p4), [#allocation9], %s3928_s14 }
  0x4d   : > { %v574_v10 = vld [vmem:[%s543_s30] sm:$0xff] (%p4906_p4)  ;;  %v576_v11 = vld [vmem:[%s543_s30 + $0x10] sm:$0xff] (%p4906_p4) }
  0x4e   : > { %575 = vst [vmem:[%s541_s19] sm:$0xff] (%p4906_p4), %v574_v10  ;;  %577 = vst [vmem:[%s541_s19 + $0x8] sm:$0xff] (%p4906_p4), %v576_v11 }
  0x4f PF: > { %p6539_p9 = scmp.ne.s32.totalorder %s6536_s18, 0 }
  0x51   : > { %586 = sbr.rel (%p6539_p9) target bundleno = 4395 (0x112b), region = 166 }
  0x56   : > { %s589_s16 = sand.u32 1, %s4789_s25   ;;  %p6540_p4 = scmp.eq.s32.totalorder %s4891_s28, 0 }
  0x57   : > { %s4982_s27 = sshll.u32 %s589_s16, 6 }
  0x58   : > { %s4985_s22 = scalar_lea.vmem [#allocation2], %s4982_s27 }
  0x59   : > { %4780 = dma.done.wait (%p6540_p4), [#allocation4], 512   ;;  %p6541_p11 = pmov %p6540_p4 }
  0x5a   : > { %p6542_p12 = pmov %p6540_p4 }
  0x5b   : > { %4782 = vsyncadd (%p6541_p11), [#allocation4], 4294966784 }
  0x5c   : > { %4784 = dma.done.wait (%p6542_p12), [#allocation6], 8192   ;;  %p6543_p0 = pmov %p6540_p4 }
  0x5d   : > { %v6525_v12 = vmov 0   ;;  %v4211_v13 = vld [vmem:[#allocation3 + $0xc] ss:$16 sps:$4 sm:$0xff]   ;;  %v4213_v14 = vld [vmem:[#allocation3 + $0x8] ss:$16 sps:$4 sm:$0xff]   ;;  %v674_v15 = vld [vmem:[%s4985_s22] sm:$0xff]  ;;  %v692_v63 = vlaneseq }
  0x5e   : > { %4786 = vsyncadd (%p6543_p0), [#allocation6], 4294959104  ;;  %850 = vmatprep.mubr.bf16.mxu1 %v6525_v12  ;;  %777 = vmatprep.mubr.bf16.mxu0 %v6525_v12  ;;  %v675_v16 = vld [vmem:[%s4985_s22 + $0x8] sm:$0xff]  ;;  %v4999_v18 = vld [vmem:[#allocation5 + $0xe4] ss:$16 sps:$4 sm:$0xff]   ;;  %vm732_vm0 = vcmask 130048  }
  0x5f   : > { %832 = vmatprep.subr.bf16.mxu1 %v4211_v13  ;;  %v682_v17 = vpack.c.bf16 %v675_v16, %v674_v15  ;;  %v5001_v19 = vld [vmem:[#allocation5 + $0xe0] ss:$16 sps:$4 sm:$0xff]   ;;  %v5004_v20 = vld [vmem:[#allocation5 + $0xc4] ss:$16 sps:$4 sm:$0xff]   ;;  %v677_v23 = vld [vmem:[%s4985_s22 + $0x18] sm:$0xff]  ;;  %s5052_s18 = sshll.u32 %s589_s16, 4 }
  0x60   : > { %833 = vmatpush1.bf16.msra.mxu1 %v4213_v14  ;;  %v5007_v21 = vld [vmem:[#allocation5 + $0xc0] ss:$16 sps:$4 sm:$0xff]   ;;  %v5014_v24 = vld [vmem:[#allocation5 + $0xa4] ss:$16 sps:$4 sm:$0xff]   ;;  %v679_v32 = vld [vmem:[%s4985_s22 + $0x28] sm:$0xff]  ;;  %s610_s25 = scalar_lea.vmem [#allocation8], %s5052_s18 }
  0x61   : > { %1086 = vmatprep.subr.bf16.mxu1 %v4999_v18  ;;  %v676_v22 = vld [vmem:[%s4985_s22 + $0x10] sm:$0xff]  ;;  %v678_v31 = vld [vmem:[%s4985_s22 + $0x20] sm:$0xff]  ;;  %v681_v39 = vld [vmem:[%s4985_s22 + $0x38] sm:$0xff]  ;;  %v5160_v0 = vshrl.u32 %v692_v63, 7  ;;  %s617_s13 = scalar_lea.vmem [#allocation9], %s5052_s18  ;;  %s5814_s15 = scalar_lea.vmem [#allocation12], %s5052_s18 }
  0x62   : > { %v683_v25 = vpack.c.bf16 %v677_v23, %v676_v22  ;;  %v5017_v26 = vld [vmem:[#allocation5 + $0xa0] ss:$16 sps:$4 sm:$0xff]   ;;  %v5020_v27 = vld [vmem:[#allocation5 + $0x84] ss:$16 sps:$4 sm:$0xff]   ;;  %v684_v34 = vpack.c.bf16 %v679_v32, %v678_v31  ;;  %v5074_v46 = vld [vmem:[#allocation5 + $0xec] ss:$16 sps:$4 sm:$0xff]  }
  0x63   : > { %3948 = vmatmul.mubr.msk.bf16.vlgmr.msra.gmra.mxu1 %vm732_vm0, %v682_v17  ;;  %v5022_v28 = vld [vmem:[#allocation5 + $0x80] ss:$16 sps:$4 sm:$0xff]   ;;  %v4235_v29 = vld [vmem:[#allocation3 + $0x4] ss:$16 sps:$4 sm:$0xff]   ;;  %v5080_v47 = vld [vmem:[#allocation5 + $0xe8] ss:$16 sps:$4 sm:$0xff]  }
  0x64   : > { %1087 = vmatpush1.bf16.msra.mxu1 %v5001_v19  ;;  %860 = vmatprep.mubr.bf16.mxu1 %v6525_v12  ;;  %v4237_v30 = vld [vmem:[#allocation3] ss:$16 sps:$4 sm:$0xff]   ;;  %v5030_v33 = vld [vmem:[#allocation5 + $0x64] ss:$16 sps:$4 sm:$0xff]   ;;  %v5083_v49 = vld [vmem:[#allocation5 + $0xcc] ss:$16 sps:$4 sm:$0xff]  }
  0x65   : > { %1088 = vmatprep.subr.bf16.mxu1 %v5004_v20  ;;  %759 = vmatprep.subr.bf16.mxu0 %v4235_v29  ;;  %v5034_v35 = vld [vmem:[#allocation5 + $0x60] ss:$16 sps:$4 sm:$0xff]   ;;  %v5037_v36 = vld [vmem:[#allocation5 + $0x44] ss:$16 sps:$4 sm:$0xff]   ;;  %v5089_v50 = vld [vmem:[#allocation5 + $0xc8] ss:$16 sps:$4 sm:$0xff]  }
  0x66   : > { %760 = vmatpush1.bf16.msra.mxu0 %v4237_v30  ;;  %v5043_v37 = vld [vmem:[#allocation5 + $0x40] ss:$16 sps:$4 sm:$0xff]   ;;  %v5055_v40 = vld [vmem:[#allocation5 + $0x24] ss:$16 sps:$4 sm:$0xff]   ;;  %v5093_v51 = vld [vmem:[#allocation5 + $0xac] ss:$16 sps:$4 sm:$0xff]  }
  0x67   : > { %1197 = vmatprep.subr.bf16.mxu0 %v4999_v18  ;;  %v680_v38 = vld [vmem:[%s4985_s22 + $0x30] sm:$0xff]  ;;  %v5099_v52 = vld [vmem:[#allocation5 + $0xa8] ss:$16 sps:$4 sm:$0xff]   ;;  %v5102_v53 = vld [vmem:[#allocation5 + $0x8c] ss:$16 sps:$4 sm:$0xff]   ;;  %6544 = vst [vmem:[#allocation17_spill] sm:$0xff] %v5160_v0 }
  0x68   : > { %1089 = vmatpush1.bf16.msra.mxu1 %v5007_v21  ;;  %v685_v41 = vpack.c.bf16 %v681_v39, %v680_v38  ;;  %v5058_v42 = vld [vmem:[#allocation5 + $0x20] ss:$16 sps:$4 sm:$0xff]   ;;  %v5062_v43 = vld [vmem:[#allocation5 + $0x4] ss:$16 sps:$4 sm:$0xff]   ;;  %v5108_v54 = vld [vmem:[#allocation5 + $0x88] ss:$16 sps:$4 sm:$0xff]  }
  0x69   : > { %1090 = vmatprep.subr.bf16.mxu1 %v5014_v24  ;;  %3944 = vmatmul.mubr.msk.bf16.vlgmr.msra.gmra.mxu0 %vm732_vm0, %v682_v17  ;;  %v5066_v44 = vld [vmem:[#allocation5] ss:$16 sps:$4 sm:$0xff]   ;;  %v5112_v55 = vld [vmem:[#allocation5 + $0x6c] ss:$16 sps:$4 sm:$0xff]   ;;  %v5117_v56 = vld [vmem:[#allocation5 + $0x68] ss:$16 sps:$4 sm:$0xff]  }
  0x6a   : > { %1198 = vmatpush1.bf16.msra.mxu0 %v5001_v19  ;;  %787 = vmatprep.mubr.bf16.mxu0 %v6525_v12  ;;  %v923_v45 = vld [vmem:[%s610_s25] sm:$0xff]  ;;  %v5120_v57 = vld [vmem:[#allocation5 + $0x4c] ss:$16 sps:$4 sm:$0xff]   ;;  %v5126_v58 = vld [vmem:[#allocation5 + $0x48] ss:$16 sps:$4 sm:$0xff]   ;;  %v6522_v1 = vsub.s32 2, %v5160_v0 }
  0x6b   : > { %3949 = vmatmul.mubr.msk.bf16.gmra.mxu1 %vm732_vm0, %v683_v25  ;;  %1199 = vmatprep.subr.bf16.mxu0 %v5004_v20  ;;  %v925_v48 = vpack.c.bf16 %v923_v45, %v923_v45  ;;  %v5129_v59 = vld [vmem:[#allocation5 + $0x2c] ss:$16 sps:$4 sm:$0xff]   ;;  %v5132_v60 = vld [vmem:[#allocation5 + $0x28] ss:$16 sps:$4 sm:$0xff]   ;;  %v690_v2 = vld [vmem:[%s6507_s3] sm:$0xf] }
  0x6c   : > { %1091 = vmatpush1.bf16.msra.mxu1 %v5017_v26  ;;  %870 = vmatprep.mubr.bf16.mxu1 %v6525_v12  ;;  %v5135_v61 = vld [vmem:[#allocation5 + $0xc] ss:$16 sps:$4 sm:$0xff]   ;;  %v5138_v62 = vld [vmem:[#allocation5 + $0x8] ss:$16 sps:$4 sm:$0xff]   ;;  %v6523_v4 = vsub.s32 3, %v5160_v0  ;;  %v5173_v6 = vrot.slane %v690_v2, %v6522_v1  ;;  %v6529_v45 = vsub.s32 1, %v5160_v0 }
  0x6d   : > { %1092 = vmatprep.subr.bf16.mxu1 %v5020_v27  ;;  %s5818_s21 = scalar_lea.vmem [#allocation11], %s5052_s18  ;;  %vm3567_vm1 = vcmask 64512   ;;  %s6442_s22 = scalar_lea.vmem [#allocation10], %s4982_s27 }
  0x6e   : > { %1200 = vmatpush1.bf16.msra.mxu0 %v5007_v21  ;;  %v5177_v8 = vrot.slane %v690_v2, %v6523_v4  ;;  %p6629_p2 = scmp.ne.s32.totalorder %s6535_s17, 0 }
  0x6f   : > { %1201 = vmatprep.subr.bf16.mxu0 %v5014_v24  ;;  %s4112_s27 = sshll.u32 (%p6629_p2), %s4891_s28, 3 }
  0x70   : > { %1093 = vmatpush1.bf16.msra.mxu1 %v5022_v28  ;;  %s3592_s23 = scalar_lea.vmem (%p6629_p2), %s6515_s11, %s4112_s27 }
  0x71   : > { %1094 = vmatprep.subr.bf16.mxu1 %v5030_v33  ;;  %3945 = vmatmul.mubr.msk.bf16.gmra.mxu0 %vm732_vm0, %v683_v25 }
  0x72   : > { %1202 = vmatpush1.bf16.msra.mxu0 %v5017_v26  ;;  %797 = vmatprep.mubr.bf16.mxu0 %v6525_v12 }
  0x73   : > { %3950 = vmatmul.mubr.msk.bf16.gmra.mxu1 %vm732_vm0, %v684_v34  ;;  %1203 = vmatprep.subr.bf16.mxu0 %v5020_v27 }
  0x74   : > { %1095 = vmatpush1.bf16.msra.mxu1 %v5034_v35  ;;  %880 = vmatprep.mubr.bf16.mxu1 %v6525_v12 }
  0x75   : > { %1096 = vmatprep.subr.bf16.mxu1 %v5037_v36 }
  0x76   : > { %1204 = vmatpush1.bf16.msra.mxu0 %v5022_v28 }
  0x77   : > { %1205 = vmatprep.subr.bf16.mxu0 %v5030_v33 }
  0x78   : > { %1097 = vmatpush1.bf16.msra.mxu1 %v5043_v37 }
  0x79   : > { %1098 = vmatprep.subr.bf16.mxu1 %v5055_v40  ;;  %3946 = vmatmul.mubr.msk.bf16.gmra.mxu0 %vm732_vm0, %v684_v34  ;;  %v6524_v34 = vsub.s32 0, %v5160_v0 }
  0x7a   : > { %1206 = vmatpush1.bf16.msra.mxu0 %v5034_v35  ;;  %807 = vmatprep.mubr.bf16.mxu0 %v6525_v12 }
  0x7b   : > { %3951 = vmatmul.mubr.msk.bf16.gmra.mxu1 %vm732_vm0, %v685_v41  ;;  %1207 = vmatprep.subr.bf16.mxu0 %v5037_v36 }
  0x7c   : > { %1099 = vmatpush1.bf16.msra.mxu1 %v5058_v42  ;;  %1118 = vmatprep.mubr.bf16.mxu1 %v6525_v12 }
  0x7d   : > { %1100 = vmatprep.subr.bf16.mxu1 %v5062_v43 }
  0x7e   : > { %1208 = vmatpush1.bf16.msra.mxu0 %v5043_v37 }
  0x7f   : > { %1209 = vmatprep.subr.bf16.mxu0 %v5055_v40 }
  0x80   : > { %1101 = vmatpush1.bf16.msra.mxu1 %v5066_v44 }
  0x81   : > { %1127 = vmatprep.subr.bf16.mxu1 %v5074_v46  ;;  %3947 = vmatmul.mubr.msk.bf16.gmra.mxu0 %vm732_vm0, %v685_v41 }
  0x82   : > { %1210 = vmatpush1.bf16.msra.mxu0 %v5058_v42  ;;  %1229 = vmatprep.mubr.bf16.mxu0 %v6525_v12 }
  0x83   : > { %1119 = vmatmul.mubr.bf16.vlgmr.msra.gmra.mxu1 %v925_v48  ;;  %1211 = vmatprep.subr.bf16.mxu0 %v5062_v43 }
  0x84   : > { %1128 = vmatpush1.bf16.msra.mxu1 %v5080_v47  ;;  %1159 = vmatprep.mubr.bf16.mxu1 %v6525_v12 }
  0x85   : > { %1129 = vmatprep.subr.bf16.mxu1 %v5083_v49 }
  0x86   : > { %1212 = vmatpush1.bf16.msra.mxu0 %v5066_v44 }
  0x87   : > { %1308 = vmatprep.subr.bf16.mxu0 %v4999_v18 }
  0x88   : > { %1130 = vmatpush1.bf16.msra.mxu1 %v5089_v50 }
  0x89   : > { %1131 = vmatprep.subr.bf16.mxu1 %v5093_v51 }
  0x8c   : > { %1132 = vmatpush1.bf16.msra.mxu1 %v5099_v52 }
  0x8d   : > { %1133 = vmatprep.subr.bf16.mxu1 %v5102_v53 }
  0x90   : > { %1134 = vmatpush1.bf16.msra.mxu1 %v5108_v54 }
  0x91   : > { %1135 = vmatprep.subr.bf16.mxu1 %v5112_v55 }
  0x94   : > { %1136 = vmatpush1.bf16.msra.mxu1 %v5117_v56 }
  0x95   : > { %1137 = vmatprep.subr.bf16.mxu1 %v5120_v57 }
  0x98   : > { %1138 = vmatpush1.bf16.msra.mxu1 %v5126_v58 }
  0x99   : > { %1139 = vmatprep.subr.bf16.mxu1 %v5129_v59 }
  0x9c   : > { %1140 = vmatpush1.bf16.msra.mxu1 %v5132_v60 }
  0x9d   : > { %1141 = vmatprep.subr.bf16.mxu1 %v5135_v61 }
  0xa0   : > { %1142 = vmatpush1.bf16.msra.mxu1 %v5138_v62 }
  0xa1   : > { %1238 = vmatprep.subr.bf16.mxu1 %v5074_v46 }
  0xa3   : > { %1160 = vmatmul.mubr.bf16.vlgmr.msra.gmra.mxu1 %v925_v48 }
  0xa4   : > { %1239 = vmatpush1.bf16.msra.mxu1 %v5080_v47  ;;  %1270 = vmatprep.mubr.bf16.mxu1 %v6525_v12 }
  0xa5   : > { %1240 = vmatprep.subr.bf16.mxu1 %v5083_v49 }
  0xa8   : > { %1241 = vmatpush1.bf16.msra.mxu1 %v5089_v50 }
  0xa9   : > { %1242 = vmatprep.subr.bf16.mxu1 %v5093_v51 }
  0xac   : > { %1243 = vmatpush1.bf16.msra.mxu1 %v5099_v52 }
  0xad   : > { %1244 = vmatprep.subr.bf16.mxu1 %v5102_v53 }
  0xb0   : > { %1245 = vmatpush1.bf16.msra.mxu1 %v5108_v54 }
  0xb1   : > { %1246 = vmatprep.subr.bf16.mxu1 %v5112_v55 }
  0xb4   : > { %1247 = vmatpush1.bf16.msra.mxu1 %v5117_v56 }
  0xb5   : > { %1248 = vmatprep.subr.bf16.mxu1 %v5120_v57 }
  0xb8   : > { %1249 = vmatpush1.bf16.msra.mxu1 %v5126_v58 }
  0xb9   : > { %1250 = vmatprep.subr.bf16.mxu1 %v5129_v59 }
  0xbc   : > { %1251 = vmatpush1.bf16.msra.mxu1 %v5132_v60 }
  0xbd   : > { %1252 = vmatprep.subr.bf16.mxu1 %v5135_v61 }
  0xc0   : > { %1253 = vmatpush1.bf16.msra.mxu1 %v5138_v62 }
  0xc1   : > { %1349 = vmatprep.subr.bf16.mxu1 %v5074_v46 }
 0x123   : > { %v5166_v3 = vpop.f32.mrf.mxu1 }
 0x125   : > { %v5169_v5 = vpop.f32.mrf.mxu1 }
 0x127   : > { %v856_v7 = vpop.f32.mrf.mxu1 }
 0x128   : > { %v5180_v9 = vadd.f32 %v856_v7, %v5173_v6 }
 0x129   : > { %v858_v10 = vpop.f32.mrf.mxu1  ;;  %v779_v25 = vpop.f32.mrf.mxu0 }
 0x12a   : > { %v5183_v11 = vadd.f32 %v858_v10, %v5177_v8  ;;  %v5214_v10 = vrot.slane %v690_v2, %v6524_v34 }
 0x12b   : > { %v862_v13 = vpop.f32.mrf.mxu1  ;;  %v781_v31 = vpop.f32.mrf.mxu0 }
 0x12c   : > { %v5186_v14 = vadd.f32 %v862_v13, %v5173_v6 }
 0x12d   : > { %v864_v15 = vpop.f32.mrf.mxu1  ;;  %v5201_v39 = vpop.f32.mrf.mxu0 }
 0x12e   : > { %v5189_v16 = vadd.f32 %v864_v15, %v5177_v8 }
 0x12f   : > { %v866_v17 = vpop.f32.mrf.mxu1  ;;  %v5207_v63 = vpop.f32.mrf.mxu0 }
 0x130   : > { %v5192_v22 = vadd.f32 %v866_v17, %v5173_v6 }
 0x131   : > { %v868_v23 = vpop.f32.mrf.mxu1  ;;  %v789_v15 = vpop.f32.mrf.mxu0 }
 0x132   : > { %6545 = vst [vmem:[#allocation18_spill] sm:$0xff] %v5192_v22  ;;  %v5195_v29 = vadd.f32 %v868_v23, %v5177_v8  ;;  %v5221_v23 = vrot.slane %v690_v2, %v6529_v45 }
 0x133   : > { %v872_v30 = vpop.f32.mrf.mxu1  ;;  %v791_v1 = vpop.f32.mrf.mxu0 }
 0x134   : > { %6546 = vst [vmem:[#allocation19_spill] sm:$0xff] %v5195_v29  ;;  %v5198_v32 = vadd.f32 %v872_v30, %v5173_v6  ;;  %v5224_v30 = vadd.f32 %v789_v15, %v5214_v10  ;;  %v5230_v4 = vadd.f32 %v791_v1, %v5221_v23 }
 0x135   : > { %v874_v38 = vpop.f32.mrf.mxu1  ;;  %v793_v12 = vpop.f32.mrf.mxu0 }
 0x136   : > { %6547 = vst [vmem:[#allocation20_spill] sm:$0xff] %v5198_v32  ;;  %v5204_v41 = vadd.f32 %v874_v38, %v5177_v8  ;;  %v5236_v0 = vadd.f32 %v793_v12, %v5214_v10  ;;  %v782_v12 = vadd.f32 %v781_v31, %v5221_v23 }
 0x137   : > { %v876_v48 = vpop.f32.mrf.mxu1  ;;  %v795_v45 = vpop.f32.mrf.mxu0 }
 0x138   : > { %6548 = vst [vmem:[#allocation21_spill] sm:$0xff] %v5204_v41  ;;  %v5210_v7 = vadd.f32 %v876_v48, %v5173_v6  ;;  %6553 = vst [vmem:[#allocation26_spill] sm:$0xff] %v5236_v0 }
 0x139   : > { %v878_v13 = vpop.f32.mrf.mxu1 }
 0x13a   : > { %6549 = vst [vmem:[#allocation22_spill] sm:$0xff] %v5210_v7  ;;  %v5217_v17 = vadd.f32 %v878_v13, %v5177_v8  ;;  %v5242_v7 = vadd.f32 %v795_v45, %v5221_v23 }
 0x13b   : > { %v882_v38 = vpop.f32.mrf.mxu1 }
 0x13c   : > { %6550 = vst [vmem:[#allocation23_spill] sm:$0xff] %v5217_v17  ;;  %v5227_v48 = vadd.f32 %v882_v38, %v5173_v6  ;;  %6555 = vst [vmem:[#allocation28_spill] sm:$0xff] %v5242_v7 }
 0x13d   : > { %v884_v34 = vpop.f32.mrf.mxu1 }
 0x13e   : > { %6551 = vst [vmem:[#allocation24_spill] sm:$0xff] %v5227_v48  ;;  %v5233_v13 = vadd.f32 %v884_v34, %v5177_v8  ;;  %v799_v48 = vpop.f32.mrf.mxu0 }
 0x13f   : > { %v886_v2 = vpop.f32.mrf.mxu1  ;;  %v5248_v17 = vadd.f32 %v799_v48, %v5214_v10 }
 0x140   : > { %6552 = vst [vmem:[#allocation25_spill] sm:$0xff] %v5233_v13  ;;  %v5239_v15 = vadd.f32 %v886_v2, %v5173_v6  ;;  %v801_v13 = vpop.f32.mrf.mxu0  ;;  %v780_v2 = vadd.f32 %v779_v25, %v5214_v10 }
 0x141   : > { %v888_v38 = vpop.f32.mrf.mxu1  ;;  %6557 = vst [vmem:[#allocation30_spill] sm:$0xff] %v5248_v17  ;;  %v5252_v32 = vadd.f32 %v801_v13, %v5221_v23 }
 0x142   : > { %6554 = vst [vmem:[#allocation27_spill] sm:$0xff] %v5239_v15  ;;  %v5245_v1 = vadd.f32 %v888_v38, %v5177_v8  ;;  %v803_v45 = vpop.f32.mrf.mxu0 }
 0x143   : > { %v1120_v34 = vpop.f32.mrf.mxu1  ;;  %6558 = vst [vmem:[#allocation31_spill] sm:$0xff] %v5252_v32  ;;  %v5256_v41 = vadd.f32 %v803_v45, %v5214_v10 }
 0x144   : > { %6556 = vst [vmem:[#allocation29_spill] sm:$0xff] %v5245_v1  ;;  %v805_v38 = vpop.f32.mrf.mxu0  ;;  %v1168_v17 = vadd.f32 %v1120_v34, %v780_v2  ;;  %v855_v2 = vadd.f32 %v5169_v5, %v5177_v8 }
 0x145   : > { %v1122_v15 = vpop.f32.mrf.mxu1  ;;  %v5259_v48 = vadd.f32 %v805_v38, %v5221_v23 }
 0x146   : > { %v1169_v1 = vadd.f32 %v1122_v15, %v782_v12  ;;  %v809_v7 = vpop.f32.mrf.mxu0  ;;  %v3984_v0 = vmul.f32 -1.442695, %v1168_v17 }
 0x147   : > { %v1124_v22 = vpop.f32.mrf.mxu1  ;;  %v5262_v31 = vadd.f32 %v809_v7, %v5214_v10  ;;  %v853_v7 = vadd.f32 %v5166_v3, %v5173_v6 }
 0x148   : > { %v811_v13 = vpop.f32.mrf.mxu0  ;;  %v3985_v32 = vmul.f32 -1.442695, %v1169_v1 }
 0x149   : > { %v1125_v29 = vpop.f32.mrf.mxu1  ;;  %6559 = vst [vmem:[#allocation32_spill] sm:$0xff] %v5262_v31  ;;  %v5265_v25 = vadd.f32 %v811_v13, %v5221_v23 }
 0x14a   : > { %v813_v45 = vpop.f32.mrf.mxu0  ;;  %4369 = vpow2.f32 %v3985_v32 }
 0x14b   : > { %6560 = vst [vmem:[#allocation33_spill] sm:$0xff] %v5265_v25  ;;  %v5268_v22 = vadd.f32 %v813_v45, %v5214_v10  ;;  %4371 = vpow2.f32 %v3984_v0 }
 0x14d   : > { %6561 = vst [vmem:[#allocation34_spill] sm:$0xff] %v5268_v22 }
 0x157   : > { %v4370_v15 = vpop.eup %4369 }
 0x158   : > { %v4372_v12 = vpop.eup %4371  ;;  %v1181_v34 = vadd.f32 1.0, %v4370_v15 }
 0x159   : > { %v1175_v29 = vadd.f32 1.0, %v4372_v12  ;;  %v924_v12 = vld [vmem:[%s617_s13] sm:$0xff] }
 0x15a   : > { %4373 = vrcp.f32 %v1181_v34 }
 0x15b   : > { %4375 = vrcp.f32 %v1175_v29 }
 0x163   : > { %v1161_v1 = vpop.f32.mrf.mxu1 }
 0x164   : > { %v1170_v17 = vadd.f32 %v1161_v1, %v853_v7 }
 0x165   : > { %v1163_v38 = vpop.f32.mrf.mxu1 }
 0x166   : > { %4377 = vtanh.f32 %v1170_v17  ;;  %v1171_v32 = vadd.f32 %v1163_v38, %v855_v2  ;;  %v784_v2 = vadd.f32 %v5201_v39, %v5214_v10 }
 0x167   : > { %v1165_v0 = vpop.f32.mrf.mxu1  ;;  %v4374_v15 = vpop.eup %4373 }
 0x168   : > { %v3986_v13 = vmul.f32 -1.442695, %v1171_v32  ;;  %v4376_v22 = vpop.eup %4375  ;;  %v1191_v6 = vmul.f32 %v4374_v15, %v924_v12  ;;  %v786_v32 = vadd.f32 %v5207_v63, %v5221_v23 }
 0x169   : > { %v1166_v45 = vpop.f32.mrf.mxu1 }
 0x16a   : > { %4379 = vpow2.f32 %v3986_v13 }
 0x173   : > { %v4378_v3 = vpop.eup %4377 }
 0x174   : > { %v1192_v25 = vmul.f32 %v4378_v3, %v4376_v22  ;;  %v5318_v22 = vpop.f32.mrf.mxu0 }
 0x175   : > { %6563 = vst [vmem:[#allocation35_spill] sm:$0xff] %v5318_v22 }
 0x176   : > { %v5277_v31 = vadd.f32 %v1192_v25, %v1191_v6  ;;  %v6562_v25 = vmov 0  }
 0x177   : > { %v4380_v5 = vpop.eup %4379 }
 0x178   : > { %v1188_v8 = vadd.f32 1.0, %v4380_v5  ;;  %4381 = vtanh.f32 %v5277_v31 }
 0x17a   : > { %4383 = vrcp.f32 %v1188_v8 }
 0x185   : > { %v4382_v34 = vpop.eup %4381 }
 0x187   : > { %v4384_v29 = vpop.eup %4383 }
 0x188   : > { %v5280_v7 = vmul.f32 %v4384_v29, %v4382_v34 }
 0x18a   : > { %v1196_v1 = vpack.c.bf16 %v5280_v7, %v5280_v7 }
 0x18c   : > { %1230 = vmatmul.mubr.bf16.vlgmr.msra.gmra.mxu0 %v1196_v1  ;;  %1271 = vmatmul.mubr.bf16.vlgmr.msra.gmra.mxu1 %v1196_v1 }
 0x18d   : > { %1309 = vmatpush1.bf16.msra.mxu0 %v5001_v19  ;;  %1350 = vmatpush1.bf16.msra.mxu1 %v5080_v47 }
 0x18e   : > { %1310 = vmatprep.subr.bf16.mxu0 %v5004_v20  ;;  %1351 = vmatprep.subr.bf16.mxu1 %v5083_v49 }
 0x18f   : > { %1340 = vmatprep.mubr.bf16.mxu0 %v6562_v25  ;;  %1381 = vmatprep.mubr.bf16.mxu1 %v6562_v25 }
 0x191   : > { %1311 = vmatpush1.bf16.msra.mxu0 %v5007_v21  ;;  %1352 = vmatpush1.bf16.msra.mxu1 %v5089_v50 }
 0x192   : > { %1312 = vmatprep.subr.bf16.mxu0 %v5014_v24  ;;  %1353 = vmatprep.subr.bf16.mxu1 %v5093_v51 }
 0x195   : > { %1313 = vmatpush1.bf16.msra.mxu0 %v5017_v26  ;;  %1354 = vmatpush1.bf16.msra.mxu1 %v5099_v52 }
 0x196   : > { %1314 = vmatprep.subr.bf16.mxu0 %v5020_v27  ;;  %1355 = vmatprep.subr.bf16.mxu1 %v5102_v53 }
 0x199   : > { %1315 = vmatpush1.bf16.msra.mxu0 %v5022_v28  ;;  %1356 = vmatpush1.bf16.msra.mxu1 %v5108_v54 }
 0x19a   : > { %1316 = vmatprep.subr.bf16.mxu0 %v5030_v33  ;;  %1357 = vmatprep.subr.bf16.mxu1 %v5112_v55 }
 0x19d   : > { %1317 = vmatpush1.bf16.msra.mxu0 %v5034_v35  ;;  %1358 = vmatpush1.bf16.msra.mxu1 %v5117_v56 }
 0x19e   : > { %1318 = vmatprep.subr.bf16.mxu0 %v5037_v36  ;;  %1359 = vmatprep.subr.bf16.mxu1 %v5120_v57 }
 0x1a1   : > { %1319 = vmatpush1.bf16.msra.mxu0 %v5043_v37  ;;  %1360 = vmatpush1.bf16.msra.mxu1 %v5126_v58 }
 0x1a2   : > { %1320 = vmatprep.subr.bf16.mxu0 %v5055_v40  ;;  %1361 = vmatprep.subr.bf16.mxu1 %v5129_v59 }
 0x1a5   : > { %1321 = vmatpush1.bf16.msra.mxu0 %v5058_v42  ;;  %1362 = vmatpush1.bf16.msra.mxu1 %v5132_v60 }
 0x1a6   : > { %1322 = vmatprep.subr.bf16.mxu0 %v5062_v43  ;;  %1363 = vmatprep.subr.bf16.mxu1 %v5135_v61 }
 0x1a9   : > { %1323 = vmatpush1.bf16.msra.mxu0 %v5066_v44  ;;  %1364 = vmatpush1.bf16.msra.mxu1 %v5138_v62 }
 0x1aa   : > { %1419 = vmatprep.subr.bf16.mxu0 %v4999_v18  ;;  %1460 = vmatprep.subr.bf16.mxu1 %v5074_v46 }
 0x24c   : > { %v1231_v17 = vpop.f32.mrf.mxu0  ;;  %v1272_v38 = vpop.f32.mrf.mxu1 }
 0x24d   : > { %v1279_v0 = vadd.f32 %v1231_v17, %v784_v2  ;;  %v1281_v39 = vadd.f32 %v1272_v38, %v5180_v9 }
 0x24e   : > { %v1233_v13 = vpop.f32.mrf.mxu0  ;;  %v1274_v45 = vpop.f32.mrf.mxu1 }
 0x24f   : > { %v3987_v15 = vmul.f32 -1.442695, %v1279_v0  ;;  %v1280_v12 = vadd.f32 %v1233_v13, %v786_v32  ;;  %v1282_v29 = vadd.f32 %v1274_v45, %v5183_v11 }
 0x250   : > { %v1235_v3 = vpop.f32.mrf.mxu0  ;;  %v1276_v6 = vpop.f32.mrf.mxu1 }
 0x251   : > { %4385 = vpow2.f32 %v3987_v15  ;;  %v3988_v5 = vmul.f32 -1.442695, %v1280_v12  ;;  %v3989_v10 = vmul.f32 -1.442695, %v1282_v29 }
 0x252   : > { %v1236_v8 = vpop.f32.mrf.mxu0  ;;  %v1277_v34 = vpop.f32.mrf.mxu1 }
 0x253   : > { %4387 = vpow2.f32 %v3988_v5 }
 0x254   : > { %4389 = vtanh.f32 %v1281_v39 }
 0x255   : > { %4391 = vpow2.f32 %v3989_v10 }
 0x25e   : > { %v4386_v1 = vpop.eup %4385 }
 0x25f   : > { %v1286_v22 = vadd.f32 1.0, %v4386_v1 }
 0x260   : > { %v4388_v63 = vpop.eup %4387 }
 0x261   : > { %4393 = vrcp.f32 %v1286_v22  ;;  %v1292_v2 = vadd.f32 1.0, %v4388_v63  ;;  %v4390_v17 = vpop.eup %4389 }
 0x262   : > { %v4392_v32 = vpop.eup %4391 }
 0x263   : > { %4395 = vrcp.f32 %v1292_v2  ;;  %v1299_v12 = vadd.f32 1.0, %v4392_v32 }
 0x265   : > { %4397 = vrcp.f32 %v1299_v12 }
 0x26e   : > { %v4394_v0 = vpop.eup %4393 }
 0x26f   : > { %v1303_v13 = vmul.f32 %v4394_v0, %v4390_v17 }
 0x270   : > { %v4396_v15 = vpop.eup %4395 }
 0x271   : > { %v1302_v3 = vmul.f32 %v4396_v15, %v5277_v31 }
 0x272   : > { %v4398_v9 = vpop.eup %4397 }
 0x273   : > { %v5327_v11 = vadd.f32 %v1303_v13, %v1302_v3 }
 0x275   : > { %4399 = vtanh.f32 %v5327_v11 }
 0x282   : > { %v4400_v38 = vpop.eup %4399 }
 0x283   : > { %v5330_v45 = vmul.f32 %v4400_v38, %v4398_v9 }
 0x285   : > { %v1307_v22 = vpack.c.bf16 %v5330_v45, %v5330_v45 }
 0x287   : > { %1341 = vmatmul.mubr.bf16.vlgmr.msra.gmra.mxu0 %v1307_v22  ;;  %1382 = vmatmul.mubr.bf16.vlgmr.msra.gmra.mxu1 %v1307_v22 }
 0x288   : > { %1420 = vmatpush1.bf16.msra.mxu0 %v5001_v19  ;;  %1461 = vmatpush1.bf16.msra.mxu1 %v5080_v47 }
 0x289   : > { %1421 = vmatprep.subr.bf16.mxu0 %v5004_v20  ;;  %1462 = vmatprep.subr.bf16.mxu1 %v5083_v49 }
 0x28a   : > { %1451 = vmatprep.mubr.bf16.mxu0 %v6562_v25  ;;  %1492 = vmatprep.mubr.bf16.mxu1 %v6562_v25 }
 0x28c   : > { %1422 = vmatpush1.bf16.msra.mxu0 %v5007_v21  ;;  %1463 = vmatpush1.bf16.msra.mxu1 %v5089_v50 }
 0x28d   : > { %1423 = vmatprep.subr.bf16.mxu0 %v5014_v24  ;;  %1464 = vmatprep.subr.bf16.mxu1 %v5093_v51 }
 0x290   : > { %1424 = vmatpush1.bf16.msra.mxu0 %v5017_v26  ;;  %1465 = vmatpush1.bf16.msra.mxu1 %v5099_v52 }
 0x291   : > { %1425 = vmatprep.subr.bf16.mxu0 %v5020_v27  ;;  %1466 = vmatprep.subr.bf16.mxu1 %v5102_v53 }
 0x294   : > { %1426 = vmatpush1.bf16.msra.mxu0 %v5022_v28  ;;  %1467 = vmatpush1.bf16.msra.mxu1 %v5108_v54 }
 0x295   : > { %1427 = vmatprep.subr.bf16.mxu0 %v5030_v33  ;;  %1468 = vmatprep.subr.bf16.mxu1 %v5112_v55 }
 0x298   : > { %1428 = vmatpush1.bf16.msra.mxu0 %v5034_v35  ;;  %1469 = vmatpush1.bf16.msra.mxu1 %v5117_v56 }
 0x299   : > { %1429 = vmatprep.subr.bf16.mxu0 %v5037_v36  ;;  %1470 = vmatprep.subr.bf16.mxu1 %v5120_v57 }
 0x29c   : > { %1430 = vmatpush1.bf16.msra.mxu0 %v5043_v37  ;;  %1471 = vmatpush1.bf16.msra.mxu1 %v5126_v58 }
 0x29d   : > { %1431 = vmatprep.subr.bf16.mxu0 %v5055_v40  ;;  %1472 = vmatprep.subr.bf16.mxu1 %v5129_v59 }
 0x2a0   : > { %1432 = vmatpush1.bf16.msra.mxu0 %v5058_v42  ;;  %1473 = vmatpush1.bf16.msra.mxu1 %v5132_v60 }
 0x2a1   : > { %1433 = vmatprep.subr.bf16.mxu0 %v5062_v43  ;;  %1474 = vmatprep.subr.bf16.mxu1 %v5135_v61 }
 0x2a4   : > { %1434 = vmatpush1.bf16.msra.mxu0 %v5066_v44  ;;  %1475 = vmatpush1.bf16.msra.mxu1 %v5138_v62 }
 0x2a5   : > { %1530 = vmatprep.subr.bf16.mxu0 %v4999_v18  ;;  %1571 = vmatprep.subr.bf16.mxu1 %v5074_v46 }
 0x347   : > { %v1342_v19 = vpop.f32.mrf.mxu0  ;;  %v1383_v31 = vpop.f32.mrf.mxu1 }
 0x348   : > { %v1390_v6 = vadd.f32 %v1342_v19, %v5224_v30  ;;  %v1392_v17 = vadd.f32 %v1383_v31, %v5186_v14 }
 0x349   : > { %v1344_v5 = vpop.f32.mrf.mxu0  ;;  %v1385_v8 = vpop.f32.mrf.mxu1 }
 0x34a   : > { %v3990_v34 = vmul.f32 -1.442695, %v1390_v6  ;;  %v1391_v29 = vadd.f32 %v1344_v5, %v5230_v4  ;;  %v1393_v18 = vadd.f32 %v1385_v8, %v5189_v16  ;;  %v5380_v8 = vld [vmem:[#allocation5 + $0xe0] ss:$16 sps:$4 sm:$0xff]  }
 0x34b   : > { %v1346_v39 = vpop.f32.mrf.mxu0  ;;  %v1387_v10 = vpop.f32.mrf.mxu1 }
 0x34c   : > { %4401 = vpow2.f32 %v3990_v34  ;;  %v3991_v1 = vmul.f32 -1.442695, %v1391_v29  ;;  %v3992_v32 = vmul.f32 -1.442695, %v1393_v18  ;;  %v6566_v34 = vld [vmem:[#allocation19_spill] sm:$0xff]  ;;  %v6567_v39 = vld [vmem:[#allocation18_spill] sm:$0xff] }
 0x34d   : > { %v1347_v63 = vpop.f32.mrf.mxu0  ;;  %v1388_v2 = vpop.f32.mrf.mxu1 }
 0x34e   : > { %4403 = vpow2.f32 %v3991_v1 }
 0x34f   : > { %4405 = vtanh.f32 %v1392_v17 }
 0x350   : > { %4407 = vpow2.f32 %v3992_v32 }
 0x359   : > { %v4402_v0 = vpop.eup %4401 }
 0x35a   : > { %v1397_v13 = vadd.f32 1.0, %v4402_v0 }
 0x35b   : > { %v4404_v30 = vpop.eup %4403 }
 0x35c   : > { %4409 = vrcp.f32 %v1397_v13  ;;  %v1403_v15 = vadd.f32 1.0, %v4404_v30  ;;  %v4406_v4 = vpop.eup %4405 }
 0x35d   : > { %v4408_v12 = vpop.eup %4407 }
 0x35e   : > { %4411 = vrcp.f32 %v1403_v15  ;;  %v1410_v22 = vadd.f32 1.0, %v4408_v12 }
 0x360   : > { %4413 = vrcp.f32 %v1410_v22 }
 0x369   : > { %v4410_v3 = vpop.eup %4409 }
 0x36a   : > { %v1414_v9 = vmul.f32 %v4410_v3, %v4406_v4 }
 0x36b   : > { %v4412_v38 = vpop.eup %4411 }
 0x36c   : > { %v1413_v19 = vmul.f32 %v4412_v38, %v5327_v11 }
 0x36d   : > { %v4414_v14 = vpop.eup %4413 }
 0x36e   : > { %v5373_v16 = vadd.f32 %v1414_v9, %v1413_v19  ;;  %v5432_v19 = vld [vmem:[#allocation5 + $0xc4] ss:$16 sps:$4 sm:$0xff]  }
 0x370   : > { %4415 = vtanh.f32 %v5373_v16 }
 0x37d   : > { %v4416_v31 = vpop.eup %4415 }
 0x37e   : > { %v5376_v6 = vmul.f32 %v4416_v31, %v4414_v14  ;;  %v5442_v14 = vld [vmem:[#allocation5 + $0xa4] ss:$16 sps:$4 sm:$0xff]   ;;  %v5454_v31 = vld [vmem:[#allocation5 + $0x80] ss:$16 sps:$4 sm:$0xff]  }
 0x380   : > { %v1418_v5 = vpack.c.bf16 %v5376_v6, %v5376_v6 }
 0x382   : > { %1452 = vmatmul.mubr.bf16.vlgmr.msra.gmra.mxu0 %v1418_v5  ;;  %1493 = vmatmul.mubr.bf16.vlgmr.msra.gmra.mxu1 %v1418_v5  ;;  %v5474_v5 = vld [vmem:[#allocation5 + $0x24] ss:$16 sps:$4 sm:$0xff]  }
 0x383   : > { %1531 = vmatpush1.bf16.msra.mxu0 %v5380_v8  ;;  %1572 = vmatpush1.bf16.msra.mxu1 %v5080_v47 }
 0x384   : > { %1532 = vmatprep.subr.bf16.mxu0 %v5004_v20  ;;  %1573 = vmatprep.subr.bf16.mxu1 %v5083_v49  ;;  %v5414_v20 = vld [vmem:[#allocation5 + $0xe4] ss:$16 sps:$4 sm:$0xff]  }
 0x385   : > { %1562 = vmatprep.mubr.bf16.mxu0 %v6562_v25  ;;  %1603 = vmatprep.mubr.bf16.mxu1 %v6562_v25 }
 0x387   : > { %1533 = vmatpush1.bf16.msra.mxu0 %v5007_v21  ;;  %1574 = vmatpush1.bf16.msra.mxu1 %v5089_v50 }
 0x388   : > { %1534 = vmatprep.subr.bf16.mxu0 %v5014_v24  ;;  %1575 = vmatprep.subr.bf16.mxu1 %v5093_v51 }
 0x38b   : > { %1535 = vmatpush1.bf16.msra.mxu0 %v5017_v26  ;;  %1576 = vmatpush1.bf16.msra.mxu1 %v5099_v52  ;;  %v6564_v26 = vld [vmem:[#allocation26_spill] sm:$0xff] }
 0x38c   : > { %1536 = vmatprep.subr.bf16.mxu0 %v5020_v27  ;;  %1577 = vmatprep.subr.bf16.mxu1 %v5102_v53 }
 0x38f   : > { %1537 = vmatpush1.bf16.msra.mxu0 %v5022_v28  ;;  %1578 = vmatpush1.bf16.msra.mxu1 %v5108_v54 }
 0x390   : > { %1538 = vmatprep.subr.bf16.mxu0 %v5030_v33  ;;  %1579 = vmatprep.subr.bf16.mxu1 %v5112_v55 }
 0x393   : > { %1539 = vmatpush1.bf16.msra.mxu0 %v5034_v35  ;;  %1580 = vmatpush1.bf16.msra.mxu1 %v5117_v56 }
 0x394   : > { %1540 = vmatprep.subr.bf16.mxu0 %v5037_v36  ;;  %1581 = vmatprep.subr.bf16.mxu1 %v5120_v57  ;;  %v6565_v36 = vld [vmem:[#allocation28_spill] sm:$0xff] }
 0x397   : > { %1541 = vmatpush1.bf16.msra.mxu0 %v5043_v37  ;;  %1582 = vmatpush1.bf16.msra.mxu1 %v5126_v58 }
 0x398   : > { %1542 = vmatprep.subr.bf16.mxu0 %v5055_v40  ;;  %1583 = vmatprep.subr.bf16.mxu1 %v5129_v59 }
 0x39b   : > { %1543 = vmatpush1.bf16.msra.mxu0 %v5058_v42  ;;  %1584 = vmatpush1.bf16.msra.mxu1 %v5132_v60 }
 0x39c   : > { %1544 = vmatprep.subr.bf16.mxu0 %v5062_v43  ;;  %1585 = vmatprep.subr.bf16.mxu1 %v5135_v61 }
 0x39f   : > { %1545 = vmatpush1.bf16.msra.mxu0 %v5066_v44  ;;  %1586 = vmatpush1.bf16.msra.mxu1 %v5138_v62 }
 0x3a0   : > { %1641 = vmatprep.subr.bf16.mxu0 %v5414_v20  ;;  %1682 = vmatprep.subr.bf16.mxu1 %v5074_v46 }
 0x442   : > { %v1453_v21 = vpop.f32.mrf.mxu0  ;;  %v1494_v24 = vpop.f32.mrf.mxu1 }
 0x443   : > { %v1501_v27 = vadd.f32 %v1453_v21, %v6564_v26  ;;  %v1503_v46 = vadd.f32 %v1494_v24, %v6567_v39  ;;  %v5478_v21 = vld [vmem:[#allocation5 + $0x20] ss:$16 sps:$4 sm:$0xff]   ;;  %v5482_v24 = vld [vmem:[#allocation5 + $0x4] ss:$16 sps:$4 sm:$0xff]  }
 0x444   : > { %v1455_v28 = vpop.f32.mrf.mxu0  ;;  %v1496_v33 = vpop.f32.mrf.mxu1  ;;  %v5486_v26 = vld [vmem:[#allocation5] ss:$16 sps:$4 sm:$0xff]  }
 0x445   : > { %v3993_v35 = vmul.f32 -1.442695, %v1501_v27  ;;  %v1502_v37 = vadd.f32 %v1455_v28, %v6565_v36  ;;  %v1504_v29 = vadd.f32 %v1496_v33, %v6566_v34  ;;  %v5491_v27 = vld [vmem:[#allocation5 + $0xec] ss:$16 sps:$4 sm:$0xff]  }
 0x446   : > { %v1457_v40 = vpop.f32.mrf.mxu0  ;;  %v1498_v42 = vpop.f32.mrf.mxu1 }
 0x447   : > { %4417 = vpow2.f32 %v3993_v35  ;;  %v3994_v43 = vmul.f32 -1.442695, %v1502_v37  ;;  %v3995_v10 = vmul.f32 -1.442695, %v1504_v29  ;;  %v6568_v35 = vld [vmem:[#allocation30_spill] sm:$0xff] }
 0x448   : > { %v1458_v44 = vpop.f32.mrf.mxu0  ;;  %v1499_v11 = vpop.f32.mrf.mxu1 }
 0x449   : > { %4419 = vpow2.f32 %v3994_v43  ;;  %v6569_v43 = vld [vmem:[#allocation31_spill] sm:$0xff] }
 0x44a   : > { %4421 = vtanh.f32 %v1503_v46 }
 0x44b   : > { %4423 = vpow2.f32 %v3995_v10  ;;  %v6570_v10 = vld [vmem:[#allocation21_spill] sm:$0xff] }
 0x454   : > { %v4418_v1 = vpop.eup %4417 }
 0x455   : > { %v1508_v63 = vadd.f32 1.0, %v4418_v1 }
 0x456   : > { %v4420_v2 = vpop.eup %4419 }
 0x457   : > { %4425 = vrcp.f32 %v1508_v63  ;;  %v1514_v18 = vadd.f32 1.0, %v4420_v2  ;;  %v4422_v17 = vpop.eup %4421  ;;  %v6571_v63 = vld [vmem:[#allocation20_spill] sm:$0xff] }
 0x458   : > { %v4424_v32 = vpop.eup %4423 }
 0x459   : > { %4427 = vrcp.f32 %v1514_v18  ;;  %v1521_v15 = vadd.f32 1.0, %v4424_v32 }
 0x45b   : > { %4429 = vrcp.f32 %v1521_v15 }
 0x464   : > { %v4426_v0 = vpop.eup %4425 }
 0x465   : > { %v1525_v13 = vmul.f32 %v4426_v0, %v4422_v17 }
 0x466   : > { %v4428_v30 = vpop.eup %4427 }
 0x467   : > { %v1524_v4 = vmul.f32 %v4428_v30, %v5373_v16  ;;  %v5438_v16 = vld [vmem:[#allocation5 + $0xc0] ss:$16 sps:$4 sm:$0xff]  }
 0x468   : > { %v4430_v3 = vpop.eup %4429 }
 0x469   : > { %v5423_v12 = vadd.f32 %v1525_v13, %v1524_v4 }
 0x46b   : > { %4431 = vtanh.f32 %v5423_v12 }
 0x478   : > { %v4432_v9 = vpop.eup %4431 }
 0x479   : > { %v5426_v38 = vmul.f32 %v4432_v9, %v4430_v3 }
 0x47b   : > { %v1529_v22 = vpack.c.bf16 %v5426_v38, %v5426_v38 }
 0x47d   : > { %1563 = vmatmul.mubr.bf16.vlgmr.msra.gmra.mxu0 %v1529_v22  ;;  %1604 = vmatmul.mubr.bf16.vlgmr.msra.gmra.mxu1 %v1529_v22 }
 0x47e   : > { %1642 = vmatpush1.bf16.msra.mxu0 %v5380_v8  ;;  %1683 = vmatpush1.bf16.msra.mxu1 %v5080_v47  ;;  %v5446_v47 = vld [vmem:[#allocation5 + $0xa0] ss:$16 sps:$4 sm:$0xff]  }
 0x47f   : > { %1643 = vmatprep.subr.bf16.mxu0 %v5432_v19  ;;  %1684 = vmatprep.subr.bf16.mxu1 %v5083_v49  ;;  %v5450_v49 = vld [vmem:[#allocation5 + $0x84] ss:$16 sps:$4 sm:$0xff]  }
 0x480   : > { %1673 = vmatprep.mubr.bf16.mxu0 %v6562_v25  ;;  %1714 = vmatprep.mubr.bf16.mxu1 %v6562_v25 }
 0x482   : > { %1644 = vmatpush1.bf16.msra.mxu0 %v5438_v16  ;;  %1685 = vmatpush1.bf16.msra.mxu1 %v5089_v50  ;;  %v5458_v50 = vld [vmem:[#allocation5 + $0x64] ss:$16 sps:$4 sm:$0xff]  }
 0x483   : > { %1645 = vmatprep.subr.bf16.mxu0 %v5442_v14  ;;  %1686 = vmatprep.subr.bf16.mxu1 %v5093_v51  ;;  %v5462_v51 = vld [vmem:[#allocation5 + $0x60] ss:$16 sps:$4 sm:$0xff]  }
 0x486   : > { %1646 = vmatpush1.bf16.msra.mxu0 %v5446_v47  ;;  %1687 = vmatpush1.bf16.msra.mxu1 %v5099_v52  ;;  %v5466_v52 = vld [vmem:[#allocation5 + $0x44] ss:$16 sps:$4 sm:$0xff]  }
 0x487   : > { %1647 = vmatprep.subr.bf16.mxu0 %v5450_v49  ;;  %1688 = vmatprep.subr.bf16.mxu1 %v5102_v53  ;;  %v5470_v53 = vld [vmem:[#allocation5 + $0x40] ss:$16 sps:$4 sm:$0xff]  }
 0x48a   : > { %1648 = vmatpush1.bf16.msra.mxu0 %v5454_v31  ;;  %1689 = vmatpush1.bf16.msra.mxu1 %v5108_v54 }
 0x48b   : > { %1649 = vmatprep.subr.bf16.mxu0 %v5458_v50  ;;  %1690 = vmatprep.subr.bf16.mxu1 %v5112_v55 }
 0x48e   : > { %1650 = vmatpush1.bf16.msra.mxu0 %v5462_v51  ;;  %1691 = vmatpush1.bf16.msra.mxu1 %v5117_v56 }
 0x48f   : > { %1651 = vmatprep.subr.bf16.mxu0 %v5466_v52  ;;  %1692 = vmatprep.subr.bf16.mxu1 %v5120_v57 }
 0x492   : > { %1652 = vmatpush1.bf16.msra.mxu0 %v5470_v53  ;;  %1693 = vmatpush1.bf16.msra.mxu1 %v5126_v58 }
 0x493   : > { %1653 = vmatprep.subr.bf16.mxu0 %v5474_v5  ;;  %1694 = vmatprep.subr.bf16.mxu1 %v5129_v59 }
 0x496   : > { %1654 = vmatpush1.bf16.msra.mxu0 %v5478_v21  ;;  %1695 = vmatpush1.bf16.msra.mxu1 %v5132_v60 }
 0x497   : > { %1655 = vmatprep.subr.bf16.mxu0 %v5482_v24  ;;  %1696 = vmatprep.subr.bf16.mxu1 %v5135_v61 }
 0x49a   : > { %1656 = vmatpush1.bf16.msra.mxu0 %v5486_v26  ;;  %1697 = vmatpush1.bf16.msra.mxu1 %v5138_v62 }
 0x49b   : > { %1752 = vmatprep.subr.bf16.mxu0 %v5414_v20  ;;  %1793 = vmatprep.subr.bf16.mxu1 %v5491_v27 }
 0x53d   : > { %v1564_v28 = vpop.f32.mrf.mxu0  ;;  %v1605_v33 = vpop.f32.mrf.mxu1 }
 0x53e   : > { %v1612_v36 = vadd.f32 %v1564_v28, %v6568_v35  ;;  %v1614_v2 = vadd.f32 %v1605_v33, %v6571_v63 }
 0x53f   : > { %v1566_v37 = vpop.f32.mrf.mxu0  ;;  %v1607_v40 = vpop.f32.mrf.mxu1 }
 0x540   : > { %v3996_v42 = vmul.f32 -1.442695, %v1612_v36  ;;  %v1613_v44 = vadd.f32 %v1566_v37, %v6569_v43  ;;  %v1615_v1 = vadd.f32 %v1607_v40, %v6570_v10  ;;  %v5517_v43 = vld [vmem:[#allocation5 + $0xc8] ss:$16 sps:$4 sm:$0xff]  }
 0x541   : > { %v1568_v11 = vpop.f32.mrf.mxu0  ;;  %v1609_v34 = vpop.f32.mrf.mxu1 }
 0x542   : > { %4433 = vpow2.f32 %v3996_v42  ;;  %v3997_v29 = vmul.f32 -1.442695, %v1613_v44  ;;  %v3998_v18 = vmul.f32 -1.442695, %v1615_v1  ;;  %v5507_v42 = vld [vmem:[#allocation5 + $0xe8] ss:$16 sps:$4 sm:$0xff]  }
 0x543   : > { %v1569_v39 = vpop.f32.mrf.mxu0  ;;  %v1610_v46 = vpop.f32.mrf.mxu1  ;;  %v5521_v44 = vld [vmem:[#allocation5 + $0xac] ss:$16 sps:$4 sm:$0xff]   ;;  %v5525_v11 = vld [vmem:[#allocation5 + $0xa8] ss:$16 sps:$4 sm:$0xff]  }
 0x544   : > { %4435 = vpow2.f32 %v3997_v29  ;;  %v5529_v34 = vld [vmem:[#allocation5 + $0x8c] ss:$16 sps:$4 sm:$0xff]  }
 0x545   : > { %4437 = vtanh.f32 %v1614_v2  ;;  %v6573_v1 = vld [vmem:[#allocation22_spill] sm:$0xff] }
 0x546   : > { %4439 = vpow2.f32 %v3998_v18 }
 0x54f   : > { %v4434_v17 = vpop.eup %4433 }
 0x550   : > { %v1619_v32 = vadd.f32 1.0, %v4434_v17 }
 0x551   : > { %v4436_v0 = vpop.eup %4435 }
 0x552   : > { %4441 = vrcp.f32 %v1619_v32  ;;  %v1625_v13 = vadd.f32 1.0, %v4436_v0  ;;  %v4438_v30 = vpop.eup %4437 }
 0x553   : > { %v4440_v15 = vpop.eup %4439 }
 0x554   : > { %4443 = vrcp.f32 %v1625_v13  ;;  %v1632_v22 = vadd.f32 1.0, %v4440_v15 }
 0x556   : > { %4445 = vrcp.f32 %v1632_v22 }
 0x55f   : > { %v4442_v4 = vpop.eup %4441 }
 0x560   : > { %v1636_v3 = vmul.f32 %v4442_v4, %v4438_v30 }
 0x561   : > { %v4444_v9 = vpop.eup %4443 }
 0x562   : > { %v1635_v28 = vmul.f32 %v4444_v9, %v5423_v12  ;;  %v5511_v12 = vld [vmem:[#allocation5 + $0xcc] ss:$16 sps:$4 sm:$0xff]  }
 0x563   : > { %v4446_v33 = vpop.eup %4445 }
 0x564   : > { %v5499_v35 = vadd.f32 %v1636_v3, %v1635_v28 }
 0x566   : > { %4447 = vtanh.f32 %v5499_v35 }
 0x573   : > { %v4448_v36 = vpop.eup %4447 }
 0x574   : > { %v5502_v37 = vmul.f32 %v4448_v36, %v4446_v33  ;;  %v6574_v36 = vld [vmem:[#allocation32_spill] sm:$0xff] }
 0x576   : > { %v1640_v40 = vpack.c.bf16 %v5502_v37, %v5502_v37 }
 0x578   : > { %1674 = vmatmul.mubr.bf16.vlgmr.msra.gmra.mxu0 %v1640_v40  ;;  %1715 = vmatmul.mubr.bf16.vlgmr.msra.gmra.mxu1 %v1640_v40 }
 0x579   : > { %1753 = vmatpush1.bf16.msra.mxu0 %v5380_v8  ;;  %1794 = vmatpush1.bf16.msra.mxu1 %v5507_v42 }
 0x57a   : > { %1754 = vmatprep.subr.bf16.mxu0 %v5432_v19  ;;  %1795 = vmatprep.subr.bf16.mxu1 %v5511_v12 }
 0x57b   : > { %1784 = vmatprep.mubr.bf16.mxu0 %v6562_v25  ;;  %1825 = vmatprep.mubr.bf16.mxu1 %v6562_v25 }
 0x57d   : > { %1755 = vmatpush1.bf16.msra.mxu0 %v5438_v16  ;;  %1796 = vmatpush1.bf16.msra.mxu1 %v5517_v43 }
 0x57e   : > { %1756 = vmatprep.subr.bf16.mxu0 %v5442_v14  ;;  %1797 = vmatprep.subr.bf16.mxu1 %v5521_v44 }
 0x581   : > { %1757 = vmatpush1.bf16.msra.mxu0 %v5446_v47  ;;  %1798 = vmatpush1.bf16.msra.mxu1 %v5525_v11 }
 0x582   : > { %1758 = vmatprep.subr.bf16.mxu0 %v5450_v49  ;;  %1799 = vmatprep.subr.bf16.mxu1 %v5529_v34 }
 0x585   : > { %1759 = vmatpush1.bf16.msra.mxu0 %v5454_v31  ;;  %1800 = vmatpush1.bf16.msra.mxu1 %v5108_v54 }
 0x586   : > { %1760 = vmatprep.subr.bf16.mxu0 %v5458_v50  ;;  %1801 = vmatprep.subr.bf16.mxu1 %v5112_v55 }
 0x589   : > { %1761 = vmatpush1.bf16.msra.mxu0 %v5462_v51  ;;  %1802 = vmatpush1.bf16.msra.mxu1 %v5117_v56 }
 0x58a   : > { %1762 = vmatprep.subr.bf16.mxu0 %v5466_v52  ;;  %1803 = vmatprep.subr.bf16.mxu1 %v5120_v57 }
 0x58d   : > { %1763 = vmatpush1.bf16.msra.mxu0 %v5470_v53  ;;  %1804 = vmatpush1.bf16.msra.mxu1 %v5126_v58 }
 0x58e   : > { %1764 = vmatprep.subr.bf16.mxu0 %v5474_v5  ;;  %1805 = vmatprep.subr.bf16.mxu1 %v5129_v59 }
 0x591   : > { %1765 = vmatpush1.bf16.msra.mxu0 %v5478_v21  ;;  %1806 = vmatpush1.bf16.msra.mxu1 %v5132_v60 }
 0x592   : > { %1766 = vmatprep.subr.bf16.mxu0 %v5482_v24  ;;  %1807 = vmatprep.subr.bf16.mxu1 %v5135_v61 }
 0x595   : > { %1767 = vmatpush1.bf16.msra.mxu0 %v5486_v26  ;;  %1808 = vmatpush1.bf16.msra.mxu1 %v5138_v62  ;;  %v6572_v62 = vld [vmem:[#allocation23_spill] sm:$0xff] }
 0x596   : > { %1863 = vmatprep.subr.bf16.mxu0 %v5414_v20  ;;  %1904 = vmatprep.subr.bf16.mxu1 %v5491_v27 }
 0x638   : > { %v1675_v54 = vpop.f32.mrf.mxu0  ;;  %v1716_v55 = vpop.f32.mrf.mxu1 }
 0x639   : > { %v1723_v56 = vadd.f32 %v1675_v54, %v5256_v41  ;;  %v1725_v27 = vadd.f32 %v1716_v55, %v6573_v1  ;;  %v6576_v55 = vld [vmem:[#allocation25_spill] sm:$0xff] }
 0x63a   : > { %v1677_v57 = vpop.f32.mrf.mxu0  ;;  %v1718_v58 = vpop.f32.mrf.mxu1 }
 0x63b   : > { %v3999_v59 = vmul.f32 -1.442695, %v1723_v56  ;;  %v1724_v60 = vadd.f32 %v1677_v57, %v5259_v48  ;;  %v1726_v20 = vadd.f32 %v1718_v58, %v6572_v62  ;;  %v6577_v57 = vld [vmem:[#allocation24_spill] sm:$0xff] }
 0x63c   : > { %v1679_v29 = vpop.f32.mrf.mxu0  ;;  %v1720_v39 = vpop.f32.mrf.mxu1 }
 0x63d   : > { %4449 = vpow2.f32 %v3999_v59  ;;  %v4000_v61 = vmul.f32 -1.442695, %v1724_v60  ;;  %v4001_v63 = vmul.f32 -1.442695, %v1726_v20 }
 0x63e   : > { %v1680_v46 = vpop.f32.mrf.mxu0  ;;  %v1721_v10 = vpop.f32.mrf.mxu1 }
 0x63f   : > { %4451 = vpow2.f32 %v4000_v61 }
 0x640   : > { %4453 = vtanh.f32 %v1725_v27 }
 0x641   : > { %4455 = vpow2.f32 %v4001_v63 }
 0x64a   : > { %v4450_v2 = vpop.eup %4449 }
 0x64b   : > { %v1730_v18 = vadd.f32 1.0, %v4450_v2 }
 0x64c   : > { %v4452_v41 = vpop.eup %4451 }
 0x64d   : > { %4457 = vrcp.f32 %v1730_v18  ;;  %v1736_v17 = vadd.f32 1.0, %v4452_v41  ;;  %v4454_v48 = vpop.eup %4453 }
 0x64e   : > { %v4456_v32 = vpop.eup %4455 }
 0x64f   : > { %4459 = vrcp.f32 %v1736_v17  ;;  %v1743_v15 = vadd.f32 1.0, %v4456_v32  ;;  %v4268_v32 = vld [vmem:[#allocation7 + $0xe8] ss:$16 sps:$4 sm:$0xff]  }
 0x651   : > { %4461 = vrcp.f32 %v1743_v15  ;;  %v4271_v15 = vld [vmem:[#allocation7 + $0xc0] ss:$16 sps:$4 sm:$0xff]  }
 0x65a   : > { %v4458_v0 = vpop.eup %4457 }
 0x65b   : > { %v1747_v13 = vmul.f32 %v4458_v0, %v4454_v48  ;;  %v4265_v48 = vld [vmem:[#allocation7 + $0xe0] ss:$16 sps:$4 sm:$0xff]  }
 0x65c   : > { %v4460_v30 = vpop.eup %4459 }
 0x65d   : > { %v1746_v4 = vmul.f32 %v4460_v30, %v5499_v35  ;;  %v4276_v30 = vld [vmem:[#allocation7 + $0xcc] ss:$16 sps:$4 sm:$0xff]  }
 0x65e   : > { %v4462_v9 = vpop.eup %4461 }
 0x65f   : > { %v5557_v3 = vadd.f32 %v1747_v13, %v1746_v4  ;;  %v4273_v13 = vld [vmem:[#allocation7 + $0xc4] ss:$16 sps:$4 sm:$0xff]   ;;  %v4274_v4 = vld [vmem:[#allocation7 + $0xc8] ss:$16 sps:$4 sm:$0xff]  }
 0x661   : > { %4463 = vtanh.f32 %v5557_v3 }
 0x66e   : > { %v4464_v22 = vpop.eup %4463 }
 0x66f   : > { %v5560_v28 = vmul.f32 %v4464_v22, %v4462_v9  ;;  %v4282_v9 = vld [vmem:[#allocation7 + $0xac] ss:$16 sps:$4 sm:$0xff]   ;;  %v4277_v22 = vld [vmem:[#allocation7 + $0xa0] ss:$16 sps:$4 sm:$0xff]  }
 0x671   : > { %v1751_v33 = vpack.c.bf16 %v5560_v28, %v5560_v28 }
 0x673   : > { %1785 = vmatmul.mubr.bf16.vlgmr.msra.gmra.mxu0 %v1751_v33  ;;  %1826 = vmatmul.mubr.bf16.vlgmr.msra.gmra.mxu1 %v1751_v33  ;;  %v4280_v33 = vld [vmem:[#allocation7 + $0xa8] ss:$16 sps:$4 sm:$0xff]  }
 0x674   : > { %1864 = vmatpush1.bf16.msra.mxu0 %v5380_v8  ;;  %1905 = vmatpush1.bf16.msra.mxu1 %v5507_v42  ;;  %v4648_v8 = vld [vmem:[#allocation5 + $0x88] ss:$16 sps:$4 sm:$0xff]  }
 0x675   : > { %1865 = vmatprep.subr.bf16.mxu0 %v5432_v19  ;;  %1906 = vmatprep.subr.bf16.mxu1 %v5511_v12  ;;  %v4649_v19 = vld [vmem:[#allocation5 + $0x6c] ss:$16 sps:$4 sm:$0xff]  }
 0x676   : > { %1895 = vmatprep.mubr.bf16.mxu0 %v6562_v25  ;;  %1936 = vmatprep.mubr.bf16.mxu1 %v6562_v25 }
 0x678   : > { %1866 = vmatpush1.bf16.msra.mxu0 %v5438_v16  ;;  %1907 = vmatpush1.bf16.msra.mxu1 %v5517_v43  ;;  %v4650_v16 = vld [vmem:[#allocation5 + $0x68] ss:$16 sps:$4 sm:$0xff]   ;;  %v6575_v43 = vld [vmem:[#allocation33_spill] sm:$0xff] }
 0x679   : > { %1867 = vmatprep.subr.bf16.mxu0 %v5442_v14  ;;  %1908 = vmatprep.subr.bf16.mxu1 %v5521_v44  ;;  %v4651_v14 = vld [vmem:[#allocation5 + $0x4c] ss:$16 sps:$4 sm:$0xff]  }
 0x67c   : > { %1868 = vmatpush1.bf16.msra.mxu0 %v5446_v47  ;;  %1909 = vmatpush1.bf16.msra.mxu1 %v5525_v11  ;;  %v4652_v47 = vld [vmem:[#allocation5 + $0x48] ss:$16 sps:$4 sm:$0xff]  }
 0x67d   : > { %1869 = vmatprep.subr.bf16.mxu0 %v5450_v49  ;;  %1910 = vmatprep.subr.bf16.mxu1 %v5529_v34  ;;  %v4653_v49 = vld [vmem:[#allocation5 + $0x2c] ss:$16 sps:$4 sm:$0xff]  }
 0x680   : > { %1870 = vmatpush1.bf16.msra.mxu0 %v5454_v31  ;;  %1911 = vmatpush1.bf16.msra.mxu1 %v4648_v8  ;;  %v4654_v31 = vld [vmem:[#allocation5 + $0x28] ss:$16 sps:$4 sm:$0xff]   ;;  %v4285_v8 = vld [vmem:[#allocation7 + $0x84] ss:$16 sps:$4 sm:$0xff]  }
 0x681   : > { %1871 = vmatprep.subr.bf16.mxu0 %v5458_v50  ;;  %1912 = vmatprep.subr.bf16.mxu1 %v4649_v19  ;;  %v4655_v50 = vld [vmem:[#allocation5 + $0xc] ss:$16 sps:$4 sm:$0xff]  }
 0x682   : > { %v4288_v19 = vld [vmem:[#allocation7 + $0x8c] ss:$16 sps:$4 sm:$0xff]  }
 0x684   : > { %1872 = vmatpush1.bf16.msra.mxu0 %v5462_v51  ;;  %1913 = vmatpush1.bf16.msra.mxu1 %v4650_v16  ;;  %v4656_v51 = vld [vmem:[#allocation5 + $0x8] ss:$16 sps:$4 sm:$0xff]   ;;  %v4283_v16 = vld [vmem:[#allocation7 + $0x80] ss:$16 sps:$4 sm:$0xff]  }
 0x685   : > { %1873 = vmatprep.subr.bf16.mxu0 %v5466_v52  ;;  %1914 = vmatprep.subr.bf16.mxu1 %v4651_v14  ;;  %v4267_v52 = vld [vmem:[#allocation7 + $0xe4] ss:$16 sps:$4 sm:$0xff]   ;;  %v4286_v14 = vld [vmem:[#allocation7 + $0x88] ss:$16 sps:$4 sm:$0xff]  }
 0x688   : > { %1874 = vmatpush1.bf16.msra.mxu0 %v5470_v53  ;;  %1915 = vmatpush1.bf16.msra.mxu1 %v4652_v47  ;;  %v4270_v53 = vld [vmem:[#allocation7 + $0xec] ss:$16 sps:$4 sm:$0xff]   ;;  %v4291_v47 = vld [vmem:[#allocation7 + $0x64] ss:$16 sps:$4 sm:$0xff]  }
 0x689   : > { %1875 = vmatprep.subr.bf16.mxu0 %v5474_v5  ;;  %1916 = vmatprep.subr.bf16.mxu1 %v4653_v49  ;;  %v4294_v49 = vld [vmem:[#allocation7 + $0x6c] ss:$16 sps:$4 sm:$0xff]  }
 0x68c   : > { %1876 = vmatpush1.bf16.msra.mxu0 %v5478_v21  ;;  %1917 = vmatpush1.bf16.msra.mxu1 %v4654_v31  ;;  %v4289_v31 = vld [vmem:[#allocation7 + $0x60] ss:$16 sps:$4 sm:$0xff]  }
 0x68d   : > { %1877 = vmatprep.subr.bf16.mxu0 %v5482_v24  ;;  %1918 = vmatprep.subr.bf16.mxu1 %v4655_v50  ;;  %v4292_v50 = vld [vmem:[#allocation7 + $0x68] ss:$16 sps:$4 sm:$0xff]  }
 0x690   : > { %1878 = vmatpush1.bf16.msra.mxu0 %v5486_v26  ;;  %1919 = vmatpush1.bf16.msra.mxu1 %v4656_v51  ;;  %v4297_v51 = vld [vmem:[#allocation7 + $0x44] ss:$16 sps:$4 sm:$0xff]  }
 0x691   : > { %2193 = vmatprep.subr.bf16.mxu0 %v4267_v52  ;;  %2266 = vmatprep.subr.bf16.mxu1 %v4270_v53  ;;  %v4300_v52 = vld [vmem:[#allocation7 + $0x4c] ss:$16 sps:$4 sm:$0xff]   ;;  %v4295_v53 = vld [vmem:[#allocation7 + $0x40] ss:$16 sps:$4 sm:$0xff]  }
 0x733   : > { %v1786_v35 = vpop.f32.mrf.mxu0  ;;  %v1827_v5 = vpop.f32.mrf.mxu1 }
 0x734   : > { %v1834_v40 = vadd.f32 %v1786_v35, %v6574_v36  ;;  %v1836_v58 = vadd.f32 %v1827_v5, %v6577_v57  ;;  %v4298_v35 = vld [vmem:[#allocation7 + $0x48] ss:$16 sps:$4 sm:$0xff]   ;;  %v4303_v5 = vld [vmem:[#allocation7 + $0x24] ss:$16 sps:$4 sm:$0xff]   ;;  %v4306_v36 = vld [vmem:[#allocation7 + $0x2c] ss:$16 sps:$4 sm:$0xff]  }
 0x735   : > { %v1788_v42 = vpop.f32.mrf.mxu0  ;;  %v1829_v21 = vpop.f32.mrf.mxu1  ;;  %v5674_v57 = vld [vmem:[%s6509_s5 + $0xa0] ss:$16 sps:$4 sm:$0xff]  }
 0x736   : > { %v4002_v12 = vmul.f32 -1.442695, %v1834_v40  ;;  %v1835_v44 = vadd.f32 %v1788_v42, %v6575_v43  ;;  %v1837_v56 = vadd.f32 %v1829_v21, %v6576_v55  ;;  %v4301_v40 = vld [vmem:[#allocation7 + $0x20] ss:$16 sps:$4 sm:$0xff]   ;;  %v4304_v42 = vld [vmem:[#allocation7 + $0x28] ss:$16 sps:$4 sm:$0xff]  }
 0x737   : > { %v1790_v24 = vpop.f32.mrf.mxu0  ;;  %v1831_v11 = vpop.f32.mrf.mxu1  ;;  %v4309_v21 = vld [vmem:[#allocation7 + $0x4] ss:$16 sps:$4 sm:$0xff]   ;;  %v4307_v43 = vld [vmem:[#allocation7] ss:$16 sps:$4 sm:$0xff]  }
 0x738   : > { %4465 = vpow2.f32 %v4002_v12  ;;  %v4003_v34 = vmul.f32 -1.442695, %v1835_v44  ;;  %v4004_v59 = vmul.f32 -1.442695, %v1837_v56  ;;  %v4312_v12 = vld [vmem:[#allocation7 + $0xc] ss:$16 sps:$4 sm:$0xff]   ;;  %v1975_v24 = vpack.c.bf16 %v5330_v45, %v5280_v7 }
 0x739   : > { %v1791_v26 = vpop.f32.mrf.mxu0  ;;  %v1832_v54 = vpop.f32.mrf.mxu1  ;;  %v4310_v44 = vld [vmem:[#allocation7 + $0x8] ss:$16 sps:$4 sm:$0xff]   ;;  %v1976_v11 = vpack.c.bf16 %v5426_v38, %v5376_v6  ;;  %v5616_v7 = vld [vmem:[%s6509_s5 + $0xe4] ss:$16 sps:$4 sm:$0xff]   ;;  %v5621_v45 = vld [vmem:[%s6509_s5 + $0xec] ss:$16 sps:$4 sm:$0xff]  }
 0x73a   : > { %4467 = vpow2.f32 %v4003_v34  ;;  %v1977_v34 = vpack.c.bf16 %v5560_v28, %v5502_v37  ;;  %v5626_v6 = vld [vmem:[%s6509_s5 + $0xe0] ss:$16 sps:$4 sm:$0xff]   ;;  %v5631_v38 = vld [vmem:[%s6509_s5 + $0xe8] ss:$16 sps:$4 sm:$0xff]   ;;  %v5640_v37 = vld [vmem:[%s6509_s5 + $0xc4] ss:$16 sps:$4 sm:$0xff]  }
 0x73b   : > { %4469 = vtanh.f32 %v1836_v58  ;;  %v5645_v28 = vld [vmem:[%s6509_s5 + $0xcc] ss:$16 sps:$4 sm:$0xff]   ;;  %v5650_v26 = vld [vmem:[%s6509_s5 + $0xc0] ss:$16 sps:$4 sm:$0xff]   ;;  %v5655_v54 = vld [vmem:[%s6509_s5 + $0xc8] ss:$16 sps:$4 sm:$0xff]  }
 0x73c   : > { %4471 = vpow2.f32 %v4004_v59  ;;  %v5664_v55 = vld [vmem:[%s6509_s5 + $0xa4] ss:$16 sps:$4 sm:$0xff]   ;;  %v5669_v56 = vld [vmem:[%s6509_s5 + $0xac] ss:$16 sps:$4 sm:$0xff]   ;;  %v5679_v58 = vld [vmem:[%s6509_s5 + $0xa8] ss:$16 sps:$4 sm:$0xff]  }
 0x73d   : > { %v5688_v59 = vld [vmem:[%s6509_s5 + $0x84] ss:$16 sps:$4 sm:$0xff]  }
 0x745   : > { %v4466_v60 = vpop.eup %4465 }
 0x746   : > { %v1841_v29 = vadd.f32 1.0, %v4466_v60  ;;  %v5693_v60 = vld [vmem:[%s6509_s5 + $0x8c] ss:$16 sps:$4 sm:$0xff]  }
 0x747   : > { %v4468_v39 = vpop.eup %4467 }
 0x748   : > { %4473 = vrcp.f32 %v1841_v29  ;;  %v1847_v61 = vadd.f32 1.0, %v4468_v39  ;;  %v4470_v46 = vpop.eup %4469  ;;  %v5698_v29 = vld [vmem:[%s6509_s5 + $0x80] ss:$16 sps:$4 sm:$0xff]   ;;  %v5703_v39 = vld [vmem:[%s6509_s5 + $0x88] ss:$16 sps:$4 sm:$0xff]  }
 0x749   : > { %v4472_v10 = vpop.eup %4471 }
 0x74a   : > { %4475 = vrcp.f32 %v1847_v61  ;;  %v1854_v27 = vadd.f32 1.0, %v4472_v10  ;;  %v5712_v61 = vld [vmem:[%s6509_s5 + $0x64] ss:$16 sps:$4 sm:$0xff]   ;;  %v5722_v10 = vld [vmem:[%s6509_s5 + $0x60] ss:$16 sps:$4 sm:$0xff]  }
 0x74c   : > { %4477 = vrcp.f32 %v1854_v27  ;;  %v5746_v27 = vld [vmem:[%s6509_s5 + $0x40] ss:$16 sps:$4 sm:$0xff]  }
 0x755   : > { %v4474_v62 = vpop.eup %4473 }
 0x756   : > { %v1858_v20 = vmul.f32 %v4474_v62, %v4470_v46  ;;  %v5717_v46 = vld [vmem:[%s6509_s5 + $0x6c] ss:$16 sps:$4 sm:$0xff]   ;;  %v5727_v62 = vld [vmem:[%s6509_s5 + $0x68] ss:$16 sps:$4 sm:$0xff]  }
 0x757   : > { %v4476_v1 = vpop.eup %4475 }
 0x758   : > { %v1857_v63 = vmul.f32 %v4476_v1, %v5557_v3  ;;  %v4279_v3 = vld [vmem:[#allocation7 + $0xa4] ss:$16 sps:$4 sm:$0xff]   ;;  %v5741_v1 = vld [vmem:[%s6509_s5 + $0x4c] ss:$16 sps:$4 sm:$0xff]  }
 0x759   : > { %v4478_v18 = vpop.eup %4477 }
 0x75a   : > { %v5592_v2 = vadd.f32 %v1858_v20, %v1857_v63  ;;  %v5736_v20 = vld [vmem:[%s6509_s5 + $0x44] ss:$16 sps:$4 sm:$0xff]   ;;  %v5751_v63 = vld [vmem:[%s6509_s5 + $0x48] ss:$16 sps:$4 sm:$0xff]  }
 0x75c   : > { %4479 = vtanh.f32 %v5592_v2 }
 0x769   : > { %v4480_v41 = vpop.eup %4479 }
 0x76a   : > { %v5595_v17 = vmul.f32 %v4480_v41, %v4478_v18  ;;  %v5756_v18 = vld [vmem:[%s6509_s5 + $0x24] ss:$16 sps:$4 sm:$0xff]   ;;  %v5766_v41 = vld [vmem:[%s6509_s5 + $0x2c] ss:$16 sps:$4 sm:$0xff]  }
 0x76c   : > { %v1862_v0 = vpack.c.bf16 %v5595_v17, %v5595_v17 }
 0x76e   : > { %1896 = vmatmul.mubr.bf16.vlgmr.msra.gmra.mxu0 %v1862_v0  ;;  %1937 = vmatmul.mubr.bf16.vlgmr.msra.gmra.mxu1 %v1862_v0  ;;  %v5781_v0 = vld [vmem:[%s6509_s5 + $0x4] ss:$16 sps:$4 sm:$0xff]  }
 0x76f   : > { %2194 = vmatpush1.bf16.msra.mxu0 %v4265_v48  ;;  %2267 = vmatpush1.bf16.msra.mxu1 %v4268_v32  ;;  %v5771_v48 = vld [vmem:[%s6509_s5 + $0x20] ss:$16 sps:$4 sm:$0xff]   ;;  %v5776_v32 = vld [vmem:[%s6509_s5 + $0x28] ss:$16 sps:$4 sm:$0xff]  }
 0x770   : > { %2195 = vmatprep.subr.bf16.mxu0 %v4273_v13  ;;  %2268 = vmatprep.subr.bf16.mxu1 %v4276_v30  ;;  %v5787_v13 = vld [vmem:[%s6509_s5 + $0xc] ss:$16 sps:$4 sm:$0xff]   ;;  %v5794_v30 = vld [vmem:[%s6509_s5] ss:$16 sps:$4 sm:$0xff]  }
 0x771   : > { %2225 = vmatprep.mubr.bf16.mxu0 %v6562_v25  ;;  %2298 = vmatprep.mubr.bf16.mxu1 %v6562_v25 }
 0x773   : > { %2196 = vmatpush1.bf16.msra.mxu0 %v4271_v15  ;;  %2269 = vmatpush1.bf16.msra.mxu1 %v4274_v4  ;;  %v5799_v15 = vld [vmem:[%s6509_s5 + $0x8] ss:$16 sps:$4 sm:$0xff]  }
 0x774   : > { %2197 = vmatprep.subr.bf16.mxu0 %v4279_v3  ;;  %2270 = vmatprep.subr.bf16.mxu1 %v4282_v9  ;;  %v6578_v9 = vld [vmem:[#allocation35_spill] sm:$0xff] }
 0x777   : > { %2198 = vmatpush1.bf16.msra.mxu0 %v4277_v22  ;;  %2271 = vmatpush1.bf16.msra.mxu1 %v4280_v33  ;;  %v816_v22 = vadd.f32 %v6578_v9, %v5221_v23  ;;  %v6579_v33 = vld [vmem:[#allocation34_spill] sm:$0xff] }
 0x778   : > { %2199 = vmatprep.subr.bf16.mxu0 %v4285_v8  ;;  %2272 = vmatprep.subr.bf16.mxu1 %v4288_v19 }
 0x77b   : > { %2200 = vmatpush1.bf16.msra.mxu0 %v4283_v16  ;;  %2273 = vmatpush1.bf16.msra.mxu1 %v4286_v14 }
 0x77c   : > { %2201 = vmatprep.subr.bf16.mxu0 %v4291_v47  ;;  %2274 = vmatprep.subr.bf16.mxu1 %v4294_v49 }
 0x77f   : > { %2202 = vmatpush1.bf16.msra.mxu0 %v4289_v31  ;;  %2275 = vmatpush1.bf16.msra.mxu1 %v4292_v50 }
 0x780   : > { %2203 = vmatprep.subr.bf16.mxu0 %v4297_v51  ;;  %2276 = vmatprep.subr.bf16.mxu1 %v4300_v52 }
 0x783   : > { %2204 = vmatpush1.bf16.msra.mxu0 %v4295_v53  ;;  %2277 = vmatpush1.bf16.msra.mxu1 %v4298_v35  ;;  %v6580_v53 = vld [vmem:[#allocation29_spill] sm:$0xff] }
 0x784   : > { %2205 = vmatprep.subr.bf16.mxu0 %v4303_v5  ;;  %2278 = vmatprep.subr.bf16.mxu1 %v4306_v36  ;;  %v6581_v5 = vld [vmem:[#allocation27_spill] sm:$0xff] }
 0x787   : > { %2206 = vmatpush1.bf16.msra.mxu0 %v4301_v40  ;;  %2279 = vmatpush1.bf16.msra.mxu1 %v4304_v42 }
 0x788   : > { %2207 = vmatprep.subr.bf16.mxu0 %v4309_v21  ;;  %2280 = vmatprep.subr.bf16.mxu1 %v4312_v12 }
 0x78b   : > { %2208 = vmatpush1.bf16.msra.mxu0 %v4307_v43  ;;  %2281 = vmatpush1.bf16.msra.mxu1 %v4310_v44 }
 0x78c   : > { %2536 = vmatprep.subr.bf16.mxu0 %v5616_v7  ;;  %2577 = vmatprep.subr.bf16.mxu1 %v5621_v45 }
 0x78e   : > { %2226 = vmatmul.mubr.bf16.vlgmr.msra.gmra.mxu0 %v1975_v24  ;;  %2299 = vmatmul.mubr.bf16.vlgmr.msra.gmra.mxu1 %v1975_v24 }
 0x78f   : > { %2235 = vmatprep.mubr.bf16.mxu0 %v6562_v25  ;;  %2308 = vmatprep.mubr.bf16.mxu1 %v6562_v25 }
 0x790   : > { %2537 = vmatpush1.bf16.msra.mxu0 %v5626_v6  ;;  %2578 = vmatpush1.bf16.msra.mxu1 %v5631_v38 }
 0x791   : > { %2538 = vmatprep.subr.bf16.mxu0 %v5640_v37  ;;  %2579 = vmatprep.subr.bf16.mxu1 %v5645_v28 }
 0x794   : > { %2539 = vmatpush1.bf16.msra.mxu0 %v5650_v26  ;;  %2580 = vmatpush1.bf16.msra.mxu1 %v5655_v54 }
 0x795   : > { %2540 = vmatprep.subr.bf16.mxu0 %v5664_v55  ;;  %2581 = vmatprep.subr.bf16.mxu1 %v5669_v56 }
 0x796   : > { %2236 = vmatmul.mubr.bf16.gmra.mxu0 %v1976_v11  ;;  %2309 = vmatmul.mubr.bf16.gmra.mxu1 %v1976_v11 }
 0x797   : > { %2245 = vmatprep.mubr.bf16.mxu0 %v6562_v25  ;;  %2318 = vmatprep.mubr.bf16.mxu1 %v6562_v25 }
 0x798   : > { %2541 = vmatpush1.bf16.msra.mxu0 %v5674_v57  ;;  %2582 = vmatpush1.bf16.msra.mxu1 %v5679_v58 }
 0x799   : > { %2542 = vmatprep.subr.bf16.mxu0 %v5688_v59  ;;  %2583 = vmatprep.subr.bf16.mxu1 %v5693_v60 }
 0x79c   : > { %2543 = vmatpush1.bf16.msra.mxu0 %v5698_v29  ;;  %2584 = vmatpush1.bf16.msra.mxu1 %v5703_v39 }
 0x79d   : > { %2544 = vmatprep.subr.bf16.mxu0 %v5712_v61  ;;  %2585 = vmatprep.subr.bf16.mxu1 %v5717_v46 }
 0x79e   : > { %2246 = vmatmul.mubr.bf16.gmra.mxu0 %v1977_v34  ;;  %2319 = vmatmul.mubr.bf16.gmra.mxu1 %v1977_v34 }
 0x79f   : > { %2255 = vmatprep.mubr.bf16.mxu0 %v6562_v25  ;;  %2328 = vmatprep.mubr.bf16.mxu1 %v6562_v25 }
 0x7a0   : > { %2545 = vmatpush1.bf16.msra.mxu0 %v5722_v10  ;;  %2586 = vmatpush1.bf16.msra.mxu1 %v5727_v62 }
 0x7a1   : > { %2546 = vmatprep.subr.bf16.mxu0 %v5736_v20  ;;  %2587 = vmatprep.subr.bf16.mxu1 %v5741_v1 }
 0x7a4   : > { %2547 = vmatpush1.bf16.msra.mxu0 %v5746_v27  ;;  %2588 = vmatpush1.bf16.msra.mxu1 %v5751_v63 }
 0x7a5   : > { %2548 = vmatprep.subr.bf16.mxu0 %v5756_v18  ;;  %2589 = vmatprep.subr.bf16.mxu1 %v5766_v41 }
 0x7a8   : > { %2549 = vmatpush1.bf16.msra.mxu0 %v5771_v48  ;;  %2590 = vmatpush1.bf16.msra.mxu1 %v5776_v32 }
 0x7a9   : > { %2550 = vmatprep.subr.bf16.mxu0 %v5781_v0  ;;  %2591 = vmatprep.subr.bf16.mxu1 %v5787_v13 }
 0x7ac   : > { %2551 = vmatpush1.bf16.msra.mxu0 %v5794_v30  ;;  %2592 = vmatpush1.bf16.msra.mxu1 %v5799_v15 }
 0x7ad   : > { %2647 = vmatprep.subr.bf16.mxu0 %v5616_v7  ;;  %2688 = vmatprep.subr.bf16.mxu1 %v5621_v45 }
 0x82e   : > { %v1897_v4 = vpop.f32.mrf.mxu0  ;;  %v1938_v3 = vpop.f32.mrf.mxu1 }
 0x82f   : > { %v1945_v8 = vadd.f32 %v1897_v4, %v6579_v33  ;;  %v1947_v36 = vadd.f32 %v1938_v3, %v6581_v5 }
 0x830   : > { %v1899_v19 = vpop.f32.mrf.mxu0  ;;  %v1940_v16 = vpop.f32.mrf.mxu1 }
 0x831   : > { %v4005_v14 = vmul.f32 -1.442695, %v1945_v8  ;;  %v1946_v47 = vadd.f32 %v1899_v19, %v816_v22  ;;  %v1948_v35 = vadd.f32 %v1940_v16, %v6580_v53 }
 0x832   : > { %v1901_v49 = vpop.f32.mrf.mxu0  ;;  %v1942_v31 = vpop.f32.mrf.mxu1 }
 0x833   : > { %4481 = vpow2.f32 %v4005_v14  ;;  %v4006_v50 = vmul.f32 -1.442695, %v1946_v47  ;;  %v4007_v40 = vmul.f32 -1.442695, %v1948_v35 }
 0x834   : > { %v1902_v51 = vpop.f32.mrf.mxu0  ;;  %v1943_v52 = vpop.f32.mrf.mxu1 }
 0x835   : > { %4483 = vpow2.f32 %v4006_v50 }
 0x836   : > { %4485 = vtanh.f32 %v1947_v36 }
 0x837   : > { %4487 = vpow2.f32 %v4007_v40 }
 0x840   : > { %v4482_v42 = vpop.eup %4481 }
 0x841   : > { %v1952_v23 = vadd.f32 1.0, %v4482_v42 }
 0x842   : > { %v4484_v21 = vpop.eup %4483 }
 0x843   : > { %4489 = vrcp.f32 %v1952_v23  ;;  %v1958_v12 = vadd.f32 1.0, %v4484_v21  ;;  %v4486_v43 = vpop.eup %4485 }
 0x844   : > { %v4488_v44 = vpop.eup %4487 }
 0x845   : > { %4491 = vrcp.f32 %v1958_v12  ;;  %v1965_v4 = vadd.f32 1.0, %v4488_v44 }
 0x847   : > { %4493 = vrcp.f32 %v1965_v4 }
 0x84e   : > { %v2300_v14 = vpop.f32.mrf.mxu1 }
 0x850   : > { %v4490_v24 = vpop.eup %4489  ;;  %v2302_v49 = vpop.f32.mrf.mxu1 }
 0x851   : > { %v1969_v11 = vmul.f32 %v4490_v24, %v4486_v43 }
 0x852   : > { %v4492_v34 = vpop.eup %4491  ;;  %v5862_v50 = vpop.f32.mrf.mxu1 }
 0x853   : > { %v1968_v9 = vmul.f32 %v4492_v34, %v5592_v2  ;;  %v4040_v2 = vld [vmem:[%s610_s25 + $0x8] sm:$0xff] }
 0x854   : > { %v4494_v22 = vpop.eup %4493  ;;  %v2375_v16 = vpack.c.bf16 %v4040_v2, %v4040_v2  ;;  %v5866_v52 = vpop.f32.mrf.mxu1  ;;  %v6599_v2 = vld [vmem:[#allocation17_spill] sm:$0xff] }
 0x855   : > { %v1970_v3 = vadd.f32 %v1969_v11, %v1968_v9 }
 0x856   : > { %v5870_v35 = vpop.f32.mrf.mxu1 }
 0x857   : > { %1974 = vst [vmem:[%s5814_s15] sm:$0xff] %v1970_v3  ;;  %4495 = vtanh.f32 %v1970_v3  ;;  %6582 = vst [vmem:[#allocation26_spill] sm:$0xff] %v5870_v35  ;;  %v2011_v3 = vld [vmem:[%s6510_s6] sm:$0xf] }
 0x858   : > { %v5874_v36 = vpop.f32.mrf.mxu1 }
 0x85a   : > { %v5878_v42 = vpop.f32.mrf.mxu1 }
 0x85b   : > { %6584 = vst [vmem:[#allocation19_spill] sm:$0xff] %v5878_v42 }
 0x85c   : > { %v5882_v21 = vpop.f32.mrf.mxu1 }
 0x85d   : > { %6586 = vst [vmem:[#allocation30_spill] sm:$0xff] %v5882_v21 }
 0x85e   : > { %v5886_v43 = vpop.f32.mrf.mxu1 }
 0x85f   : > { %6588 = vst [vmem:[#allocation21_spill] sm:$0xff] %v5886_v43 }
 0x860   : > { %v5890_v24 = vpop.f32.mrf.mxu1 }
 0x861   : > { %6590 = vst [vmem:[#allocation23_spill] sm:$0xff] %v5890_v24 }
 0x862   : > { %v5894_v34 = vpop.f32.mrf.mxu1 }
 0x863   : > { %6592 = vst [vmem:[#allocation32_spill] sm:$0xff] %v5894_v34 }
 0x864   : > { %v4496_v33 = vpop.eup %4495  ;;  %v5898_v9 = vpop.f32.mrf.mxu1 }
 0x865   : > { %v1972_v8 = vmul.f32 %v4496_v33, %v4494_v22  ;;  %6594 = vst [vmem:[#allocation25_spill] sm:$0xff] %v5898_v9  ;;  %v6603_v9 = vsub.s32 1, %v6599_v2 }
 0x867   : > { %1973 = vst [vmem:[%s5818_s21] sm:$0xff] %v1972_v8  ;;  %v1978_v19 = vpack.c.bf16 %v1972_v8, %v5595_v17  ;;  %v2227_v17 = vpop.f32.mrf.mxu0  ;;  %v5921_v43 = vrot.slane %v2011_v3, %v6603_v9 }
 0x869   : > { %2256 = vmatmul.mubr.bf16.gmra.mxu0 %v1978_v19  ;;  %2329 = vmatmul.mubr.bf16.gmra.mxu1 %v1978_v19  ;;  %v2229_v47 = vpop.f32.mrf.mxu0 }
 0x86a   : > { %2568 = vmatprep.mubr.bf16.mxu0 %v6562_v25  ;;  %2609 = vmatprep.mubr.bf16.mxu1 %v6562_v25 }
 0x86b   : > { %v5860_v31 = vpop.f32.mrf.mxu0 }
 0x86d   : > { %v5864_v51 = vpop.f32.mrf.mxu0 }
 0x86f   : > { %v5868_v53 = vpop.f32.mrf.mxu0 }
 0x871   : > { %2569 = vmatmul.mubr.bf16.vlgmr.msra.gmra.mxu0 %v2375_v16  ;;  %2610 = vmatmul.mubr.bf16.vlgmr.msra.gmra.mxu1 %v2375_v16  ;;  %v5872_v5 = vpop.f32.mrf.mxu0  ;;  %v6600_v16 = vsub.s32 0, %v6599_v2 }
 0x872   : > { %2648 = vmatpush1.bf16.msra.mxu0 %v5626_v6  ;;  %2689 = vmatpush1.bf16.msra.mxu1 %v5631_v38 }
 0x873   : > { %2649 = vmatprep.subr.bf16.mxu0 %v5640_v37  ;;  %2690 = vmatprep.subr.bf16.mxu1 %v5645_v28  ;;  %v5876_v40 = vpop.f32.mrf.mxu0 }
 0x874   : > { %2679 = vmatprep.mubr.bf16.mxu0 %v6562_v25  ;;  %2720 = vmatprep.mubr.bf16.mxu1 %v6562_v25  ;;  %6583 = vst [vmem:[#allocation28_spill] sm:$0xff] %v5876_v40  ;;  %v6606_v40 = vsub.s32 3, %v6599_v2 }
 0x875   : > { %v5880_v23 = vpop.f32.mrf.mxu0 }
 0x876   : > { %2650 = vmatpush1.bf16.msra.mxu0 %v5650_v26  ;;  %2691 = vmatpush1.bf16.msra.mxu1 %v5655_v54  ;;  %6585 = vst [vmem:[#allocation18_spill] sm:$0xff] %v5880_v23 }
 0x877   : > { %2651 = vmatprep.subr.bf16.mxu0 %v5664_v55  ;;  %2692 = vmatprep.subr.bf16.mxu1 %v5669_v56  ;;  %v5884_v12 = vpop.f32.mrf.mxu0 }
 0x878   : > { %6587 = vst [vmem:[#allocation31_spill] sm:$0xff] %v5884_v12 }
 0x879   : > { %v5888_v44 = vpop.f32.mrf.mxu0 }
 0x87a   : > { %2652 = vmatpush1.bf16.msra.mxu0 %v5674_v57  ;;  %2693 = vmatpush1.bf16.msra.mxu1 %v5679_v58  ;;  %6589 = vst [vmem:[#allocation20_spill] sm:$0xff] %v5888_v44  ;;  %v2230_v44 = vadd.f32 %v2229_v47, %v5921_v43  ;;  %v6607_v47 = vsub.s32 2, %v6599_v2 }
 0x87b   : > { %2653 = vmatprep.subr.bf16.mxu0 %v5688_v59  ;;  %2694 = vmatprep.subr.bf16.mxu1 %v5693_v60  ;;  %v5892_v11 = vpop.f32.mrf.mxu0 }
 0x87c   : > { %6591 = vst [vmem:[#allocation22_spill] sm:$0xff] %v5892_v11  ;;  %v5913_v11 = vrot.slane %v2011_v3, %v6600_v16 }
 0x87d   : > { %v5896_v4 = vpop.f32.mrf.mxu0 }
 0x87e   : > { %2654 = vmatpush1.bf16.msra.mxu0 %v5698_v29  ;;  %2695 = vmatpush1.bf16.msra.mxu1 %v5703_v39  ;;  %6593 = vst [vmem:[#allocation33_spill] sm:$0xff] %v5896_v4 }
 0x87f   : > { %2655 = vmatprep.subr.bf16.mxu0 %v5712_v61  ;;  %2696 = vmatprep.subr.bf16.mxu1 %v5717_v46 }
 0x882   : > { %2656 = vmatpush1.bf16.msra.mxu0 %v5722_v10  ;;  %2697 = vmatpush1.bf16.msra.mxu1 %v5727_v62 }
 0x883   : > { %2657 = vmatprep.subr.bf16.mxu0 %v5736_v20  ;;  %2698 = vmatprep.subr.bf16.mxu1 %v5741_v1 }
 0x886   : > { %2658 = vmatpush1.bf16.msra.mxu0 %v5746_v27  ;;  %2699 = vmatpush1.bf16.msra.mxu1 %v5751_v63 }
 0x887   : > { %2659 = vmatprep.subr.bf16.mxu0 %v5756_v18  ;;  %2700 = vmatprep.subr.bf16.mxu1 %v5766_v41 }
 0x88a   : > { %2660 = vmatpush1.bf16.msra.mxu0 %v5771_v48  ;;  %2701 = vmatpush1.bf16.msra.mxu1 %v5776_v32 }
 0x88b   : > { %2661 = vmatprep.subr.bf16.mxu0 %v5781_v0  ;;  %2702 = vmatprep.subr.bf16.mxu1 %v5787_v13 }
 0x88e   : > { %2662 = vmatpush1.bf16.msra.mxu0 %v5794_v30  ;;  %2703 = vmatpush1.bf16.msra.mxu1 %v5799_v15 }
 0x88f   : > { %2758 = vmatprep.subr.bf16.mxu0 %v5616_v7  ;;  %2799 = vmatprep.subr.bf16.mxu1 %v5621_v45 }
 0x929   : > { %v5903_v22 = vpop.f32.mrf.mxu0  ;;  %v5905_v33 = vpop.f32.mrf.mxu1 }
 0x92a   : > { %6595 = vst [vmem:[#allocation24_spill] sm:$0xff] %v5903_v22  ;;  %6596 = vst [vmem:[#allocation35_spill] sm:$0xff] %v5905_v33  ;;  %v2228_v33 = vadd.f32 %v2227_v17, %v5913_v11 }
 0x92b   : > { %v5907_v8 = vpop.f32.mrf.mxu0  ;;  %v5909_v19 = vpop.f32.mrf.mxu1 }
 0x92c   : > { %6597 = vst [vmem:[#allocation34_spill] sm:$0xff] %v5907_v8  ;;  %6598 = vst [vmem:[#allocation29_spill] sm:$0xff] %v5909_v19 }
 0x92d   : > { %v5915_v34 = vpop.f32.mrf.mxu0  ;;  %v5917_v4 = vpop.f32.mrf.mxu1 }
 0x92e   : > { %6601 = vst [vmem:[#allocation27_spill] sm:$0xff] %v5915_v34  ;;  %6602 = vst [vmem:[#allocation17_spill] sm:$0xff] %v5917_v4 }
 0x92f   : > { %v5923_v24 = vpop.f32.mrf.mxu0  ;;  %v5925_v22 = vpop.f32.mrf.mxu1 }
 0x930   : > { %6604 = vst [vmem:[#allocation36_spill] sm:$0xff] %v5923_v24  ;;  %6605 = vst [vmem:[#allocation37_spill] sm:$0xff] %v5925_v22  ;;  %v5931_v24 = vrot.slane %v2011_v3, %v6606_v40 }
 0x931   : > { %v2570_v8 = vpop.f32.mrf.mxu0  ;;  %v2611_v19 = vpop.f32.mrf.mxu1 }
 0x932   : > { %v2618_v16 = vadd.f32 %v2570_v8, %v2228_v33  ;;  %v2303_v17 = vadd.f32 %v2302_v49, %v5931_v24  ;;  %v5936_v33 = vrot.slane %v2011_v3, %v6607_v47 }
 0x933   : > { %v2572_v12 = vpop.f32.mrf.mxu0  ;;  %v2613_v42 = vpop.f32.mrf.mxu1 }
 0x934   : > { %v4074_v34 = vmul.f32 -1.442695, %v2618_v16  ;;  %v2619_v21 = vadd.f32 %v2572_v12, %v2230_v44  ;;  %v2621_v8 = vadd.f32 %v2613_v42, %v2303_v17  ;;  %v2301_v12 = vadd.f32 %v2300_v14, %v5936_v33 }
 0x935   : > { %v2574_v4 = vpop.f32.mrf.mxu0  ;;  %v2615_v23 = vpop.f32.mrf.mxu1 }
 0x936   : > { %4497 = vpow2.f32 %v4074_v34  ;;  %v4075_v9 = vmul.f32 -1.442695, %v2619_v21  ;;  %v4076_v23 = vmul.f32 -1.442695, %v2621_v8  ;;  %v2620_v21 = vadd.f32 %v2611_v19, %v2301_v12 }
 0x937   : > { %v2575_v22 = vpop.f32.mrf.mxu0  ;;  %v2616_v35 = vpop.f32.mrf.mxu1  ;;  %v2232_v12 = vadd.f32 %v5860_v31, %v5913_v11  ;;  %v2307_v31 = vadd.f32 %v5866_v52, %v5931_v24 }
 0x938   : > { %4499 = vpow2.f32 %v4075_v9  ;;  %v4041_v22 = vld [vmem:[%s617_s13 + $0x8] sm:$0xff] }
 0x939   : > { %4501 = vpow2.f32 %v4076_v23 }
 0x943   : > { %v4498_v44 = vpop.eup %4497 }
 0x944   : > { %v2625_v34 = vadd.f32 1.0, %v4498_v44 }
 0x945   : > { %v4500_v4 = vpop.eup %4499 }
 0x946   : > { %4503 = vrcp.f32 %v2625_v34  ;;  %v2631_v40 = vadd.f32 1.0, %v4500_v4  ;;  %v4502_v35 = vpop.eup %4501 }
 0x947   : > { %4505 = vtanh.f32 %v2620_v21  ;;  %v2638_v16 = vadd.f32 1.0, %v4502_v35  ;;  %v2234_v21 = vadd.f32 %v5864_v51, %v5921_v43 }
 0x948   : > { %4507 = vrcp.f32 %v2631_v40 }
 0x949   : > { %4509 = vrcp.f32 %v2638_v16 }
 0x953   : > { %v4504_v49 = vpop.eup %4503 }
 0x954   : > { %v4506_v2 = vpop.eup %4505 }
 0x955   : > { %v4508_v3 = vpop.eup %4507  ;;  %v2642_v42 = vmul.f32 %v4506_v2, %v4504_v49 }
 0x956   : > { %v2641_v9 = vmul.f32 %v4508_v3, %v4041_v22  ;;  %v4510_v19 = vpop.eup %4509 }
 0x958   : > { %v5941_v14 = vadd.f32 %v2642_v42, %v2641_v9 }
 0x95a   : > { %4511 = vtanh.f32 %v5941_v14 }
 0x967   : > { %v4512_v17 = vpop.eup %4511 }
 0x968   : > { %v5944_v47 = vmul.f32 %v4512_v17, %v4510_v19  ;;  %v2305_v19 = vadd.f32 %v5862_v50, %v5936_v33 }
 0x96a   : > { %v2646_v8 = vpack.c.bf16 %v5944_v47, %v5944_v47 }
 0x96c   : > { %2680 = vmatmul.mubr.bf16.vlgmr.msra.gmra.mxu0 %v2646_v8  ;;  %2721 = vmatmul.mubr.bf16.vlgmr.msra.gmra.mxu1 %v2646_v8 }
 0x96d   : > { %2759 = vmatpush1.bf16.msra.mxu0 %v5626_v6  ;;  %2800 = vmatpush1.bf16.msra.mxu1 %v5631_v38 }
 0x96e   : > { %2760 = vmatprep.subr.bf16.mxu0 %v5640_v37  ;;  %2801 = vmatprep.subr.bf16.mxu1 %v5645_v28 }
 0x96f   : > { %2790 = vmatprep.mubr.bf16.mxu0 %v6562_v25  ;;  %2831 = vmatprep.mubr.bf16.mxu1 %v6562_v25 }
 0x971   : > { %2761 = vmatpush1.bf16.msra.mxu0 %v5650_v26  ;;  %2802 = vmatpush1.bf16.msra.mxu1 %v5655_v54 }
 0x972   : > { %2762 = vmatprep.subr.bf16.mxu0 %v5664_v55  ;;  %2803 = vmatprep.subr.bf16.mxu1 %v5669_v56 }
 0x975   : > { %2763 = vmatpush1.bf16.msra.mxu0 %v5674_v57  ;;  %2804 = vmatpush1.bf16.msra.mxu1 %v5679_v58 }
 0x976   : > { %2764 = vmatprep.subr.bf16.mxu0 %v5688_v59  ;;  %2805 = vmatprep.subr.bf16.mxu1 %v5693_v60 }
 0x979   : > { %2765 = vmatpush1.bf16.msra.mxu0 %v5698_v29  ;;  %2806 = vmatpush1.bf16.msra.mxu1 %v5703_v39 }
 0x97a   : > { %2766 = vmatprep.subr.bf16.mxu0 %v5712_v61  ;;  %2807 = vmatprep.subr.bf16.mxu1 %v5717_v46 }
 0x97d   : > { %2767 = vmatpush1.bf16.msra.mxu0 %v5722_v10  ;;  %2808 = vmatpush1.bf16.msra.mxu1 %v5727_v62 }
 0x97e   : > { %2768 = vmatprep.subr.bf16.mxu0 %v5736_v20  ;;  %2809 = vmatprep.subr.bf16.mxu1 %v5741_v1 }
 0x981   : > { %2769 = vmatpush1.bf16.msra.mxu0 %v5746_v27  ;;  %2810 = vmatpush1.bf16.msra.mxu1 %v5751_v63 }
 0x982   : > { %2770 = vmatprep.subr.bf16.mxu0 %v5756_v18  ;;  %2811 = vmatprep.subr.bf16.mxu1 %v5766_v41 }
 0x985   : > { %2771 = vmatpush1.bf16.msra.mxu0 %v5771_v48  ;;  %2812 = vmatpush1.bf16.msra.mxu1 %v5776_v32 }
 0x986   : > { %2772 = vmatprep.subr.bf16.mxu0 %v5781_v0  ;;  %2813 = vmatprep.subr.bf16.mxu1 %v5787_v13 }
 0x989   : > { %2773 = vmatpush1.bf16.msra.mxu0 %v5794_v30  ;;  %2814 = vmatpush1.bf16.msra.mxu1 %v5799_v15 }
 0x98a   : > { %2869 = vmatprep.subr.bf16.mxu0 %v5616_v7  ;;  %2910 = vmatprep.subr.bf16.mxu1 %v5621_v45 }
 0xa2c   : > { %v2681_v23 = vpop.f32.mrf.mxu0  ;;  %v2722_v44 = vpop.f32.mrf.mxu1 }
 0xa2d   : > { %v2729_v34 = vadd.f32 %v2681_v23, %v2232_v12  ;;  %v2731_v51 = vadd.f32 %v2722_v44, %v2305_v19 }
 0xa2e   : > { %v2683_v4 = vpop.f32.mrf.mxu0  ;;  %v2724_v40 = vpop.f32.mrf.mxu1 }
 0xa2f   : > { %v4077_v35 = vmul.f32 -1.442695, %v2729_v34  ;;  %v2730_v49 = vadd.f32 %v2683_v4, %v2234_v21  ;;  %v2732_v9 = vadd.f32 %v2724_v40, %v2307_v31 }
 0xa30   : > { %v2685_v22 = vpop.f32.mrf.mxu0  ;;  %v2726_v2 = vpop.f32.mrf.mxu1 }
 0xa31   : > { %4513 = vpow2.f32 %v4077_v35  ;;  %v4078_v3 = vmul.f32 -1.442695, %v2730_v49  ;;  %v4079_v17 = vmul.f32 -1.442695, %v2732_v9  ;;  %v2240_v9 = vadd.f32 %v5872_v5, %v5921_v43 }
 0xa32   : > { %v2686_v16 = vpop.f32.mrf.mxu0  ;;  %v2727_v42 = vpop.f32.mrf.mxu1 }
 0xa33   : > { %4515 = vpow2.f32 %v4078_v3 }
 0xa34   : > { %4517 = vtanh.f32 %v2731_v51 }
 0xa35   : > { %4519 = vpow2.f32 %v4079_v17 }
 0xa3e   : > { %v4514_v8 = vpop.eup %4513 }
 0xa3f   : > { %v2736_v12 = vadd.f32 1.0, %v4514_v8 }
 0xa40   : > { %v4516_v23 = vpop.eup %4515 }
 0xa41   : > { %4521 = vrcp.f32 %v2736_v12  ;;  %v2742_v21 = vadd.f32 1.0, %v4516_v23  ;;  %v4518_v34 = vpop.eup %4517 }
 0xa42   : > { %v4520_v4 = vpop.eup %4519 }
 0xa43   : > { %4523 = vrcp.f32 %v2742_v21  ;;  %v2749_v52 = vadd.f32 1.0, %v4520_v4 }
 0xa45   : > { %4525 = vrcp.f32 %v2749_v52 }
 0xa4e   : > { %v4522_v35 = vpop.eup %4521 }
 0xa4f   : > { %v2753_v49 = vmul.f32 %v4522_v35, %v4518_v34 }
 0xa50   : > { %v4524_v22 = vpop.eup %4523 }
 0xa51   : > { %v2752_v40 = vmul.f32 %v4524_v22, %v5941_v14  ;;  %v2238_v14 = vadd.f32 %v5868_v53, %v5913_v11  ;;  %v2313_v53 = vadd.f32 %v5874_v36, %v5931_v24  ;;  %v6608_v22 = vld [vmem:[#allocation26_spill] sm:$0xff] }
 0xa52   : > { %v4526_v50 = vpop.eup %4525  ;;  %v2311_v52 = vadd.f32 %v6608_v22, %v5936_v33 }
 0xa53   : > { %v5991_v2 = vadd.f32 %v2753_v49, %v2752_v40 }
 0xa55   : > { %4527 = vtanh.f32 %v5991_v2 }
 0xa62   : > { %v4528_v44 = vpop.eup %4527 }
 0xa63   : > { %v5994_v3 = vmul.f32 %v4528_v44, %v4526_v50 }
 0xa65   : > { %v2757_v16 = vpack.c.bf16 %v5994_v3, %v5994_v3 }
 0xa67   : > { %2791 = vmatmul.mubr.bf16.vlgmr.msra.gmra.mxu0 %v2757_v16  ;;  %2832 = vmatmul.mubr.bf16.vlgmr.msra.gmra.mxu1 %v2757_v16 }
 0xa68   : > { %2870 = vmatpush1.bf16.msra.mxu0 %v5626_v6  ;;  %2911 = vmatpush1.bf16.msra.mxu1 %v5631_v38 }
 0xa69   : > { %2871 = vmatprep.subr.bf16.mxu0 %v5640_v37  ;;  %2912 = vmatprep.subr.bf16.mxu1 %v5645_v28 }
 0xa6a   : > { %2901 = vmatprep.mubr.bf16.mxu0 %v6562_v25  ;;  %2942 = vmatprep.mubr.bf16.mxu1 %v6562_v25 }
 0xa6c   : > { %2872 = vmatpush1.bf16.msra.mxu0 %v5650_v26  ;;  %2913 = vmatpush1.bf16.msra.mxu1 %v5655_v54 }
 0xa6d   : > { %2873 = vmatprep.subr.bf16.mxu0 %v5664_v55  ;;  %2914 = vmatprep.subr.bf16.mxu1 %v5669_v56 }
 0xa70   : > { %2874 = vmatpush1.bf16.msra.mxu0 %v5674_v57  ;;  %2915 = vmatpush1.bf16.msra.mxu1 %v5679_v58 }
 0xa71   : > { %2875 = vmatprep.subr.bf16.mxu0 %v5688_v59  ;;  %2916 = vmatprep.subr.bf16.mxu1 %v5693_v60 }
 0xa74   : > { %2876 = vmatpush1.bf16.msra.mxu0 %v5698_v29  ;;  %2917 = vmatpush1.bf16.msra.mxu1 %v5703_v39 }
 0xa75   : > { %2877 = vmatprep.subr.bf16.mxu0 %v5712_v61  ;;  %2918 = vmatprep.subr.bf16.mxu1 %v5717_v46 }
 0xa78   : > { %2878 = vmatpush1.bf16.msra.mxu0 %v5722_v10  ;;  %2919 = vmatpush1.bf16.msra.mxu1 %v5727_v62 }
 0xa79   : > { %2879 = vmatprep.subr.bf16.mxu0 %v5736_v20  ;;  %2920 = vmatprep.subr.bf16.mxu1 %v5741_v1 }
 0xa7c   : > { %2880 = vmatpush1.bf16.msra.mxu0 %v5746_v27  ;;  %2921 = vmatpush1.bf16.msra.mxu1 %v5751_v63 }
 0xa7d   : > { %2881 = vmatprep.subr.bf16.mxu0 %v5756_v18  ;;  %2922 = vmatprep.subr.bf16.mxu1 %v5766_v41 }
 0xa80   : > { %2882 = vmatpush1.bf16.msra.mxu0 %v5771_v48  ;;  %2923 = vmatpush1.bf16.msra.mxu1 %v5776_v32 }
 0xa81   : > { %2883 = vmatprep.subr.bf16.mxu0 %v5781_v0  ;;  %2924 = vmatprep.subr.bf16.mxu1 %v5787_v13 }
 0xa84   : > { %2884 = vmatpush1.bf16.msra.mxu0 %v5794_v30  ;;  %2925 = vmatpush1.bf16.msra.mxu1 %v5799_v15 }
 0xa85   : > { %2980 = vmatprep.subr.bf16.mxu0 %v5616_v7  ;;  %3021 = vmatprep.subr.bf16.mxu1 %v5621_v45 }
 0xb27   : > { %v2792_v42 = vpop.f32.mrf.mxu0  ;;  %v2833_v31 = vpop.f32.mrf.mxu1 }
 0xb28   : > { %v2840_v19 = vadd.f32 %v2792_v42, %v2238_v14  ;;  %v2842_v5 = vadd.f32 %v2833_v31, %v2311_v52 }
 0xb29   : > { %v2794_v51 = vpop.f32.mrf.mxu0  ;;  %v2835_v17 = vpop.f32.mrf.mxu1 }
 0xb2a   : > { %v4080_v8 = vmul.f32 -1.442695, %v2840_v19  ;;  %v2841_v12 = vadd.f32 %v2794_v51, %v2240_v9  ;;  %v2843_v49 = vadd.f32 %v2835_v17, %v2313_v53 }
 0xb2b   : > { %v2796_v23 = vpop.f32.mrf.mxu0  ;;  %v2837_v21 = vpop.f32.mrf.mxu1 }
 0xb2c   : > { %4529 = vpow2.f32 %v4080_v8  ;;  %v4081_v34 = vmul.f32 -1.442695, %v2841_v12  ;;  %v4082_v40 = vmul.f32 -1.442695, %v2843_v49  ;;  %v6610_v49 = vld [vmem:[#allocation18_spill] sm:$0xff] }
 0xb2d   : > { %v2797_v4 = vpop.f32.mrf.mxu0  ;;  %v2838_v35 = vpop.f32.mrf.mxu1  ;;  %v2244_v22 = vadd.f32 %v6610_v49, %v5921_v43 }
 0xb2e   : > { %4531 = vpow2.f32 %v4081_v34 }
 0xb2f   : > { %4533 = vtanh.f32 %v2842_v5 }
 0xb30   : > { %4535 = vpow2.f32 %v4082_v40 }
 0xb39   : > { %v4530_v50 = vpop.eup %4529 }
 0xb3a   : > { %v2847_v44 = vadd.f32 1.0, %v4530_v50 }
 0xb3b   : > { %v4532_v16 = vpop.eup %4531 }
 0xb3c   : > { %4537 = vrcp.f32 %v2847_v44  ;;  %v2853_v14 = vadd.f32 1.0, %v4532_v16  ;;  %v4534_v42 = vpop.eup %4533 }
 0xb3d   : > { %v4536_v9 = vpop.eup %4535 }
 0xb3e   : > { %4539 = vrcp.f32 %v2853_v14  ;;  %v2860_v36 = vadd.f32 1.0, %v4536_v9 }
 0xb40   : > { %4541 = vrcp.f32 %v2860_v36 }
 0xb49   : > { %v4538_v19 = vpop.eup %4537 }
 0xb4a   : > { %v2864_v51 = vmul.f32 %v4538_v19, %v4534_v42 }
 0xb4b   : > { %v4540_v8 = vpop.eup %4539 }
 0xb4c   : > { %v2863_v17 = vmul.f32 %v4540_v8, %v5991_v2  ;;  %v6609_v2 = vld [vmem:[#allocation28_spill] sm:$0xff] }
 0xb4d   : > { %v4542_v31 = vpop.eup %4541  ;;  %v2242_v4 = vadd.f32 %v6609_v2, %v5913_v11 }
 0xb4e   : > { %v6041_v12 = vadd.f32 %v2864_v51, %v2863_v17  ;;  %v6611_v51 = vld [vmem:[#allocation30_spill] sm:$0xff]  ;;  %v6612_v17 = vld [vmem:[#allocation19_spill] sm:$0xff] }
 0xb4f   : > { %v2317_v8 = vadd.f32 %v6611_v51, %v5931_v24 }
 0xb50   : > { %4543 = vtanh.f32 %v6041_v12 }
 0xb5d   : > { %v4544_v23 = vpop.eup %4543 }
 0xb5e   : > { %v6044_v21 = vmul.f32 %v4544_v23, %v4542_v31  ;;  %v2315_v31 = vadd.f32 %v6612_v17, %v5936_v33 }
 0xb60   : > { %v2868_v34 = vpack.c.bf16 %v6044_v21, %v6044_v21 }
 0xb62   : > { %2902 = vmatmul.mubr.bf16.vlgmr.msra.gmra.mxu0 %v2868_v34  ;;  %2943 = vmatmul.mubr.bf16.vlgmr.msra.gmra.mxu1 %v2868_v34 }
 0xb63   : > { %2981 = vmatpush1.bf16.msra.mxu0 %v5626_v6  ;;  %3022 = vmatpush1.bf16.msra.mxu1 %v5631_v38 }
 0xb64   : > { %2982 = vmatprep.subr.bf16.mxu0 %v5640_v37  ;;  %3023 = vmatprep.subr.bf16.mxu1 %v5645_v28 }
 0xb65   : > { %3012 = vmatprep.mubr.bf16.mxu0 %v6562_v25  ;;  %3053 = vmatprep.mubr.bf16.mxu1 %v6562_v25 }
 0xb67   : > { %2983 = vmatpush1.bf16.msra.mxu0 %v5650_v26  ;;  %3024 = vmatpush1.bf16.msra.mxu1 %v5655_v54 }
 0xb68   : > { %2984 = vmatprep.subr.bf16.mxu0 %v5664_v55  ;;  %3025 = vmatprep.subr.bf16.mxu1 %v5669_v56 }
 0xb6b   : > { %2985 = vmatpush1.bf16.msra.mxu0 %v5674_v57  ;;  %3026 = vmatpush1.bf16.msra.mxu1 %v5679_v58 }
 0xb6c   : > { %2986 = vmatprep.subr.bf16.mxu0 %v5688_v59  ;;  %3027 = vmatprep.subr.bf16.mxu1 %v5693_v60 }
 0xb6f   : > { %2987 = vmatpush1.bf16.msra.mxu0 %v5698_v29  ;;  %3028 = vmatpush1.bf16.msra.mxu1 %v5703_v39 }
 0xb70   : > { %2988 = vmatprep.subr.bf16.mxu0 %v5712_v61  ;;  %3029 = vmatprep.subr.bf16.mxu1 %v5717_v46 }
 0xb73   : > { %2989 = vmatpush1.bf16.msra.mxu0 %v5722_v10  ;;  %3030 = vmatpush1.bf16.msra.mxu1 %v5727_v62 }
 0xb74   : > { %2990 = vmatprep.subr.bf16.mxu0 %v5736_v20  ;;  %3031 = vmatprep.subr.bf16.mxu1 %v5741_v1 }
 0xb77   : > { %2991 = vmatpush1.bf16.msra.mxu0 %v5746_v27  ;;  %3032 = vmatpush1.bf16.msra.mxu1 %v5751_v63 }
 0xb78   : > { %2992 = vmatprep.subr.bf16.mxu0 %v5756_v18  ;;  %3033 = vmatprep.subr.bf16.mxu1 %v5766_v41 }
 0xb7b   : > { %2993 = vmatpush1.bf16.msra.mxu0 %v5771_v48  ;;  %3034 = vmatpush1.bf16.msra.mxu1 %v5776_v32 }
 0xb7c   : > { %2994 = vmatprep.subr.bf16.mxu0 %v5781_v0  ;;  %3035 = vmatprep.subr.bf16.mxu1 %v5787_v13 }
 0xb7f   : > { %2995 = vmatpush1.bf16.msra.mxu0 %v5794_v30  ;;  %3036 = vmatpush1.bf16.msra.mxu1 %v5799_v15 }
 0xb80   : > { %3091 = vmatprep.subr.bf16.mxu0 %v5616_v7  ;;  %3132 = vmatprep.subr.bf16.mxu1 %v5621_v45 }
 0xc22   : > { %v2903_v35 = vpop.f32.mrf.mxu0  ;;  %v2944_v53 = vpop.f32.mrf.mxu1 }
 0xc23   : > { %v2951_v52 = vadd.f32 %v2903_v35, %v2242_v4  ;;  %v2953_v23 = vadd.f32 %v2944_v53, %v2315_v31 }
 0xc24   : > { %v2905_v5 = vpop.f32.mrf.mxu0  ;;  %v2946_v40 = vpop.f32.mrf.mxu1 }
 0xc25   : > { %v4083_v50 = vmul.f32 -1.442695, %v2951_v52  ;;  %v2952_v44 = vadd.f32 %v2905_v5, %v2244_v22  ;;  %v2954_v36 = vadd.f32 %v2946_v40, %v2317_v8 }
 0xc26   : > { %v2907_v16 = vpop.f32.mrf.mxu0  ;;  %v2948_v14 = vpop.f32.mrf.mxu1 }
 0xc27   : > { %4545 = vpow2.f32 %v4083_v50  ;;  %v4084_v42 = vmul.f32 -1.442695, %v2952_v44  ;;  %v4085_v34 = vmul.f32 -1.442695, %v2954_v36 }
 0xc28   : > { %v2908_v9 = vpop.f32.mrf.mxu0  ;;  %v2949_v19 = vpop.f32.mrf.mxu1 }
 0xc29   : > { %4547 = vpow2.f32 %v4084_v42 }
 0xc2a   : > { %4549 = vtanh.f32 %v2953_v23 }
 0xc2b   : > { %4551 = vpow2.f32 %v4085_v34  ;;  %v6151_v34 = vld [vmem:[%s6509_s5 + $0xe0] ss:$16 sps:$4 sm:$0xff]  }
 0xc34   : > { %v4546_v2 = vpop.eup %4545 }
 0xc35   : > { %v2958_v4 = vadd.f32 1.0, %v4546_v2  ;;  %v6157_v2 = vld [vmem:[%s6509_s5 + $0xe8] ss:$16 sps:$4 sm:$0xff]  }
 0xc36   : > { %v4548_v35 = vpop.eup %4547 }
 0xc37   : > { %4553 = vrcp.f32 %v2958_v4  ;;  %v2964_v49 = vadd.f32 1.0, %v4548_v35  ;;  %v4550_v22 = vpop.eup %4549  ;;  %v6163_v4 = vld [vmem:[%s6509_s5 + $0xc4] ss:$16 sps:$4 sm:$0xff]   ;;  %v6169_v35 = vld [vmem:[%s6509_s5 + $0xcc] ss:$16 sps:$4 sm:$0xff]  }
 0xc38   : > { %v4552_v52 = vpop.eup %4551 }
 0xc39   : > { %4555 = vrcp.f32 %v2964_v49  ;;  %v2971_v16 = vadd.f32 1.0, %v4552_v52  ;;  %v6177_v49 = vld [vmem:[%s6509_s5 + $0xc0] ss:$16 sps:$4 sm:$0xff]   ;;  %v6189_v52 = vld [vmem:[%s6509_s5 + $0xa4] ss:$16 sps:$4 sm:$0xff]  }
 0xc3b   : > { %4557 = vrcp.f32 %v2971_v16  ;;  %v6213_v16 = vld [vmem:[%s6509_s5 + $0x84] ss:$16 sps:$4 sm:$0xff]  }
 0xc44   : > { %v4554_v5 = vpop.eup %4553 }
 0xc45   : > { %v2975_v50 = vmul.f32 %v4554_v5, %v4550_v22  ;;  %v6183_v22 = vld [vmem:[%s6509_s5 + $0xc8] ss:$16 sps:$4 sm:$0xff]   ;;  %v6195_v5 = vld [vmem:[%s6509_s5 + $0xac] ss:$16 sps:$4 sm:$0xff]  }
 0xc46   : > { %v4556_v44 = vpop.eup %4555 }
 0xc47   : > { %v2974_v40 = vmul.f32 %v4556_v44, %v6041_v12  ;;  %v6207_v44 = vld [vmem:[%s6509_s5 + $0xa8] ss:$16 sps:$4 sm:$0xff]  }
 0xc48   : > { %v4558_v53 = vpop.eup %4557 }
 0xc49   : > { %v6091_v14 = vadd.f32 %v2975_v50, %v2974_v40  ;;  %v6201_v50 = vld [vmem:[%s6509_s5 + $0xa0] ss:$16 sps:$4 sm:$0xff]   ;;  %v6219_v40 = vld [vmem:[%s6509_s5 + $0x8c] ss:$16 sps:$4 sm:$0xff]  }
 0xc4b   : > { %4559 = vtanh.f32 %v6091_v14 }
 0xc58   : > { %v4560_v42 = vpop.eup %4559 }
 0xc59   : > { %v6094_v9 = vmul.f32 %v4560_v42, %v4558_v53  ;;  %v6231_v53 = vld [vmem:[%s6509_s5 + $0x88] ss:$16 sps:$4 sm:$0xff]   ;;  %v6237_v42 = vld [vmem:[%s6509_s5 + $0x64] ss:$16 sps:$4 sm:$0xff]  }
 0xc5b   : > { %v2979_v19 = vpack.c.bf16 %v6094_v9, %v6094_v9 }
 0xc5d   : > { %3013 = vmatmul.mubr.bf16.vlgmr.msra.gmra.mxu0 %v2979_v19  ;;  %3054 = vmatmul.mubr.bf16.vlgmr.msra.gmra.mxu1 %v2979_v19  ;;  %v6243_v19 = vld [vmem:[%s6509_s5 + $0x6c] ss:$16 sps:$4 sm:$0xff]  }
 0xc5e   : > { %3092 = vmatpush1.bf16.msra.mxu0 %v5626_v6  ;;  %3133 = vmatpush1.bf16.msra.mxu1 %v5631_v38  ;;  %v6613_v6 = vld [vmem:[#allocation31_spill] sm:$0xff] }
 0xc5f   : > { %3093 = vmatprep.subr.bf16.mxu0 %v5640_v37  ;;  %3134 = vmatprep.subr.bf16.mxu1 %v5645_v28  ;;  %v2248_v38 = vadd.f32 %v6613_v6, %v5913_v11  ;;  %v6249_v6 = vld [vmem:[%s6509_s5 + $0x60] ss:$16 sps:$4 sm:$0xff]  }
 0xc60   : > { %3123 = vmatprep.mubr.bf16.mxu0 %v6562_v25  ;;  %3164 = vmatprep.mubr.bf16.mxu1 %v6562_v25 }
 0xc62   : > { %3094 = vmatpush1.bf16.msra.mxu0 %v5650_v26  ;;  %3135 = vmatpush1.bf16.msra.mxu1 %v5655_v54  ;;  %v6614_v26 = vld [vmem:[#allocation20_spill] sm:$0xff] }
 0xc63   : > { %3095 = vmatprep.subr.bf16.mxu0 %v5664_v55  ;;  %3136 = vmatprep.subr.bf16.mxu1 %v5669_v56  ;;  %v2250_v54 = vadd.f32 %v6614_v26, %v5921_v43  ;;  %v6273_v26 = vld [vmem:[%s6509_s5 + $0x40] ss:$16 sps:$4 sm:$0xff]  }
 0xc66   : > { %3096 = vmatpush1.bf16.msra.mxu0 %v5674_v57  ;;  %3137 = vmatpush1.bf16.msra.mxu1 %v5679_v58 }
 0xc67   : > { %3097 = vmatprep.subr.bf16.mxu0 %v5688_v59  ;;  %3138 = vmatprep.subr.bf16.mxu1 %v5693_v60 }
 0xc6a   : > { %3098 = vmatpush1.bf16.msra.mxu0 %v5698_v29  ;;  %3139 = vmatpush1.bf16.msra.mxu1 %v5703_v39 }
 0xc6b   : > { %3099 = vmatprep.subr.bf16.mxu0 %v5712_v61  ;;  %3140 = vmatprep.subr.bf16.mxu1 %v5717_v46 }
 0xc6e   : > { %3100 = vmatpush1.bf16.msra.mxu0 %v5722_v10  ;;  %3141 = vmatpush1.bf16.msra.mxu1 %v5727_v62  ;;  %v6616_v62 = vld [vmem:[#allocation21_spill] sm:$0xff] }
 0xc6f   : > { %3101 = vmatprep.subr.bf16.mxu0 %v5736_v20  ;;  %3142 = vmatprep.subr.bf16.mxu1 %v5741_v1  ;;  %v2321_v20 = vadd.f32 %v6616_v62, %v5936_v33 }
 0xc72   : > { %3102 = vmatpush1.bf16.msra.mxu0 %v5746_v27  ;;  %3143 = vmatpush1.bf16.msra.mxu1 %v5751_v63 }
 0xc73   : > { %3103 = vmatprep.subr.bf16.mxu0 %v5756_v18  ;;  %3144 = vmatprep.subr.bf16.mxu1 %v5766_v41 }
 0xc76   : > { %3104 = vmatpush1.bf16.msra.mxu0 %v5771_v48  ;;  %3145 = vmatpush1.bf16.msra.mxu1 %v5776_v32 }
 0xc77   : > { %3105 = vmatprep.subr.bf16.mxu0 %v5781_v0  ;;  %3146 = vmatprep.subr.bf16.mxu1 %v5787_v13 }
 0xc7a   : > { %3106 = vmatpush1.bf16.msra.mxu0 %v5794_v30  ;;  %3147 = vmatpush1.bf16.msra.mxu1 %v5799_v15 }
 0xc7b   : > { %3202 = vmatprep.subr.bf16.mxu0 %v5616_v7  ;;  %3243 = vmatprep.subr.bf16.mxu1 %v5621_v45  ;;  %v6615_v45 = vld [vmem:[#allocation23_spill] sm:$0xff] }
 0xc7c   : > { %v2323_v46 = vadd.f32 %v6615_v45, %v5931_v24  ;;  %v6617_v45 = vld [vmem:[#allocation22_spill] sm:$0xff] }
 0xd1d   : > { %v3014_v37 = vpop.f32.mrf.mxu0  ;;  %v3055_v28 = vpop.f32.mrf.mxu1 }
 0xd1e   : > { %v3062_v55 = vadd.f32 %v3014_v37, %v2248_v38  ;;  %v3064_v1 = vadd.f32 %v3055_v28, %v2321_v20  ;;  %v6255_v38 = vld [vmem:[%s6509_s5 + $0x68] ss:$16 sps:$4 sm:$0xff]   ;;  %v6261_v37 = vld [vmem:[%s6509_s5 + $0x44] ss:$16 sps:$4 sm:$0xff]   ;;  %v6267_v28 = vld [vmem:[%s6509_s5 + $0x4c] ss:$16 sps:$4 sm:$0xff]  }
 0xd1f   : > { %v3016_v56 = vpop.f32.mrf.mxu0  ;;  %v3057_v57 = vpop.f32.mrf.mxu1  ;;  %v6618_v20 = vld [vmem:[#allocation33_spill] sm:$0xff] }
 0xd20   : > { %v4086_v58 = vmul.f32 -1.442695, %v3062_v55  ;;  %v3063_v59 = vadd.f32 %v3016_v56, %v2250_v54  ;;  %v3065_v10 = vadd.f32 %v3057_v57, %v2323_v46  ;;  %v6279_v54 = vld [vmem:[%s6509_s5 + $0x48] ss:$16 sps:$4 sm:$0xff]   ;;  %v6285_v55 = vld [vmem:[%s6509_s5 + $0x24] ss:$16 sps:$4 sm:$0xff]   ;;  %v2252_v46 = vadd.f32 %v6617_v45, %v5913_v11 }
 0xd21   : > { %v3018_v60 = vpop.f32.mrf.mxu0  ;;  %v3059_v29 = vpop.f32.mrf.mxu1  ;;  %v6291_v56 = vld [vmem:[%s6509_s5 + $0x2c] ss:$16 sps:$4 sm:$0xff]   ;;  %v6297_v57 = vld [vmem:[%s6509_s5 + $0x20] ss:$16 sps:$4 sm:$0xff]  }
 0xd22   : > { %4561 = vpow2.f32 %v4086_v58  ;;  %v4087_v39 = vmul.f32 -1.442695, %v3063_v59  ;;  %v4088_v27 = vmul.f32 -1.442695, %v3065_v10  ;;  %v6303_v58 = vld [vmem:[%s6509_s5 + $0x28] ss:$16 sps:$4 sm:$0xff]  }
 0xd23   : > { %v3019_v7 = vpop.f32.mrf.mxu0  ;;  %v3060_v61 = vpop.f32.mrf.mxu1  ;;  %v6309_v59 = vld [vmem:[%s6509_s5 + $0x4] ss:$16 sps:$4 sm:$0xff]   ;;  %v6315_v60 = vld [vmem:[%s6509_s5 + $0xc] ss:$16 sps:$4 sm:$0xff]   ;;  %v6321_v29 = vld [vmem:[%s6509_s5] ss:$16 sps:$4 sm:$0xff]  }
 0xd24   : > { %4563 = vpow2.f32 %v4087_v39  ;;  %v6327_v39 = vld [vmem:[%s6509_s5 + $0x8] ss:$16 sps:$4 sm:$0xff]   ;;  %v4687_v7 = vld [vmem:[%s6509_s5 + $0xe4] ss:$16 sps:$4 sm:$0xff]   ;;  %v4688_v61 = vld [vmem:[%s6509_s5 + $0xec] ss:$16 sps:$4 sm:$0xff]  }
 0xd25   : > { %4565 = vtanh.f32 %v3064_v1  ;;  %v2254_v1 = vadd.f32 %v6618_v20, %v5921_v43 }
 0xd26   : > { %4567 = vpow2.f32 %v4088_v27 }
 0xd2f   : > { %v4562_v63 = vpop.eup %4561 }
 0xd30   : > { %v3069_v18 = vadd.f32 1.0, %v4562_v63 }
 0xd31   : > { %v4564_v41 = vpop.eup %4563 }
 0xd32   : > { %4569 = vrcp.f32 %v3069_v18  ;;  %v3075_v48 = vadd.f32 1.0, %v4564_v41  ;;  %v4566_v32 = vpop.eup %4565 }
 0xd33   : > { %v4568_v0 = vpop.eup %4567 }
 0xd34   : > { %4571 = vrcp.f32 %v3075_v48  ;;  %v3082_v12 = vadd.f32 1.0, %v4568_v0 }
 0xd36   : > { %4573 = vrcp.f32 %v3082_v12  ;;  %v6619_v12 = vld [vmem:[#allocation25_spill] sm:$0xff] }
 0xd3f   : > { %v4570_v13 = vpop.eup %4569 }
 0xd40   : > { %v3086_v30 = vmul.f32 %v4570_v13, %v4566_v32 }
 0xd41   : > { %v4572_v15 = vpop.eup %4571 }
 0xd42   : > { %v3085_v51 = vmul.f32 %v4572_v15, %v6091_v14  ;;  %v6225_v14 = vld [vmem:[%s6509_s5 + $0x80] ss:$16 sps:$4 sm:$0xff]  }
 0xd43   : > { %v4574_v36 = vpop.eup %4573 }
 0xd44   : > { %v6141_v8 = vadd.f32 %v3086_v30, %v3085_v51  ;;  %v2327_v51 = vadd.f32 %v6619_v12, %v5931_v24 }
 0xd46   : > { %4575 = vtanh.f32 %v6141_v8 }
 0xd53   : > { %v4576_v17 = vpop.eup %4575 }
 0xd54   : > { %v6144_v31 = vmul.f32 %v4576_v17, %v4574_v36  ;;  %v6620_v17 = vld [vmem:[#allocation32_spill] sm:$0xff] }
 0xd56   : > { %v3090_v23 = vpack.c.bf16 %v6144_v31, %v6144_v31 }
 0xd58   : > { %3124 = vmatmul.mubr.bf16.vlgmr.msra.gmra.mxu0 %v3090_v23  ;;  %3165 = vmatmul.mubr.bf16.vlgmr.msra.gmra.mxu1 %v3090_v23  ;;  %v2325_v23 = vadd.f32 %v6620_v17, %v5936_v33 }
 0xd59   : > { %3203 = vmatpush1.bf16.msra.mxu0 %v6151_v34  ;;  %3244 = vmatpush1.bf16.msra.mxu1 %v6157_v2 }
 0xd5a   : > { %3204 = vmatprep.subr.bf16.mxu0 %v6163_v4  ;;  %3245 = vmatprep.subr.bf16.mxu1 %v6169_v35 }
 0xd5b   : > { %3234 = vmatprep.mubr.bf16.mxu0 %v6562_v25  ;;  %3275 = vmatprep.mubr.bf16.mxu1 %v6562_v25 }
 0xd5d   : > { %3205 = vmatpush1.bf16.msra.mxu0 %v6177_v49  ;;  %3246 = vmatpush1.bf16.msra.mxu1 %v6183_v22 }
 0xd5e   : > { %3206 = vmatprep.subr.bf16.mxu0 %v6189_v52  ;;  %3247 = vmatprep.subr.bf16.mxu1 %v6195_v5 }
 0xd61   : > { %3207 = vmatpush1.bf16.msra.mxu0 %v6201_v50  ;;  %3248 = vmatpush1.bf16.msra.mxu1 %v6207_v44 }
 0xd62   : > { %3208 = vmatprep.subr.bf16.mxu0 %v6213_v16  ;;  %3249 = vmatprep.subr.bf16.mxu1 %v6219_v40 }
 0xd65   : > { %3209 = vmatpush1.bf16.msra.mxu0 %v6225_v14  ;;  %3250 = vmatpush1.bf16.msra.mxu1 %v6231_v53 }
 0xd66   : > { %3210 = vmatprep.subr.bf16.mxu0 %v6237_v42  ;;  %3251 = vmatprep.subr.bf16.mxu1 %v6243_v19 }
 0xd69   : > { %3211 = vmatpush1.bf16.msra.mxu0 %v6249_v6  ;;  %3252 = vmatpush1.bf16.msra.mxu1 %v6255_v38 }
 0xd6a   : > { %3212 = vmatprep.subr.bf16.mxu0 %v6261_v37  ;;  %3253 = vmatprep.subr.bf16.mxu1 %v6267_v28 }
 0xd6d   : > { %3213 = vmatpush1.bf16.msra.mxu0 %v6273_v26  ;;  %3254 = vmatpush1.bf16.msra.mxu1 %v6279_v54 }
 0xd6e   : > { %3214 = vmatprep.subr.bf16.mxu0 %v6285_v55  ;;  %3255 = vmatprep.subr.bf16.mxu1 %v6291_v56 }
 0xd71   : > { %3215 = vmatpush1.bf16.msra.mxu0 %v6297_v57  ;;  %3256 = vmatpush1.bf16.msra.mxu1 %v6303_v58 }
 0xd72   : > { %3216 = vmatprep.subr.bf16.mxu0 %v6309_v59  ;;  %3257 = vmatprep.subr.bf16.mxu1 %v6315_v60 }
 0xd75   : > { %3217 = vmatpush1.bf16.msra.mxu0 %v6321_v29  ;;  %3258 = vmatpush1.bf16.msra.mxu1 %v6327_v39 }
 0xd76   : > { %3313 = vmatprep.subr.bf16.mxu0 %v4687_v7  ;;  %3354 = vmatprep.subr.bf16.mxu1 %v4688_v61 }
 0xe18   : > { %v3125_v10 = vpop.f32.mrf.mxu0  ;;  %v3166_v62 = vpop.f32.mrf.mxu1 }
 0xe19   : > { %v3173_v27 = vadd.f32 %v3125_v10, %v2252_v46  ;;  %v3175_v7 = vadd.f32 %v3166_v62, %v2325_v23 }
 0xe1a   : > { %v3127_v63 = vpop.f32.mrf.mxu0  ;;  %v3168_v18 = vpop.f32.mrf.mxu1 }
 0xe1b   : > { %v4089_v41 = vmul.f32 -1.442695, %v3173_v27  ;;  %v3174_v48 = vadd.f32 %v3127_v63, %v2254_v1  ;;  %v3176_v36 = vadd.f32 %v3168_v18, %v2327_v51 }
 0xe1c   : > { %v3129_v32 = vpop.f32.mrf.mxu0  ;;  %v3170_v0 = vpop.f32.mrf.mxu1 }
 0xe1d   : > { %4577 = vpow2.f32 %v4089_v41  ;;  %v4090_v13 = vmul.f32 -1.442695, %v3174_v48  ;;  %v4091_v61 = vmul.f32 -1.442695, %v3176_v36 }
 0xe1e   : > { %v3130_v30 = vpop.f32.mrf.mxu0  ;;  %v3171_v15 = vpop.f32.mrf.mxu1 }
 0xe1f   : > { %4579 = vpow2.f32 %v4090_v13 }
 0xe20   : > { %4581 = vtanh.f32 %v3175_v7 }
 0xe21   : > { %4583 = vpow2.f32 %v4091_v61 }
 0xe2a   : > { %v4578_v45 = vpop.eup %4577 }
 0xe2b   : > { %v3180_v46 = vadd.f32 1.0, %v4578_v45 }
 0xe2c   : > { %v4580_v10 = vpop.eup %4579 }
 0xe2d   : > { %4585 = vrcp.f32 %v3180_v46  ;;  %v3186_v20 = vadd.f32 1.0, %v4580_v10  ;;  %v4582_v1 = vpop.eup %4581  ;;  %v4362_v46 = vld [vmem:[%s6513_s9 + $0x30] sm:$0xff]   ;;  %v3427_v10 = vpack.c.bf16 %v5994_v3, %v5944_v47  ;;  %v4365_v47 = vld [vmem:[%s6513_s9 + $0x18] sm:$0xff]  }
 0xe2e   : > { %v4584_v27 = vpop.eup %4583  ;;  %v4366_v3 = vld [vmem:[%s6513_s9 + $0x10] sm:$0xff]  }
 0xe2f   : > { %4587 = vrcp.f32 %v3186_v20  ;;  %v3193_v32 = vadd.f32 1.0, %v4584_v27  ;;  %v4363_v20 = vld [vmem:[%s6513_s9 + $0x28] sm:$0xff]  }
 0xe30   : > { %v4367_v27 = vld [vmem:[%s6513_s9 + $0x8] sm:$0xff]  }
 0xe31   : > { %4589 = vrcp.f32 %v3193_v32  ;;  %v6625_v32 = vld [vmem:[#allocation27_spill] sm:$0xff] }
 0xe3a   : > { %v4586_v63 = vpop.eup %4585 }
 0xe3b   : > { %v3197_v41 = vmul.f32 %v4586_v63, %v4582_v1  ;;  %v4364_v1 = vld [vmem:[%s6513_s9 + $0x20] sm:$0xff]  }
 0xe3c   : > { %v4588_v48 = vpop.eup %4587  ;;  %v4368_v63 = vld [vmem:[%s6513_s9] sm:$0xff]  }
 0xe3d   : > { %v3196_v18 = vmul.f32 %v4588_v48, %v6141_v8  ;;  %v6621_v8 = vld [vmem:[#allocation24_spill] sm:$0xff] }
 0xe3e   : > { %v4590_v62 = vpop.eup %4589 }
 0xe3f   : > { %v6345_v0 = vadd.f32 %v3197_v41, %v3196_v18  ;;  %v3428_v41 = vpack.c.bf16 %v6094_v9, %v6044_v21  ;;  %v2262_v18 = vadd.f32 %v6625_v32, %v5913_v11 }
 0xe41   : > { %4591 = vtanh.f32 %v6345_v0 }
 0xe4e   : > { %v4592_v13 = vpop.eup %4591 }
 0xe4f   : > { %v6348_v30 = vmul.f32 %v4592_v13, %v4590_v62  ;;  %v6626_v13 = vld [vmem:[#allocation36_spill] sm:$0xff] }
 0xe51   : > { %v3201_v15 = vpack.c.bf16 %v6348_v30, %v6348_v30  ;;  %v3429_v48 = vpack.c.bf16 %v6348_v30, %v6144_v31 }
 0xe53   : > { %3235 = vmatmul.mubr.bf16.vlgmr.msra.gmra.mxu0 %v3201_v15  ;;  %3276 = vmatmul.mubr.bf16.vlgmr.msra.gmra.mxu1 %v3201_v15  ;;  %v2264_v15 = vadd.f32 %v6626_v13, %v5921_v43 }
 0xe54   : > { %3314 = vmatpush1.bf16.msra.mxu0 %v6151_v34  ;;  %3355 = vmatpush1.bf16.msra.mxu1 %v6157_v2  ;;  %v2258_v34 = vadd.f32 %v6621_v8, %v5913_v11 }
 0xe55   : > { %3315 = vmatprep.subr.bf16.mxu0 %v6163_v4  ;;  %3356 = vmatprep.subr.bf16.mxu1 %v6169_v35  ;;  %v6622_v35 = vld [vmem:[#allocation34_spill] sm:$0xff] }
 0xe56   : > { %3345 = vmatprep.mubr.bf16.mxu0 %v6562_v25  ;;  %3386 = vmatprep.mubr.bf16.mxu1 %v6562_v25  ;;  %v4361_v25 = vld [vmem:[%s6513_s9 + $0x38] sm:$0xff]  }
 0xe58   : > { %3316 = vmatpush1.bf16.msra.mxu0 %v6177_v49  ;;  %3357 = vmatpush1.bf16.msra.mxu1 %v6183_v22  ;;  %v2260_v49 = vadd.f32 %v6622_v35, %v5921_v43 }
 0xe59   : > { %3317 = vmatprep.subr.bf16.mxu0 %v6189_v52  ;;  %3358 = vmatprep.subr.bf16.mxu1 %v6195_v5 }
 0xe5c   : > { %3318 = vmatpush1.bf16.msra.mxu0 %v6201_v50  ;;  %3359 = vmatpush1.bf16.msra.mxu1 %v6207_v44 }
 0xe5d   : > { %3319 = vmatprep.subr.bf16.mxu0 %v6213_v16  ;;  %3360 = vmatprep.subr.bf16.mxu1 %v6219_v40 }
 0xe60   : > { %3320 = vmatpush1.bf16.msra.mxu0 %v6225_v14  ;;  %3361 = vmatpush1.bf16.msra.mxu1 %v6231_v53 }
 0xe61   : > { %3321 = vmatprep.subr.bf16.mxu0 %v6237_v42  ;;  %3362 = vmatprep.subr.bf16.mxu1 %v6243_v19  ;;  %v6623_v19 = vld [vmem:[#allocation29_spill] sm:$0xff] }
 0xe64   : > { %3322 = vmatpush1.bf16.msra.mxu0 %v6249_v6  ;;  %3363 = vmatpush1.bf16.msra.mxu1 %v6255_v38  ;;  %v2333_v6 = vadd.f32 %v6623_v19, %v5931_v24 }
 0xe65   : > { %3323 = vmatprep.subr.bf16.mxu0 %v6261_v37  ;;  %3364 = vmatprep.subr.bf16.mxu1 %v6267_v28  ;;  %v6624_v37 = vld [vmem:[#allocation35_spill] sm:$0xff] }
 0xe66   : > { %v2331_v28 = vadd.f32 %v6624_v37, %v5936_v33 }
 0xe68   : > { %3324 = vmatpush1.bf16.msra.mxu0 %v6273_v26  ;;  %3365 = vmatpush1.bf16.msra.mxu1 %v6279_v54 }
 0xe69   : > { %3325 = vmatprep.subr.bf16.mxu0 %v6285_v55  ;;  %3366 = vmatprep.subr.bf16.mxu1 %v6291_v56 }
 0xe6c   : > { %3326 = vmatpush1.bf16.msra.mxu0 %v6297_v57  ;;  %3367 = vmatpush1.bf16.msra.mxu1 %v6303_v58 }
 0xe6d   : > { %3327 = vmatprep.subr.bf16.mxu0 %v6309_v59  ;;  %3368 = vmatprep.subr.bf16.mxu1 %v6315_v60 }
 0xe70   : > { %3328 = vmatpush1.bf16.msra.mxu0 %v6321_v29  ;;  %3369 = vmatpush1.bf16.msra.mxu1 %v6327_v39 }
 0xe71   : > { %4129 = vmatprep.subr.bf16.mxu0 %v4361_v25 }
 0xf13   : > { %v3236_v2 = vpop.f32.mrf.mxu0  ;;  %v3277_v4 = vpop.f32.mrf.mxu1 }
 0xf14   : > { %v3284_v22 = vadd.f32 %v3236_v2, %v2258_v34  ;;  %v3286_v26 = vadd.f32 %v3277_v4, %v2331_v28 }
 0xf15   : > { %v3238_v52 = vpop.f32.mrf.mxu0  ;;  %v3279_v5 = vpop.f32.mrf.mxu1 }
 0xf16   : > { %v4092_v50 = vmul.f32 -1.442695, %v3284_v22  ;;  %v3285_v44 = vadd.f32 %v3238_v52, %v2260_v49  ;;  %v3287_v38 = vadd.f32 %v3279_v5, %v2333_v6  ;;  %v6627_v49 = vld [vmem:[#allocation37_spill] sm:$0xff] }
 0xf17   : > { %v3240_v16 = vpop.f32.mrf.mxu0  ;;  %v3281_v40 = vpop.f32.mrf.mxu1  ;;  %v2337_v11 = vadd.f32 %v6627_v49, %v5931_v24  ;;  %v6628_v52 = vld [vmem:[#allocation17_spill] sm:$0xff] }
 0xf18   : > { %4593 = vpow2.f32 %v4092_v50  ;;  %v4093_v14 = vmul.f32 -1.442695, %v3285_v44  ;;  %v4094_v54 = vmul.f32 -1.442695, %v3287_v38  ;;  %v2335_v5 = vadd.f32 %v6628_v52, %v5936_v33 }
 0xf19   : > { %v3241_v53 = vpop.f32.mrf.mxu0  ;;  %v3282_v42 = vpop.f32.mrf.mxu1 }
 0xf1a   : > { %4595 = vpow2.f32 %v4093_v14  ;;  %v4100_v53 = vld [vmem:[%s6514_s10] ss:$0 sm:$0xff] }
 0xf1b   : > { %4597 = vtanh.f32 %v3286_v26 }
 0xf1c   : > { %4599 = vpow2.f32 %v4094_v54 }
 0xf25   : > { %v4594_v55 = vpop.eup %4593 }
 0xf26   : > { %v3291_v56 = vadd.f32 1.0, %v4594_v55 }
 0xf27   : > { %v4596_v57 = vpop.eup %4595 }
 0xf28   : > { %4601 = vrcp.f32 %v3291_v56  ;;  %v3297_v58 = vadd.f32 1.0, %v4596_v57  ;;  %v4598_v59 = vpop.eup %4597 }
 0xf29   : > { %v4600_v60 = vpop.eup %4599 }
 0xf2a   : > { %4603 = vrcp.f32 %v3297_v58  ;;  %v3304_v51 = vadd.f32 1.0, %v4600_v60 }
 0xf2c   : > { %4605 = vrcp.f32 %v3304_v51 }
 0xf35   : > { %v4602_v29 = vpop.eup %4601 }
 0xf36   : > { %v3308_v39 = vmul.f32 %v4602_v29, %v4598_v59 }
 0xf37   : > { %v4604_v12 = vpop.eup %4603 }
 0xf38   : > { %v3307_v36 = vmul.f32 %v4604_v12, %v6345_v0 }
 0xf39   : > { %v4606_v23 = vpop.eup %4605 }
 0xf3a   : > { %v6396_v17 = vadd.f32 %v3308_v39, %v3307_v36 }
 0xf3c   : > { %4607 = vtanh.f32 %v6396_v17 }
 0xf49   : > { %v4608_v7 = vpop.eup %4607 }
 0xf4a   : > { %v6399_v61 = vmul.f32 %v4608_v7, %v4606_v23 }
 0xf4c   : > { %v3312_v45 = vpack.c.bf16 %v6399_v61, %v6399_v61 }
 0xf4e   : > { %3346 = vmatmul.mubr.bf16.vlgmr.msra.gmra.mxu0 %v3312_v45  ;;  %3387 = vmatmul.mubr.bf16.vlgmr.msra.gmra.mxu1 %v3312_v45 }
 0xf4f   : > { %4130 = vmatpush3.bf16.msra.mxu0 %v4361_v25  ;;  %4145 = vmatprep.mubr.bf16.mxu0 %v3427_v10 }
 0xf50   : > { %4131 = vmatprep.subr.bf16.mxu0 %v4362_v46 }
 0xf53   : > { %4132 = vmatpush3.bf16.msra.mxu0 %v4362_v46 }
 0xf54   : > { %4133 = vmatprep.subr.bf16.mxu0 %v4363_v20 }
 0xf57   : > { %4134 = vmatpush3.bf16.msra.mxu0 %v4363_v20 }
 0xf58   : > { %4135 = vmatprep.subr.bf16.mxu0 %v4364_v1 }
 0xf5b   : > { %4136 = vmatpush3.bf16.msra.mxu0 %v4364_v1 }
 0xf5c   : > { %4137 = vmatprep.subr.bf16.mxu0 %v4365_v47 }
 0xf5f   : > { %4138 = vmatpush3.bf16.msra.mxu0 %v4365_v47 }
 0xf60   : > { %4139 = vmatprep.subr.bf16.mxu0 %v4366_v3 }
 0xf63   : > { %4140 = vmatpush3.bf16.msra.mxu0 %v4366_v3 }
 0xf64   : > { %4141 = vmatprep.subr.bf16.mxu0 %v4367_v27 }
 0xf67   : > { %4142 = vmatpush3.bf16.msra.mxu0 %v4367_v27 }
 0xf68   : > { %4143 = vmatprep.subr.bf16.mxu0 %v4368_v63 }
 0xf6b   : > { %4144 = vmatpush3.bf16.msra.mxu0 %v4368_v63 }
 0xf6e   : > { %4146 = vmatmul.mubr.bf16.vlgmr.msra.gmra.mxu0 %v3428_v41 }
 0xf6f   : > { %4149 = vmatprep.mubr.bf16.mxu0 %v3429_v48 }
0x100e   : > { %v3347_v0 = vpop.f32.mrf.mxu0  ;;  %v3388_v62 = vpop.f32.mrf.mxu1 }
0x100f   : > { %v3395_v25 = vadd.f32 %v3347_v0, %v2262_v18  ;;  %v3397_v43 = vadd.f32 %v3388_v62, %v2335_v5 }
0x1010   : > { %v3349_v8 = vpop.f32.mrf.mxu0  ;;  %v3390_v34 = vpop.f32.mrf.mxu1 }
0x1011   : > { %v4095_v2 = vmul.f32 -1.442695, %v3395_v25  ;;  %v3396_v4 = vadd.f32 %v3349_v8, %v2264_v15  ;;  %v3398_v22 = vadd.f32 %v3390_v34, %v2337_v11 }
0x1012   : > { %v3351_v35 = vpop.f32.mrf.mxu0  ;;  %v3392_v21 = vpop.f32.mrf.mxu1 }
0x1013   : > { %4609 = vpow2.f32 %v4095_v2  ;;  %v4096_v9 = vmul.f32 -1.442695, %v3396_v4  ;;  %v4097_v50 = vmul.f32 -1.442695, %v3398_v22 }
0x1014   : > { %v3352_v31 = vpop.f32.mrf.mxu0  ;;  %v3393_v30 = vpop.f32.mrf.mxu1 }
0x1015   : > { %4611 = vpow2.f32 %v4096_v9 }
0x1016   : > { %4613 = vtanh.f32 %v3397_v43 }
0x1017   : > { %4615 = vpow2.f32 %v4097_v50 }
0x1020   : > { %v4610_v44 = vpop.eup %4609 }
0x1021   : > { %v3402_v16 = vadd.f32 1.0, %v4610_v44 }
0x1022   : > { %v4612_v40 = vpop.eup %4611 }
0x1023   : > { %4617 = vrcp.f32 %v3402_v16  ;;  %v3408_v14 = vadd.f32 1.0, %v4612_v40  ;;  %v4614_v24 = vpop.eup %4613 }
0x1024   : > { %v4616_v19 = vpop.eup %4615 }
0x1025   : > { %4619 = vrcp.f32 %v3408_v14  ;;  %v3415_v54 = vadd.f32 1.0, %v4616_v19 }
0x1027   : > { %4621 = vrcp.f32 %v3415_v54 }
0x102e   : > { %v4147_v42 = vpop.f32.mrf.mxu0 }
0x102f   : > { %v3545_v33 = vadd.f32 %v4147_v42, %v4100_v53 }
0x1030   : > { %v4618_v6 = vpop.eup %4617  ;;  %v3536_v38 = vpop.f32.mrf.mxu0 }
0x1031   : > { %v3419_v37 = vmul.f32 %v4618_v6, %v4614_v24  ;;  %3570 = vst.msk [vmem:[%s6442_s22 + $0x10] sm:$0xff] %vm3567_vm1, %v3545_v33  ;;  %v3537_v28 = vadd.f32 %v4100_v53, %v3536_v38 }
0x1032   : > { %v4620_v26 = vpop.eup %4619  ;;  %v4148_v55 = vpop.f32.mrf.mxu0 }
0x1033   : > { %v3418_v56 = vmul.f32 %v4620_v26, %v6396_v17  ;;  %3568 = vst.msk [vmem:[%s6442_s22] sm:$0xff] %vm3567_vm1, %v3537_v28  ;;  %v3548_v57 = vadd.f32 %v4148_v55, %v4100_v53 }
0x1034   : > { %v3539_v58 = vpop.f32.mrf.mxu0  ;;  %v4622_v29 = vpop.eup %4621 }
0x1035   : > { %v3420_v59 = vadd.f32 %v3419_v37, %v3418_v56  ;;  %3571 = vst.msk [vmem:[%s6442_s22 + $0x18] sm:$0xff] %vm3567_vm1, %v3548_v57  ;;  %v3540_v60 = vadd.f32 %v4100_v53, %v3539_v58 }
0x1037   : > { %4099 = vst [vmem:[%s5814_s15 + $0x8] sm:$0xff] %v3420_v59  ;;  %3569 = vst.msk [vmem:[%s6442_s22 + $0x8] sm:$0xff] %vm3567_vm1, %v3540_v60  ;;  %4623 = vtanh.f32 %v3420_v59 }
0x1038   : > { %v3639_v47 = vld [vmem:[%s6442_s22 + $0x10] sm:$0xff] (%p6629_p2) }
0x1039   : > { %3640 = vst [vmem:[%s3592_s23 + $0x20] sm:$0xff] (%p6629_p2), %v3639_v47 }
0x103c   : > { %v3641_v3 = vld [vmem:[%s6442_s22 + $0x18] sm:$0xff] (%p6629_p2) }
0x103d   : > { %3642 = vst [vmem:[%s3592_s23 + $0x30] sm:$0xff] (%p6629_p2), %v3641_v3 }
0x103e   : > { %v3637_v1 = vld [vmem:[%s6442_s22 + $0x8] sm:$0xff] (%p6629_p2) }
0x103f   : > { %3638 = vst [vmem:[%s3592_s23 + $0x10] sm:$0xff] (%p6629_p2), %v3637_v1 }
0x1044   : > { %v4624_v39 = vpop.eup %4623 }
0x1045   : > { %v3422_v12 = vmul.f32 %v4624_v39, %v4622_v29 }
0x1047   : > { %4098 = vst [vmem:[%s5818_s21 + $0x8] sm:$0xff] %v3422_v12  ;;  %v3430_v51 = vpack.c.bf16 %v3422_v12, %v6399_v61  ;;  %v3635_v61 = vld [vmem:[%s6442_s22] sm:$0xff] (%p6629_p2) }
0x1048   : > { %3636 = vst [vmem:[%s3592_s23] sm:$0xff] (%p6629_p2), %v3635_v61 }
0x1049   : > { %4150 = vmatmul.mubr.bf16.gmra.mxu0 %v3430_v51 }
0x1109   : > { %v4151_v36 = vpop.f32.mrf.mxu0 }
0x110a   : > { %v3561_v17 = vadd.f32 %v4151_v36, %v4100_v53 }
0x110b   : > { %v3552_v23 = vpop.f32.mrf.mxu0 }
0x110c   : > { %3574 = vst.msk [vmem:[%s6442_s22 + $0x30] sm:$0xff] %vm3567_vm1, %v3561_v17  ;;  %v3553_v7 = vadd.f32 %v4100_v53, %v3552_v23 }
0x110d   : > { %v4152_v45 = vpop.f32.mrf.mxu0 }
0x110e   : > { %3572 = vst.msk [vmem:[%s6442_s22 + $0x20] sm:$0xff] %vm3567_vm1, %v3553_v7  ;;  %v3564_v46 = vadd.f32 %v4152_v45, %v4100_v53  ;;  %3590 = sbr.rel (!%p6629_p2) target bundleno = 4379 (0x111b), region = 194 }
0x110f   : > { %v3555_v10 = vpop.f32.mrf.mxu0 }
0x1110   : > { %3575 = vst.msk [vmem:[%s6442_s22 + $0x38] sm:$0xff] %vm3567_vm1, %v3564_v46  ;;  %v3556_v20 = vadd.f32 %v4100_v53, %v3555_v10 }
0x1112   : > { %3573 = vst.msk [vmem:[%s6442_s22 + $0x28] sm:$0xff] %vm3567_vm1, %v3556_v20 }
0x1113   : > { %v3647_v41 = vld [vmem:[%s6442_s22 + $0x30] sm:$0xff] }
0x1114   : > { %3648 = vst [vmem:[%s3592_s23 + $0x60] sm:$0xff] %v3647_v41 }
0x1115   : > { %v3643_v27 = vld [vmem:[%s6442_s22 + $0x20] sm:$0xff] }
0x1116   : > { %3644 = vst [vmem:[%s3592_s23 + $0x40] sm:$0xff] %v3643_v27 }
0x1117   : > { %v3649_v48 = vld [vmem:[%s6442_s22 + $0x38] sm:$0xff] }
0x1118   : > { %3650 = vst [vmem:[%s3592_s23 + $0x70] sm:$0xff] %v3649_v48 }
0x1119   : > { %v3645_v63 = vld [vmem:[%s6442_s22 + $0x28] sm:$0xff] }
0x111a   : > { %3646 = vst [vmem:[%s3592_s23 + $0x50] sm:$0xff] %v3645_v63 }
0x111b PF: > { %p6630_p1 = scmp.ne.s32.totalorder %s6535_s17, 0 }
0x111c   : > { %s4113_s1 = sshll.u32 (%p6630_p1), %s4891_s28, 3  ;;  %v3689_v32 = vld [vmem:[%s5818_s21] sm:$0xff] (%p6630_p1)  ;;  %v3691_v18 = vld [vmem:[%s5818_s21 + $0x8] sm:$0xff] (%p6630_p1) }
0x111d   : > { %3656 = sbr.rel (!%p6630_p1) target bundleno = 4386 (0x1122), region = 232  ;;  %s3658_s25 = scalar_lea.vmem (%p6630_p1), %s6516_s12, %s4113_s1 }
0x111e   : > { %3690 = vst [vmem:[%s3658_s25] sm:$0xff] (%p6630_p1), %v3689_v32  ;;  %3692 = vst [vmem:[%s3658_s25 + $0x10] sm:$0xff] (%p6630_p1), %v3691_v18 }
0x1122 PF: > { %p6631_p3 = scmp.ne.s32.totalorder %s6535_s17, 0 }
0x1123   : > { %s4114_s30 = sshll.u32 (%p6631_p3), %s4891_s28, 3  ;;  %v3731_v0 = vld [vmem:[%s5814_s15] sm:$0xff] (%p6631_p3)  ;;  %v3733_v62 = vld [vmem:[%s5814_s15 + $0x8] sm:$0xff] (%p6631_p3)  ;;  %s6632_s19 = sld [smem:[#allocation39_spill]] (%p6631_p3) }
0x1124   : > { %3698 = sbr.rel (!%p6631_p3) target bundleno = 4395 (0x112b), region = 270 }
0x1129   : > { %s3700_s21 = scalar_lea.vmem %s6632_s19, %s4114_s30 }
0x112a   : > { %3732 = vst [vmem:[%s3700_s21] sm:$0xff] %v3731_v0  ;;  %3734 = vst [vmem:[%s3700_s21 + $0x10] sm:$0xff] %v3733_v62 }
0x112b PF: > { %s6633_s27 = sld [smem:[#allocation15_spill]]  ;;  %s6635_s25 = smov %s4793_s26 }
0x112c   : > { %s6634_s16 = sld [smem:[#allocation16_spill]] }
0x1131   : > { %p23_p6 = scmp.ge.s32.totalorder %s6633_s27, 4  }
0x1132   : > { %s6636_s26 = smov %s6634_s16 }
0x1133   :  { %25 = sbr.rel (!%p23_p6) target bundleno = 6 (0x6), region = 384 }
0x1138   :  { %3764 = vsyncpa [#allocation4], 1 }
0x1139   :  { %3766 = vsyncpa [#allocation4 + $0x1], 1 }
0x113a   :  { %3767 = vsyncpa [#allocation6], 1 }

</bundles_post_ra>
